<compile_context>
chip_gen: v5e
topology: v5e:2x2
jax: 0.10.0
libtpu: 0.0.40
codegen_flags: <defaults>
</compile_context>

<pallas_src>
import jax
import jax.numpy as jnp
from jax.experimental import pallas as pl
from jax.experimental.pallas import tpu as pltpu

# ----------------------------- configuration (small, consistent with the module) ---
NUM_CLASSES = 10
IN_DIM      = 16
DIM         = 32
NUM_FRAMES  = 8
HEADS       = 4
DIM_HEAD    = 8          # inner_dim = 32 ; heads != 1 -> project_out = True
MLP_DIM     = 64         # NOTE: unused by FeedForward (it is just Linear(dim, dim)), kept for parity
DEPTH       = 2
BATCH       = 2
INNER       = HEADS * DIM_HEAD
SEQ         = NUM_FRAMES + 1          # cls token + frames
LN_EPS      = 1e-5
ATTN_SCALE  = DIM_HEAD ** (-0.5)
G           = HEADS * BATCH           # batched-matmul group count for attention

# dropout / emb_dropout: evaluated in inference mode (identity).
# TODO(synk): train-mode dropout not implemented.


# ----------------------------- small in-kernel helper -------------------------------
def _ln(x, gamma, beta):
    """LayerNorm over the last dim. gamma/beta are (1, DIM) and broadcast."""
    mu = jnp.mean(x, axis=-1, keepdims=True)
    var = jnp.mean(jnp.square(x - mu), axis=-1, keepdims=True)
    return (x - mu) * jax.lax.rsqrt(var + LN_EPS) * gamma + beta


# ----------------------------- the single fused kernel ------------------------------
def _prober_kernel(x2d_ref, projw_ref, projb_ref, cls_ref, pos_ref,
                   ln1g_ref, ln1b_ref, wqkv_ref, wout_ref, bout_ref,
                   ln2g_ref, ln2b_ref, wff_ref, bff_ref,
                   hlng_ref, hlnb_ref, headw_ref, headb_ref,
                   o_ref, h_scr):
    # ---- input projection: flat 2D matmul (B*T, IN_DIM) @ (IN_DIM, DIM) -----------
    proj = jnp.dot(x2d_ref[...], projw_ref[...],
                   preferred_element_type=jnp.float32) + projb_ref[...]
    proj = proj.reshape(BATCH, NUM_FRAMES, DIM)          # leading-dim split only

    # ---- assemble tokens in VMEM scratch: [cls | proj] + pos_embedding ------------
    pos = pos_ref[...]                                   # (1, SEQ, DIM)
    h_scr[:, 0:1, :] = jnp.broadcast_to(cls_ref[...] + pos[:, 0:1, :], (BATCH, 1, DIM))
    h_scr[:, 1:SEQ, :] = proj + pos[:, 1:SEQ, :]
    h = h_scr[...]                                       # (B, SEQ, DIM), stays on-chip

    # ---- transformer layers (static unroll over DEPTH) -----------------------------
    for l in range(DEPTH):
        # --- PreNorm + multi-head self-attention, all (head, batch) pairs batched --
        n = _ln(h, ln1g_ref[l], ln1b_ref[l])             # (B, SEQ, DIM)

        # q/k/v for every head in ONE batched matmul; selection only on leading dims.
        nb = jnp.broadcast_to(n[None], (3 * HEADS, BATCH, SEQ, DIM)
                              ).reshape(3 * G, SEQ, DIM)              # (3G, SEQ, DIM)
        wqkv_g = jnp.broadcast_to(wqkv_ref[l][:, None],
                                  (3 * HEADS, BATCH, DIM, DIM_HEAD)
                                  ).reshape(3 * G, DIM, DIM_HEAD)     # (3G, DIM, Dh)
        qkv = jnp.einsum('gsd,gde->gse', nb, wqkv_g,
                         preferred_element_type=jnp.float32)          # (3G, SEQ, Dh)
        q = qkv[0 * G:1 * G]                              # (G, SEQ, Dh), g = h*B + b
        k = qkv[1 * G:2 * G]
        v = qkv[2 * G:3 * G]

        dots = jnp.einsum('gid,gjd->gij', q, k,
                          preferred_element_type=jnp.float32) * ATTN_SCALE
        dots = dots - jnp.max(dots, axis=-1, keepdims=True)
        e = jnp.exp(dots)
        attn = e * pl.reciprocal(jnp.sum(e, axis=-1, keepdims=True), approx=True)
        out = jnp.einsum('gij,gjd->gid', attn, v,
                         preferred_element_type=jnp.float32)          # (G, SEQ, Dh)

        # Output projection: one batched matmul, then a cheap leading-dim head sum
        # (sum_h o_h @ Wout_h == concat_h(o_h) @ Wout).
        wout_g = jnp.broadcast_to(wout_ref[l][:, None],
                                  (HEADS, BATCH, DIM_HEAD, DIM)
                                  ).reshape(G, DIM_HEAD, DIM)         # (G, Dh, DIM)
        partial = jnp.einsum('gid,gde->gie', out, wout_g,
                             preferred_element_type=jnp.float32)      # (G, SEQ, DIM)
        p4 = partial.reshape(HEADS, BATCH, SEQ, DIM)     # leading-dim split only
        attn_out = p4[0]
        for hh in range(1, HEADS):
            attn_out = attn_out + p4[hh]
        h = h + attn_out + bout_ref[l]                   # residual + to_out bias

        # --- PreNorm + FeedForward (Linear(dim, dim)), flat 2D matmul ---------------
        n2 = _ln(h, ln2g_ref[l], ln2b_ref[l])
        ff = jnp.dot(n2.reshape(BATCH * SEQ, DIM), wff_ref[l],
                     preferred_element_type=jnp.float32) + bff_ref[l]
        h = h + ff.reshape(BATCH, SEQ, DIM)              # residual

    # ---- pool='cls' + mlp_head (LayerNorm -> Linear) -------------------------------
    cls_tok = h[:, 0, :]                                 # (B, DIM)
    hn = _ln(cls_tok, hlng_ref[...], hlnb_ref[...])
    o_ref[...] = jnp.dot(hn, headw_ref[...],
                         preferred_element_type=jnp.float32) + headb_ref[...]


# ----------------------------- parameters (deterministic, synthetic) ----------------
# Stored directly in the kernel-friendly layout:
#   wqkv_h : (DEPTH, 3*HEADS, DIM, DIM_HEAD)   group index = qkv_idx*HEADS + head
#   wout_h : (DEPTH, HEADS, DIM_HEAD, DIM)
# so all in-kernel head selection is along leading dims (no lane slicing).
def init_params(key):
    keys = iter(jax.random.split(key, 32))

    def rnd(shape, scale=0.05):
        return jax.random.normal(next(keys), shape, jnp.float32) * scale

    return dict(
        proj_w=rnd((IN_DIM, DIM)), proj_b=rnd((1, DIM)),
        cls=rnd((1, 1, DIM), 1.0),                        # torch.randn
        pos=rnd((1, SEQ, DIM), 1.0),                      # torch.randn
        ln1_g=1.0 + rnd((DEPTH, 1, DIM)), ln1_b=rnd((DEPTH, 1, DIM)),
        wqkv_h=rnd((DEPTH, 3 * HEADS, DIM, DIM_HEAD)),    # to_qkv (no bias)
        wout_h=rnd((DEPTH, HEADS, DIM_HEAD, DIM)),        # to_out weight
        bout=rnd((DEPTH, 1, DIM)),                        # to_out bias
        ln2_g=1.0 + rnd((DEPTH, 1, DIM)), ln2_b=rnd((DEPTH, 1, DIM)),
        wff=rnd((DEPTH, DIM, DIM)), bff=rnd((DEPTH, 1, DIM)),
        head_ln_g=1.0 + rnd((1, DIM)), head_ln_b=rnd((1, DIM)),
        head_w=rnd((DIM, NUM_CLASSES)), head_b=rnd((1, NUM_CLASSES)),
    )


# ----------------------------- forward (Pallas) --------------------------------------
@jax.jit
def prober_forward(params, x):
    # x: (B, IN_DIM, NUM_FRAMES)  (PyTorch: (B, C, T)).  The only remaining XLA glue
    # is this single tiny NCT->NTC layout op; everything else is inside the kernel.
    xt2d = jnp.transpose(x, (0, 2, 1)).reshape(BATCH * NUM_FRAMES, IN_DIM)
    return pl.pallas_call(
        _prober_kernel,
        out_shape=jax.ShapeDtypeStruct((BATCH, NUM_CLASSES), jnp.float32),
        scratch_shapes=[pltpu.VMEM((BATCH, SEQ, DIM), jnp.float32)],
    )(xt2d, params['proj_w'], params['proj_b'], params['cls'], params['pos'],
      params['ln1_g'], params['ln1_b'], params['wqkv_h'], params['wout_h'],
      params['bout'], params['ln2_g'], params['ln2_b'], params['wff'], params['bff'],
      params['head_ln_g'], params['head_ln_b'], params['head_w'], params['head_b'])


# ----------------------------- pure-JAX reference (torch-faithful) -------------------
def reference_forward(params, x):
    def ln(v, g, b):
        mu = jnp.mean(v, -1, keepdims=True)
        var = jnp.mean((v - mu) ** 2, -1, keepdims=True)
        return (v - mu) / jnp.sqrt(var + LN_EPS) * g + b

    xt = jnp.transpose(x, (0, 2, 1))
    h = xt @ params['proj_w'] + params['proj_b']
    h = jnp.concatenate([jnp.broadcast_to(params['cls'], (BATCH, 1, DIM)), h], axis=1)
    h = h + params['pos'][:, :SEQ]
    for l in range(DEPTH):
        # Reconstruct the torch-layout weights from the kernel layout.
        wqkv = jnp.transpose(params['wqkv_h'][l].reshape(3, HEADS, DIM, DIM_HEAD),
                             (2, 0, 1, 3)).reshape(DIM, 3 * INNER)
        wout = params['wout_h'][l].reshape(INNER, DIM)
        n = ln(h, params['ln1_g'][l], params['ln1_b'][l])
        qkv = n @ wqkv
        q, k, v = jnp.split(qkv, 3, axis=-1)
        q = q.reshape(BATCH, SEQ, HEADS, DIM_HEAD).transpose(0, 2, 1, 3)
        k = k.reshape(BATCH, SEQ, HEADS, DIM_HEAD).transpose(0, 2, 1, 3)
        v = v.reshape(BATCH, SEQ, HEADS, DIM_HEAD).transpose(0, 2, 1, 3)
        dots = jnp.einsum('bhid,bhjd->bhij', q, k) * ATTN_SCALE
        attn = jax.nn.softmax(dots, axis=-1)
        o = jnp.einsum('bhij,bhjd->bhid', attn, v)
        o = o.transpose(0, 2, 1, 3).reshape(BATCH, SEQ, INNER)
        h = h + o @ wout + params['bout'][l]
        n2 = ln(h, params['ln2_g'][l], params['ln2_b'][l])
        h = h + n2 @ params['wff'][l] + params['bff'][l]
    cls_out = h[:, 0, :]
    return (ln(cls_out, params['head_ln_g'], params['head_ln_b'])
            @ params['head_w'] + params['head_b'])


# ----------------------------- main ---------------------------------------------------
if __name__ == "__main__":
    key = jax.random.PRNGKey(0)
    pkey, xkey = jax.random.split(key)
    params = init_params(pkey)
    x = jax.random.normal(xkey, (BATCH, IN_DIM, NUM_FRAMES), jnp.float32)

    out = prober_forward(params, x)
    out = jax.block_until_ready(out)
    assert out.shape == (BATCH, NUM_CLASSES), out.shape

    ref = reference_forward(params, x)
    assert jnp.allclose(out, ref, atol=1e-2, rtol=1e-2), (out, ref)

    print("KERNEL_OK")
</pallas_src>

<mosaic_0001>
module attributes {stable_mosaic.version = 11 : i64} {
  func.func @_prober_kernel(%arg0: memref<16x16xf32, #tpu.memory_space<vmem>>, %arg1: memref<16x32xf32, #tpu.memory_space<vmem>>, %arg2: memref<1x32xf32, #tpu.memory_space<vmem>>, %arg3: memref<1x1x32xf32, #tpu.memory_space<vmem>>, %arg4: memref<1x9x32xf32, #tpu.memory_space<vmem>>, %arg5: memref<2x1x32xf32, #tpu.memory_space<vmem>>, %arg6: memref<2x1x32xf32, #tpu.memory_space<vmem>>, %arg7: memref<2x12x32x8xf32, #tpu.memory_space<vmem>>, %arg8: memref<2x4x8x32xf32, #tpu.memory_space<vmem>>, %arg9: memref<2x1x32xf32, #tpu.memory_space<vmem>>, %arg10: memref<2x1x32xf32, #tpu.memory_space<vmem>>, %arg11: memref<2x1x32xf32, #tpu.memory_space<vmem>>, %arg12: memref<2x32x32xf32, #tpu.memory_space<vmem>>, %arg13: memref<2x1x32xf32, #tpu.memory_space<vmem>>, %arg14: memref<1x32xf32, #tpu.memory_space<vmem>>, %arg15: memref<1x32xf32, #tpu.memory_space<vmem>>, %arg16: memref<32x10xf32, #tpu.memory_space<vmem>>, %arg17: memref<1x10xf32, #tpu.memory_space<vmem>>, %arg18: memref<2x10xf32, #tpu.memory_space<vmem>>, %arg19: memref<2x9x32xf32, #tpu.memory_space<vmem>>) attributes {dimension_semantics = [], scalar_prefetch = 0 : i64, scratch_operands = 1 : i64, tpu.core_type = #tpu.core_type<tc>} {
    %c0 = arith.constant 0 : index
    %c0_0 = arith.constant 0 : index
    %0 = vector.load %arg0[%c0, %c0_0] : memref<16x16xf32, #tpu.memory_space<vmem>>, vector<16x16xf32>
    %c0_1 = arith.constant 0 : index
    %c0_2 = arith.constant 0 : index
    %1 = vector.load %arg1[%c0_1, %c0_2] : memref<16x32xf32, #tpu.memory_space<vmem>>, vector<16x32xf32>
    %cst = arith.constant dense<0.000000e+00> : vector<16x32xf32>
    %2 = tpu.matmul %0, %1, %cst {dimension_numbers = #tpu.dot_dimension_numbers<[1], [0], [0], [1], [0, 0, 1, 1], [], []>} : vector<16x16xf32>, vector<16x32xf32>, vector<16x32xf32> -> vector<16x32xf32>
    %c0_3 = arith.constant 0 : index
    %c0_4 = arith.constant 0 : index
    %3 = vector.load %arg2[%c0_3, %c0_4] : memref<1x32xf32, #tpu.memory_space<vmem>>, vector<1x32xf32>
    %4 = vector.broadcast %3 : vector<1x32xf32> to vector<16x32xf32>
    %5 = arith.addf %2, %4 : vector<16x32xf32>
    %6 = vector.shape_cast %5 : vector<16x32xf32> to vector<2x8x32xf32>
    %c0_5 = arith.constant 0 : index
    %c0_6 = arith.constant 0 : index
    %c0_7 = arith.constant 0 : index
    %7 = vector.load %arg4[%c0_5, %c0_6, %c0_7] : memref<1x9x32xf32, #tpu.memory_space<vmem>>, vector<1x9x32xf32>
    %c0_8 = arith.constant 0 : index
    %c0_9 = arith.constant 0 : index
    %c0_10 = arith.constant 0 : index
    %8 = vector.load %arg3[%c0_8, %c0_9, %c0_10] : memref<1x1x32xf32, #tpu.memory_space<vmem>>, vector<1x1x32xf32>
    %9 = vector.extract_strided_slice %7 {offsets = [0, 0, 0], sizes = [1, 1, 32], strides = [1, 1, 1]} : vector<1x9x32xf32> to vector<1x1x32xf32>
    %10 = arith.addf %8, %9 : vector<1x1x32xf32>
    %11 = vector.shape_cast %10 : vector<1x1x32xf32> to vector<1x1x32xf32>
    %12 = vector.broadcast %11 : vector<1x1x32xf32> to vector<2x1x32xf32>
    %c0_11 = arith.constant 0 : index
    %c0_12 = arith.constant 0 : index
    %c0_13 = arith.constant 0 : index
    %13 = vector.load %arg19[%c0_11, %c0_12, %c0_13] : memref<2x9x32xf32, #tpu.memory_space<vmem>>, vector<2x1x32xf32>
    tpu.vector_store %arg19[%c0_11, %c0_12, %c0_13], %12 {strides = array<i32>} : memref<2x9x32xf32, #tpu.memory_space<vmem>>, vector<2x1x32xf32>,
    %14 = vector.extract_strided_slice %7 {offsets = [0, 1, 0], sizes = [1, 8, 32], strides = [1, 1, 1]} : vector<1x9x32xf32> to vector<1x8x32xf32>
    %15 = vector.broadcast %14 : vector<1x8x32xf32> to vector<2x8x32xf32>
    %16 = arith.addf %6, %15 : vector<2x8x32xf32>
    %c0_14 = arith.constant 0 : index
    %c1 = arith.constant 1 : index
    %c0_15 = arith.constant 0 : index
    %17 = vector.load %arg19[%c0_14, %c1, %c0_15] : memref<2x9x32xf32, #tpu.memory_space<vmem>>, vector<2x8x32xf32>
    tpu.vector_store %arg19[%c0_14, %c1, %c0_15], %16 {strides = array<i32>} : memref<2x9x32xf32, #tpu.memory_space<vmem>>, vector<2x8x32xf32>,
    %c0_16 = arith.constant 0 : index
    %c0_17 = arith.constant 0 : index
    %c0_18 = arith.constant 0 : index
    %18 = vector.load %arg19[%c0_16, %c0_17, %c0_18] : memref<2x9x32xf32, #tpu.memory_space<vmem>>, vector<2x9x32xf32>
    %c0_19 = arith.constant 0 : index
    %c0_20 = arith.constant 0 : index
    %c0_21 = arith.constant 0 : index
    %19 = vector.load %arg5[%c0_19, %c0_20, %c0_21] : memref<2x1x32xf32, #tpu.memory_space<vmem>>, vector<1x1x32xf32>
    %20 = vector.shape_cast %19 : vector<1x1x32xf32> to vector<1x32xf32>
    %c0_22 = arith.constant 0 : index
    %c0_23 = arith.constant 0 : index
    %c0_24 = arith.constant 0 : index
    %21 = vector.load %arg6[%c0_22, %c0_23, %c0_24] : memref<2x1x32xf32, #tpu.memory_space<vmem>>, vector<1x1x32xf32>
    %22 = vector.shape_cast %21 : vector<1x1x32xf32> to vector<1x32xf32>
    %cst_25 = arith.constant dense<0.000000e+00> : vector<2x9xf32>
    %23 = vector.multi_reduction <add>, %18, %cst_25 [2] : vector<2x9x32xf32> to vector<2x9xf32>
    %24 = vector.shape_cast %23 : vector<2x9xf32> to vector<2x9x1xf32>
    %cst_26 = arith.constant 3.200000e+01 : f32
    %25 = vector.broadcast %cst_26 : f32 to vector<2x9x1xf32>
    %26 = arith.divf %24, %25 : vector<2x9x1xf32>
    %27 = vector.broadcast %26 : vector<2x9x1xf32> to vector<2x9x32xf32>
    %28 = arith.subf %18, %27 : vector<2x9x32xf32>
    %29 = arith.mulf %28, %28 : vector<2x9x32xf32>
    %cst_27 = arith.constant dense<0.000000e+00> : vector<2x9xf32>
    %30 = vector.multi_reduction <add>, %29, %cst_27 [2] : vector<2x9x32xf32> to vector<2x9xf32>
    %31 = vector.shape_cast %30 : vector<2x9xf32> to vector<2x9x1xf32>
    %cst_28 = arith.constant 3.200000e+01 : f32
    %32 = vector.broadcast %cst_28 : f32 to vector<2x9x1xf32>
    %33 = arith.divf %31, %32 : vector<2x9x1xf32>
    %34 = vector.broadcast %26 : vector<2x9x1xf32> to vector<2x9x32xf32>
    %35 = arith.subf %18, %34 : vector<2x9x32xf32>
    %cst_29 = arith.constant 9.99999974E-6 : f32
    %36 = vector.broadcast %cst_29 : f32 to vector<2x9x1xf32>
    %37 = arith.addf %33, %36 : vector<2x9x1xf32>
    %38 = math.rsqrt %37 : vector<2x9x1xf32>
    %39 = vector.broadcast %38 : vector<2x9x1xf32> to vector<2x9x32xf32>
    %40 = arith.mulf %35, %39 : vector<2x9x32xf32>
    %41 = vector.shape_cast %20 : vector<1x32xf32> to vector<1x1x32xf32>
    %42 = vector.broadcast %41 : vector<1x1x32xf32> to vector<2x9x32xf32>
    %43 = arith.mulf %40, %42 : vector<2x9x32xf32>
    %44 = vector.shape_cast %22 : vector<1x32xf32> to vector<1x1x32xf32>
    %45 = vector.broadcast %44 : vector<1x1x32xf32> to vector<2x9x32xf32>
    %46 = arith.addf %43, %45 : vector<2x9x32xf32>
    %47 = vector.shape_cast %46 : vector<2x9x32xf32> to vector<1x2x9x32xf32>
    %48 = vector.shape_cast %47 : vector<1x2x9x32xf32> to vector<1x2x9x32xf32>
    %49 = vector.broadcast %48 : vector<1x2x9x32xf32> to vector<12x2x9x32xf32>
    %50 = vector.shape_cast %49 : vector<12x2x9x32xf32> to vector<24x9x32xf32>
    %c0_30 = arith.constant 0 : index
    %c0_31 = arith.constant 0 : index
    %c0_32 = arith.constant 0 : index
    %c0_33 = arith.constant 0 : index
    %51 = vector.load %arg7[%c0_30, %c0_31, %c0_32, %c0_33] : memref<2x12x32x8xf32, #tpu.memory_space<vmem>>, vector<1x12x32x8xf32>
    %52 = vector.shape_cast %51 : vector<1x12x32x8xf32> to vector<12x32x8xf32>
    %53 = vector.shape_cast %52 : vector<12x32x8xf32> to vector<12x1x32x8xf32>
    %54 = vector.shape_cast %53 : vector<12x1x32x8xf32> to vector<12x1x32x8xf32>
    %55 = vector.broadcast %54 : vector<12x1x32x8xf32> to vector<12x2x32x8xf32>
    %56 = vector.shape_cast %55 : vector<12x2x32x8xf32> to vector<24x32x8xf32>
    "tpu.trace_start"() <{level = 10 : i32, message = "gsd,gde->gse"}> : () -> ()
    %cst_34 = arith.constant dense<0.000000e+00> : vector<24x9x8xf32>
    %57 = tpu.matmul %50, %56, %cst_34 {dimension_numbers = #tpu.dot_dimension_numbers<[2], [1], [1], [2], [0, 0, 0, 1, 1, 2], [0], [0]>} : vector<24x9x32xf32>, vector<24x32x8xf32>, vector<24x9x8xf32> -> vector<24x9x8xf32>
    "tpu.trace_stop"() : () -> ()
    %58 = vector.extract_strided_slice %57 {offsets = [0, 0, 0], sizes = [8, 9, 8], strides = [1, 1, 1]} : vector<24x9x8xf32> to vector<8x9x8xf32>
    %59 = vector.extract_strided_slice %57 {offsets = [8, 0, 0], sizes = [8, 9, 8], strides = [1, 1, 1]} : vector<24x9x8xf32> to vector<8x9x8xf32>
    %60 = vector.extract_strided_slice %57 {offsets = [16, 0, 0], sizes = [8, 9, 8], strides = [1, 1, 1]} : vector<24x9x8xf32> to vector<8x9x8xf32>
    "tpu.trace_start"() <{level = 10 : i32, message = "gid,gjd->gij"}> : () -> ()
    %cst_35 = arith.constant dense<0.000000e+00> : vector<8x9x9xf32>
    %61 = tpu.matmul %58, %59, %cst_35 {dimension_numbers = #tpu.dot_dimension_numbers<[2], [2], [1], [1], [0, 0, 0, 1, 1, 1], [0], [0]>} : vector<8x9x8xf32>, vector<8x9x8xf32>, vector<8x9x9xf32> -> vector<8x9x9xf32>
    "tpu.trace_stop"() : () -> ()
    %cst_36 = arith.constant 0.353553385 : f32
    %62 = vector.broadcast %cst_36 : f32 to vector<8x9x9xf32>
    %63 = arith.mulf %61, %62 : vector<8x9x9xf32>
    %cst_37 = arith.constant dense<0xFF800000> : vector<8x9xf32>
    %64 = vector.multi_reduction <maximumf>, %63, %cst_37 [2] : vector<8x9x9xf32> to vector<8x9xf32>
    %65 = vector.shape_cast %64 : vector<8x9xf32> to vector<8x9x1xf32>
    %66 = vector.broadcast %65 : vector<8x9x1xf32> to vector<8x9x9xf32>
    %67 = arith.subf %63, %66 : vector<8x9x9xf32>
    %68 = math.exp %67 : vector<8x9x9xf32>
    %cst_38 = arith.constant dense<0.000000e+00> : vector<8x9xf32>
    %69 = vector.multi_reduction <add>, %68, %cst_38 [2] : vector<8x9x9xf32> to vector<8x9xf32>
    %70 = vector.shape_cast %69 : vector<8x9xf32> to vector<8x9x1xf32>
    %71 = tpu.reciprocal %70 {approx = true} : vector<8x9x1xf32> -> vector<8x9x1xf32>
    %72 = vector.broadcast %71 : vector<8x9x1xf32> to vector<8x9x9xf32>
    %73 = arith.mulf %68, %72 : vector<8x9x9xf32>
    "tpu.trace_start"() <{level = 10 : i32, message = "gij,gjd->gid"}> : () -> ()
    %cst_39 = arith.constant dense<0.000000e+00> : vector<8x9x8xf32>
    %74 = tpu.matmul %73, %60, %cst_39 {dimension_numbers = #tpu.dot_dimension_numbers<[2], [1], [1], [2], [0, 0, 0, 1, 1, 2], [0], [0]>} : vector<8x9x9xf32>, vector<8x9x8xf32>, vector<8x9x8xf32> -> vector<8x9x8xf32>
    "tpu.trace_stop"() : () -> ()
    %c0_40 = arith.constant 0 : index
    %c0_41 = arith.constant 0 : index
    %c0_42 = arith.constant 0 : index
    %c0_43 = arith.constant 0 : index
    %75 = vector.load %arg8[%c0_40, %c0_41, %c0_42, %c0_43] : memref<2x4x8x32xf32, #tpu.memory_space<vmem>>, vector<1x4x8x32xf32>
    %76 = vector.shape_cast %75 : vector<1x4x8x32xf32> to vector<4x8x32xf32>
    %77 = vector.shape_cast %76 : vector<4x8x32xf32> to vector<4x1x8x32xf32>
    %78 = vector.shape_cast %77 : vector<4x1x8x32xf32> to vector<4x1x8x32xf32>
    %79 = vector.broadcast %78 : vector<4x1x8x32xf32> to vector<4x2x8x32xf32>
    %80 = vector.shape_cast %79 : vector<4x2x8x32xf32> to vector<8x8x32xf32>
    "tpu.trace_start"() <{level = 10 : i32, message = "gid,gde->gie"}> : () -> ()
    %cst_44 = arith.constant dense<0.000000e+00> : vector<8x9x32xf32>
    %81 = tpu.matmul %74, %80, %cst_44 {dimension_numbers = #tpu.dot_dimension_numbers<[2], [1], [1], [2], [0, 0, 0, 1, 1, 2], [0], [0]>} : vector<8x9x8xf32>, vector<8x8x32xf32>, vector<8x9x32xf32> -> vector<8x9x32xf32>
    "tpu.trace_stop"() : () -> ()
    %82 = vector.shape_cast %81 : vector<8x9x32xf32> to vector<4x2x9x32xf32>
    %83 = vector.extract_strided_slice %82 {offsets = [0, 0, 0, 0], sizes = [1, 2, 9, 32], strides = [1, 1, 1, 1]} : vector<4x2x9x32xf32> to vector<1x2x9x32xf32>
    %84 = vector.shape_cast %83 : vector<1x2x9x32xf32> to vector<2x9x32xf32>
    %85 = vector.extract_strided_slice %82 {offsets = [1, 0, 0, 0], sizes = [1, 2, 9, 32], strides = [1, 1, 1, 1]} : vector<4x2x9x32xf32> to vector<1x2x9x32xf32>
    %86 = vector.shape_cast %85 : vector<1x2x9x32xf32> to vector<2x9x32xf32>
    %87 = arith.addf %84, %86 : vector<2x9x32xf32>
    %88 = vector.extract_strided_slice %82 {offsets = [2, 0, 0, 0], sizes = [1, 2, 9, 32], strides = [1, 1, 1, 1]} : vector<4x2x9x32xf32> to vector<1x2x9x32xf32>
    %89 = vector.shape_cast %88 : vector<1x2x9x32xf32> to vector<2x9x32xf32>
    %90 = arith.addf %87, %89 : vector<2x9x32xf32>
    %91 = vector.extract_strided_slice %82 {offsets = [3, 0, 0, 0], sizes = [1, 2, 9, 32], strides = [1, 1, 1, 1]} : vector<4x2x9x32xf32> to vector<1x2x9x32xf32>
    %92 = vector.shape_cast %91 : vector<1x2x9x32xf32> to vector<2x9x32xf32>
    %93 = arith.addf %90, %92 : vector<2x9x32xf32>
    %94 = arith.addf %18, %93 : vector<2x9x32xf32>
    %c0_45 = arith.constant 0 : index
    %c0_46 = arith.constant 0 : index
    %c0_47 = arith.constant 0 : index
    %95 = vector.load %arg9[%c0_45, %c0_46, %c0_47] : memref<2x1x32xf32, #tpu.memory_space<vmem>>, vector<1x1x32xf32>
    %96 = vector.shape_cast %95 : vector<1x1x32xf32> to vector<1x32xf32>
    %97 = vector.shape_cast %96 : vector<1x32xf32> to vector<1x1x32xf32>
    %98 = vector.broadcast %97 : vector<1x1x32xf32> to vector<2x9x32xf32>
    %99 = arith.addf %94, %98 : vector<2x9x32xf32>
    %c0_48 = arith.constant 0 : index
    %c0_49 = arith.constant 0 : index
    %c0_50 = arith.constant 0 : index
    %100 = vector.load %arg10[%c0_48, %c0_49, %c0_50] : memref<2x1x32xf32, #tpu.memory_space<vmem>>, vector<1x1x32xf32>
    %101 = vector.shape_cast %100 : vector<1x1x32xf32> to vector<1x32xf32>
    %c0_51 = arith.constant 0 : index
    %c0_52 = arith.constant 0 : index
    %c0_53 = arith.constant 0 : index
    %102 = vector.load %arg11[%c0_51, %c0_52, %c0_53] : memref<2x1x32xf32, #tpu.memory_space<vmem>>, vector<1x1x32xf32>
    %103 = vector.shape_cast %102 : vector<1x1x32xf32> to vector<1x32xf32>
    %cst_54 = arith.constant dense<0.000000e+00> : vector<2x9xf32>
    %104 = vector.multi_reduction <add>, %99, %cst_54 [2] : vector<2x9x32xf32> to vector<2x9xf32>
    %105 = vector.shape_cast %104 : vector<2x9xf32> to vector<2x9x1xf32>
    %cst_55 = arith.constant 3.200000e+01 : f32
    %106 = vector.broadcast %cst_55 : f32 to vector<2x9x1xf32>
    %107 = arith.divf %105, %106 : vector<2x9x1xf32>
    %108 = vector.broadcast %107 : vector<2x9x1xf32> to vector<2x9x32xf32>
    %109 = arith.subf %99, %108 : vector<2x9x32xf32>
    %110 = arith.mulf %109, %109 : vector<2x9x32xf32>
    %cst_56 = arith.constant dense<0.000000e+00> : vector<2x9xf32>
    %111 = vector.multi_reduction <add>, %110, %cst_56 [2] : vector<2x9x32xf32> to vector<2x9xf32>
    %112 = vector.shape_cast %111 : vector<2x9xf32> to vector<2x9x1xf32>
    %cst_57 = arith.constant 3.200000e+01 : f32
    %113 = vector.broadcast %cst_57 : f32 to vector<2x9x1xf32>
    %114 = arith.divf %112, %113 : vector<2x9x1xf32>
    %115 = vector.broadcast %107 : vector<2x9x1xf32> to vector<2x9x32xf32>
    %116 = arith.subf %99, %115 : vector<2x9x32xf32>
    %cst_58 = arith.constant 9.99999974E-6 : f32
    %117 = vector.broadcast %cst_58 : f32 to vector<2x9x1xf32>
    %118 = arith.addf %114, %117 : vector<2x9x1xf32>
    %119 = math.rsqrt %118 : vector<2x9x1xf32>
    %120 = vector.broadcast %119 : vector<2x9x1xf32> to vector<2x9x32xf32>
    %121 = arith.mulf %116, %120 : vector<2x9x32xf32>
    %122 = vector.shape_cast %101 : vector<1x32xf32> to vector<1x1x32xf32>
    %123 = vector.broadcast %122 : vector<1x1x32xf32> to vector<2x9x32xf32>
    %124 = arith.mulf %121, %123 : vector<2x9x32xf32>
    %125 = vector.shape_cast %103 : vector<1x32xf32> to vector<1x1x32xf32>
    %126 = vector.broadcast %125 : vector<1x1x32xf32> to vector<2x9x32xf32>
    %127 = arith.addf %124, %126 : vector<2x9x32xf32>
    %128 = vector.shape_cast %127 : vector<2x9x32xf32> to vector<18x32xf32>
    %c0_59 = arith.constant 0 : index
    %c0_60 = arith.constant 0 : index
    %c0_61 = arith.constant 0 : index
    %129 = vector.load %arg12[%c0_59, %c0_60, %c0_61] : memref<2x32x32xf32, #tpu.memory_space<vmem>>, vector<1x32x32xf32>
    %130 = vector.shape_cast %129 : vector<1x32x32xf32> to vector<32x32xf32>
    %cst_62 = arith.constant dense<0.000000e+00> : vector<18x32xf32>
    %131 = tpu.matmul %128, %130, %cst_62 {dimension_numbers = #tpu.dot_dimension_numbers<[1], [0], [0], [1], [0, 0, 1, 1], [], []>} : vector<18x32xf32>, vector<32x32xf32>, vector<18x32xf32> -> vector<18x32xf32>
    %c0_63 = arith.constant 0 : index
    %c0_64 = arith.constant 0 : index
    %c0_65 = arith.constant 0 : index
    %132 = vector.load %arg13[%c0_63, %c0_64, %c0_65] : memref<2x1x32xf32, #tpu.memory_space<vmem>>, vector<1x1x32xf32>
    %133 = vector.shape_cast %132 : vector<1x1x32xf32> to vector<1x32xf32>
    %134 = vector.broadcast %133 : vector<1x32xf32> to vector<18x32xf32>
    %135 = arith.addf %131, %134 : vector<18x32xf32>
    %136 = vector.shape_cast %135 : vector<18x32xf32> to vector<2x9x32xf32>
    %137 = arith.addf %99, %136 : vector<2x9x32xf32>
    %c1_66 = arith.constant 1 : index
    %c0_67 = arith.constant 0 : index
    %c0_68 = arith.constant 0 : index
    %138 = vector.load %arg5[%c1_66, %c0_67, %c0_68] : memref<2x1x32xf32, #tpu.memory_space<vmem>>, vector<1x1x32xf32>
    %139 = vector.shape_cast %138 : vector<1x1x32xf32> to vector<1x32xf32>
    %c1_69 = arith.constant 1 : index
    %c0_70 = arith.constant 0 : index
    %c0_71 = arith.constant 0 : index
    %140 = vector.load %arg6[%c1_69, %c0_70, %c0_71] : memref<2x1x32xf32, #tpu.memory_space<vmem>>, vector<1x1x32xf32>
    %141 = vector.shape_cast %140 : vector<1x1x32xf32> to vector<1x32xf32>
    %cst_72 = arith.constant dense<0.000000e+00> : vector<2x9xf32>
    %142 = vector.multi_reduction <add>, %137, %cst_72 [2] : vector<2x9x32xf32> to vector<2x9xf32>
    %143 = vector.shape_cast %142 : vector<2x9xf32> to vector<2x9x1xf32>
    %cst_73 = arith.constant 3.200000e+01 : f32
    %144 = vector.broadcast %cst_73 : f32 to vector<2x9x1xf32>
    %145 = arith.divf %143, %144 : vector<2x9x1xf32>
    %146 = vector.broadcast %145 : vector<2x9x1xf32> to vector<2x9x32xf32>
    %147 = arith.subf %137, %146 : vector<2x9x32xf32>
    %148 = arith.mulf %147, %147 : vector<2x9x32xf32>
    %cst_74 = arith.constant dense<0.000000e+00> : vector<2x9xf32>
    %149 = vector.multi_reduction <add>, %148, %cst_74 [2] : vector<2x9x32xf32> to vector<2x9xf32>
    %150 = vector.shape_cast %149 : vector<2x9xf32> to vector<2x9x1xf32>
    %cst_75 = arith.constant 3.200000e+01 : f32
    %151 = vector.broadcast %cst_75 : f32 to vector<2x9x1xf32>
    %152 = arith.divf %150, %151 : vector<2x9x1xf32>
    %153 = vector.broadcast %145 : vector<2x9x1xf32> to vector<2x9x32xf32>
    %154 = arith.subf %137, %153 : vector<2x9x32xf32>
    %cst_76 = arith.constant 9.99999974E-6 : f32
    %155 = vector.broadcast %cst_76 : f32 to vector<2x9x1xf32>
    %156 = arith.addf %152, %155 : vector<2x9x1xf32>
    %157 = math.rsqrt %156 : vector<2x9x1xf32>
    %158 = vector.broadcast %157 : vector<2x9x1xf32> to vector<2x9x32xf32>
    %159 = arith.mulf %154, %158 : vector<2x9x32xf32>
    %160 = vector.shape_cast %139 : vector<1x32xf32> to vector<1x1x32xf32>
    %161 = vector.broadcast %160 : vector<1x1x32xf32> to vector<2x9x32xf32>
    %162 = arith.mulf %159, %161 : vector<2x9x32xf32>
    %163 = vector.shape_cast %141 : vector<1x32xf32> to vector<1x1x32xf32>
    %164 = vector.broadcast %163 : vector<1x1x32xf32> to vector<2x9x32xf32>
    %165 = arith.addf %162, %164 : vector<2x9x32xf32>
    %166 = vector.shape_cast %165 : vector<2x9x32xf32> to vector<1x2x9x32xf32>
    %167 = vector.shape_cast %166 : vector<1x2x9x32xf32> to vector<1x2x9x32xf32>
    %168 = vector.broadcast %167 : vector<1x2x9x32xf32> to vector<12x2x9x32xf32>
    %169 = vector.shape_cast %168 : vector<12x2x9x32xf32> to vector<24x9x32xf32>
    %c1_77 = arith.constant 1 : index
    %c0_78 = arith.constant 0 : index
    %c0_79 = arith.constant 0 : index
    %c0_80 = arith.constant 0 : index
    %170 = vector.load %arg7[%c1_77, %c0_78, %c0_79, %c0_80] : memref<2x12x32x8xf32, #tpu.memory_space<vmem>>, vector<1x12x32x8xf32>
    %171 = vector.shape_cast %170 : vector<1x12x32x8xf32> to vector<12x32x8xf32>
    %172 = vector.shape_cast %171 : vector<12x32x8xf32> to vector<12x1x32x8xf32>
    %173 = vector.shape_cast %172 : vector<12x1x32x8xf32> to vector<12x1x32x8xf32>
    %174 = vector.broadcast %173 : vector<12x1x32x8xf32> to vector<12x2x32x8xf32>
    %175 = vector.shape_cast %174 : vector<12x2x32x8xf32> to vector<24x32x8xf32>
    "tpu.trace_start"() <{level = 10 : i32, message = "gsd,gde->gse"}> : () -> ()
    %cst_81 = arith.constant dense<0.000000e+00> : vector<24x9x8xf32>
    %176 = tpu.matmul %169, %175, %cst_81 {dimension_numbers = #tpu.dot_dimension_numbers<[2], [1], [1], [2], [0, 0, 0, 1, 1, 2], [0], [0]>} : vector<24x9x32xf32>, vector<24x32x8xf32>, vector<24x9x8xf32> -> vector<24x9x8xf32>
    "tpu.trace_stop"() : () -> ()
    %177 = vector.extract_strided_slice %176 {offsets = [0, 0, 0], sizes = [8, 9, 8], strides = [1, 1, 1]} : vector<24x9x8xf32> to vector<8x9x8xf32>
    %178 = vector.extract_strided_slice %176 {offsets = [8, 0, 0], sizes = [8, 9, 8], strides = [1, 1, 1]} : vector<24x9x8xf32> to vector<8x9x8xf32>
    %179 = vector.extract_strided_slice %176 {offsets = [16, 0, 0], sizes = [8, 9, 8], strides = [1, 1, 1]} : vector<24x9x8xf32> to vector<8x9x8xf32>
    "tpu.trace_start"() <{level = 10 : i32, message = "gid,gjd->gij"}> : () -> ()
    %cst_82 = arith.constant dense<0.000000e+00> : vector<8x9x9xf32>
    %180 = tpu.matmul %177, %178, %cst_82 {dimension_numbers = #tpu.dot_dimension_numbers<[2], [2], [1], [1], [0, 0, 0, 1, 1, 1], [0], [0]>} : vector<8x9x8xf32>, vector<8x9x8xf32>, vector<8x9x9xf32> -> vector<8x9x9xf32>
    "tpu.trace_stop"() : () -> ()
    %cst_83 = arith.constant 0.353553385 : f32
    %181 = vector.broadcast %cst_83 : f32 to vector<8x9x9xf32>
    %182 = arith.mulf %180, %181 : vector<8x9x9xf32>
    %cst_84 = arith.constant dense<0xFF800000> : vector<8x9xf32>
    %183 = vector.multi_reduction <maximumf>, %182, %cst_84 [2] : vector<8x9x9xf32> to vector<8x9xf32>
    %184 = vector.shape_cast %183 : vector<8x9xf32> to vector<8x9x1xf32>
    %185 = vector.broadcast %184 : vector<8x9x1xf32> to vector<8x9x9xf32>
    %186 = arith.subf %182, %185 : vector<8x9x9xf32>
    %187 = math.exp %186 : vector<8x9x9xf32>
    %cst_85 = arith.constant dense<0.000000e+00> : vector<8x9xf32>
    %188 = vector.multi_reduction <add>, %187, %cst_85 [2] : vector<8x9x9xf32> to vector<8x9xf32>
    %189 = vector.shape_cast %188 : vector<8x9xf32> to vector<8x9x1xf32>
    %190 = tpu.reciprocal %189 {approx = true} : vector<8x9x1xf32> -> vector<8x9x1xf32>
    %191 = vector.broadcast %190 : vector<8x9x1xf32> to vector<8x9x9xf32>
    %192 = arith.mulf %187, %191 : vector<8x9x9xf32>
    "tpu.trace_start"() <{level = 10 : i32, message = "gij,gjd->gid"}> : () -> ()
    %cst_86 = arith.constant dense<0.000000e+00> : vector<8x9x8xf32>
    %193 = tpu.matmul %192, %179, %cst_86 {dimension_numbers = #tpu.dot_dimension_numbers<[2], [1], [1], [2], [0, 0, 0, 1, 1, 2], [0], [0]>} : vector<8x9x9xf32>, vector<8x9x8xf32>, vector<8x9x8xf32> -> vector<8x9x8xf32>
    "tpu.trace_stop"() : () -> ()
    %c1_87 = arith.constant 1 : index
    %c0_88 = arith.constant 0 : index
    %c0_89 = arith.constant 0 : index
    %c0_90 = arith.constant 0 : index
    %194 = vector.load %arg8[%c1_87, %c0_88, %c0_89, %c0_90] : memref<2x4x8x32xf32, #tpu.memory_space<vmem>>, vector<1x4x8x32xf32>
    %195 = vector.shape_cast %194 : vector<1x4x8x32xf32> to vector<4x8x32xf32>
    %196 = vector.shape_cast %195 : vector<4x8x32xf32> to vector<4x1x8x32xf32>
    %197 = vector.shape_cast %196 : vector<4x1x8x32xf32> to vector<4x1x8x32xf32>
    %198 = vector.broadcast %197 : vector<4x1x8x32xf32> to vector<4x2x8x32xf32>
    %199 = vector.shape_cast %198 : vector<4x2x8x32xf32> to vector<8x8x32xf32>
    "tpu.trace_start"() <{level = 10 : i32, message = "gid,gde->gie"}> : () -> ()
    %cst_91 = arith.constant dense<0.000000e+00> : vector<8x9x32xf32>
    %200 = tpu.matmul %193, %199, %cst_91 {dimension_numbers = #tpu.dot_dimension_numbers<[2], [1], [1], [2], [0, 0, 0, 1, 1, 2], [0], [0]>} : vector<8x9x8xf32>, vector<8x8x32xf32>, vector<8x9x32xf32> -> vector<8x9x32xf32>
    "tpu.trace_stop"() : () -> ()
    %201 = vector.shape_cast %200 : vector<8x9x32xf32> to vector<4x2x9x32xf32>
    %202 = vector.extract_strided_slice %201 {offsets = [0, 0, 0, 0], sizes = [1, 2, 9, 32], strides = [1, 1, 1, 1]} : vector<4x2x9x32xf32> to vector<1x2x9x32xf32>
    %203 = vector.shape_cast %202 : vector<1x2x9x32xf32> to vector<2x9x32xf32>
    %204 = vector.extract_strided_slice %201 {offsets = [1, 0, 0, 0], sizes = [1, 2, 9, 32], strides = [1, 1, 1, 1]} : vector<4x2x9x32xf32> to vector<1x2x9x32xf32>
    %205 = vector.shape_cast %204 : vector<1x2x9x32xf32> to vector<2x9x32xf32>
    %206 = arith.addf %203, %205 : vector<2x9x32xf32>
    %207 = vector.extract_strided_slice %201 {offsets = [2, 0, 0, 0], sizes = [1, 2, 9, 32], strides = [1, 1, 1, 1]} : vector<4x2x9x32xf32> to vector<1x2x9x32xf32>
    %208 = vector.shape_cast %207 : vector<1x2x9x32xf32> to vector<2x9x32xf32>
    %209 = arith.addf %206, %208 : vector<2x9x32xf32>
    %210 = vector.extract_strided_slice %201 {offsets = [3, 0, 0, 0], sizes = [1, 2, 9, 32], strides = [1, 1, 1, 1]} : vector<4x2x9x32xf32> to vector<1x2x9x32xf32>
    %211 = vector.shape_cast %210 : vector<1x2x9x32xf32> to vector<2x9x32xf32>
    %212 = arith.addf %209, %211 : vector<2x9x32xf32>
    %213 = arith.addf %137, %212 : vector<2x9x32xf32>
    %c1_92 = arith.constant 1 : index
    %c0_93 = arith.constant 0 : index
    %c0_94 = arith.constant 0 : index
    %214 = vector.load %arg9[%c1_92, %c0_93, %c0_94] : memref<2x1x32xf32, #tpu.memory_space<vmem>>, vector<1x1x32xf32>
    %215 = vector.shape_cast %214 : vector<1x1x32xf32> to vector<1x32xf32>
    %216 = vector.shape_cast %215 : vector<1x32xf32> to vector<1x1x32xf32>
    %217 = vector.broadcast %216 : vector<1x1x32xf32> to vector<2x9x32xf32>
    %218 = arith.addf %213, %217 : vector<2x9x32xf32>
    %c1_95 = arith.constant 1 : index
    %c0_96 = arith.constant 0 : index
    %c0_97 = arith.constant 0 : index
    %219 = vector.load %arg10[%c1_95, %c0_96, %c0_97] : memref<2x1x32xf32, #tpu.memory_space<vmem>>, vector<1x1x32xf32>
    %220 = vector.shape_cast %219 : vector<1x1x32xf32> to vector<1x32xf32>
    %c1_98 = arith.constant 1 : index
    %c0_99 = arith.constant 0 : index
    %c0_100 = arith.constant 0 : index
    %221 = vector.load %arg11[%c1_98, %c0_99, %c0_100] : memref<2x1x32xf32, #tpu.memory_space<vmem>>, vector<1x1x32xf32>
    %222 = vector.shape_cast %221 : vector<1x1x32xf32> to vector<1x32xf32>
    %cst_101 = arith.constant dense<0.000000e+00> : vector<2x9xf32>
    %223 = vector.multi_reduction <add>, %218, %cst_101 [2] : vector<2x9x32xf32> to vector<2x9xf32>
    %224 = vector.shape_cast %223 : vector<2x9xf32> to vector<2x9x1xf32>
    %cst_102 = arith.constant 3.200000e+01 : f32
    %225 = vector.broadcast %cst_102 : f32 to vector<2x9x1xf32>
    %226 = arith.divf %224, %225 : vector<2x9x1xf32>
    %227 = vector.broadcast %226 : vector<2x9x1xf32> to vector<2x9x32xf32>
    %228 = arith.subf %218, %227 : vector<2x9x32xf32>
    %229 = arith.mulf %228, %228 : vector<2x9x32xf32>
    %cst_103 = arith.constant dense<0.000000e+00> : vector<2x9xf32>
    %230 = vector.multi_reduction <add>, %229, %cst_103 [2] : vector<2x9x32xf32> to vector<2x9xf32>
    %231 = vector.shape_cast %230 : vector<2x9xf32> to vector<2x9x1xf32>
    %cst_104 = arith.constant 3.200000e+01 : f32
    %232 = vector.broadcast %cst_104 : f32 to vector<2x9x1xf32>
    %233 = arith.divf %231, %232 : vector<2x9x1xf32>
    %234 = vector.broadcast %226 : vector<2x9x1xf32> to vector<2x9x32xf32>
    %235 = arith.subf %218, %234 : vector<2x9x32xf32>
    %cst_105 = arith.constant 9.99999974E-6 : f32
    %236 = vector.broadcast %cst_105 : f32 to vector<2x9x1xf32>
    %237 = arith.addf %233, %236 : vector<2x9x1xf32>
    %238 = math.rsqrt %237 : vector<2x9x1xf32>
    %239 = vector.broadcast %238 : vector<2x9x1xf32> to vector<2x9x32xf32>
    %240 = arith.mulf %235, %239 : vector<2x9x32xf32>
    %241 = vector.shape_cast %220 : vector<1x32xf32> to vector<1x1x32xf32>
    %242 = vector.broadcast %241 : vector<1x1x32xf32> to vector<2x9x32xf32>
    %243 = arith.mulf %240, %242 : vector<2x9x32xf32>
    %244 = vector.shape_cast %222 : vector<1x32xf32> to vector<1x1x32xf32>
    %245 = vector.broadcast %244 : vector<1x1x32xf32> to vector<2x9x32xf32>
    %246 = arith.addf %243, %245 : vector<2x9x32xf32>
    %247 = vector.shape_cast %246 : vector<2x9x32xf32> to vector<18x32xf32>
    %c1_106 = arith.constant 1 : index
    %c0_107 = arith.constant 0 : index
    %c0_108 = arith.constant 0 : index
    %248 = vector.load %arg12[%c1_106, %c0_107, %c0_108] : memref<2x32x32xf32, #tpu.memory_space<vmem>>, vector<1x32x32xf32>
    %249 = vector.shape_cast %248 : vector<1x32x32xf32> to vector<32x32xf32>
    %cst_109 = arith.constant dense<0.000000e+00> : vector<18x32xf32>
    %250 = tpu.matmul %247, %249, %cst_109 {dimension_numbers = #tpu.dot_dimension_numbers<[1], [0], [0], [1], [0, 0, 1, 1], [], []>} : vector<18x32xf32>, vector<32x32xf32>, vector<18x32xf32> -> vector<18x32xf32>
    %c1_110 = arith.constant 1 : index
    %c0_111 = arith.constant 0 : index
    %c0_112 = arith.constant 0 : index
    %251 = vector.load %arg13[%c1_110, %c0_111, %c0_112] : memref<2x1x32xf32, #tpu.memory_space<vmem>>, vector<1x1x32xf32>
    %252 = vector.shape_cast %251 : vector<1x1x32xf32> to vector<1x32xf32>
    %253 = vector.broadcast %252 : vector<1x32xf32> to vector<18x32xf32>
    %254 = arith.addf %250, %253 : vector<18x32xf32>
    %255 = vector.shape_cast %254 : vector<18x32xf32> to vector<2x9x32xf32>
    %256 = arith.addf %218, %255 : vector<2x9x32xf32>
    %257 = vector.extract_strided_slice %256 {offsets = [0, 0, 0], sizes = [2, 1, 32], strides = [1, 1, 1]} : vector<2x9x32xf32> to vector<2x1x32xf32>
    %258 = vector.shape_cast %257 : vector<2x1x32xf32> to vector<2x32xf32>
    %c0_113 = arith.constant 0 : index
    %c0_114 = arith.constant 0 : index
    %259 = vector.load %arg14[%c0_113, %c0_114] : memref<1x32xf32, #tpu.memory_space<vmem>>, vector<1x32xf32>
    %c0_115 = arith.constant 0 : index
    %c0_116 = arith.constant 0 : index
    %260 = vector.load %arg15[%c0_115, %c0_116] : memref<1x32xf32, #tpu.memory_space<vmem>>, vector<1x32xf32>
    %cst_117 = arith.constant dense<0.000000e+00> : vector<2xf32>
    %261 = vector.multi_reduction <add>, %258, %cst_117 [1] : vector<2x32xf32> to vector<2xf32>
    %262 = vector.shape_cast %261 : vector<2xf32> to vector<2x1xf32>
    %cst_118 = arith.constant 3.200000e+01 : f32
    %263 = vector.broadcast %cst_118 : f32 to vector<2x1xf32>
    %264 = arith.divf %262, %263 : vector<2x1xf32>
    %265 = vector.broadcast %264 : vector<2x1xf32> to vector<2x32xf32>
    %266 = arith.subf %258, %265 : vector<2x32xf32>
    %267 = arith.mulf %266, %266 : vector<2x32xf32>
    %cst_119 = arith.constant dense<0.000000e+00> : vector<2xf32>
    %268 = vector.multi_reduction <add>, %267, %cst_119 [1] : vector<2x32xf32> to vector<2xf32>
    %269 = vector.shape_cast %268 : vector<2xf32> to vector<2x1xf32>
    %cst_120 = arith.constant 3.200000e+01 : f32
    %270 = vector.broadcast %cst_120 : f32 to vector<2x1xf32>
    %271 = arith.divf %269, %270 : vector<2x1xf32>
    %272 = vector.broadcast %264 : vector<2x1xf32> to vector<2x32xf32>
    %273 = arith.subf %258, %272 : vector<2x32xf32>
    %cst_121 = arith.constant 9.99999974E-6 : f32
    %274 = vector.broadcast %cst_121 : f32 to vector<2x1xf32>
    %275 = arith.addf %271, %274 : vector<2x1xf32>
    %276 = math.rsqrt %275 : vector<2x1xf32>
    %277 = vector.broadcast %276 : vector<2x1xf32> to vector<2x32xf32>
    %278 = arith.mulf %273, %277 : vector<2x32xf32>
    %279 = vector.broadcast %259 : vector<1x32xf32> to vector<2x32xf32>
    %280 = arith.mulf %278, %279 : vector<2x32xf32>
    %281 = vector.broadcast %260 : vector<1x32xf32> to vector<2x32xf32>
    %282 = arith.addf %280, %281 : vector<2x32xf32>
    %c0_122 = arith.constant 0 : index
    %c0_123 = arith.constant 0 : index
    %283 = vector.load %arg16[%c0_122, %c0_123] : memref<32x10xf32, #tpu.memory_space<vmem>>, vector<32x10xf32>
    %cst_124 = arith.constant dense<0.000000e+00> : vector<2x10xf32>
    %284 = tpu.matmul %282, %283, %cst_124 {dimension_numbers = #tpu.dot_dimension_numbers<[1], [0], [0], [1], [0, 0, 1, 1], [], []>} : vector<2x32xf32>, vector<32x10xf32>, vector<2x10xf32> -> vector<2x10xf32>
    %c0_125 = arith.constant 0 : index
    %c0_126 = arith.constant 0 : index
    %285 = vector.load %arg17[%c0_125, %c0_126] : memref<1x10xf32, #tpu.memory_space<vmem>>, vector<1x10xf32>
    %286 = vector.broadcast %285 : vector<1x10xf32> to vector<2x10xf32>
    %287 = arith.addf %284, %286 : vector<2x10xf32>
    %c0_127 = arith.constant 0 : index
    %c0_128 = arith.constant 0 : index
    %288 = vector.load %arg18[%c0_127, %c0_128] : memref<2x10xf32, #tpu.memory_space<vmem>>, vector<2x10xf32>
    tpu.vector_store %arg18[%c0_127, %c0_128], %287 {strides = array<i32>} : memref<2x10xf32, #tpu.memory_space<vmem>>, vector<2x10xf32>,
    return
  }
}

</mosaic_0001>

<bundles_post_ra>
// kernel: prober_forward.1
= control target key start
LH: loop header
LB: loop body
LE: loop exit
PB: predicated region body
PF: predicated region fallthrough
CT: control target
= control target key end

     0   :  { %s6147_s0 = inlined_call_operand.vmem [shape: f32[16,16], index: 0, kind: input, shape index: {}]   ;;  %s6148_s1 = inlined_call_operand.vmem [shape: f32[16,32], index: 1, kind: input, shape index: {}]   ;;  %s6149_s2 = inlined_call_operand.vmem [shape: f32[1,32], index: 2, kind: input, shape index: {}]   ;;  %s6150_s3 = inlined_call_operand.vmem [shape: f32[1,1,32], index: 3, kind: input, shape index: {}]   ;;  %s6151_s4 = inlined_call_operand.vmem [shape: f32[1,9,32], index: 4, kind: input, shape index: {}]   ;;  %s6152_s5 = inlined_call_operand.vmem [shape: f32[2,1,32], index: 5, kind: input, shape index: {}]   ;;  %s6153_s6 = inlined_call_operand.vmem [shape: f32[2,1,32], index: 6, kind: input, shape index: {}]   ;;  %s6154_s7 = inlined_call_operand.vmem [shape: f32[2,12,32,8], index: 7, kind: input, shape index: {}]   ;;  %s6155_s8 = inlined_call_operand.vmem [shape: f32[2,4,8,32], index: 8, kind: input, shape index: {}]   ;;  %s6156_s9 = inlined_call_operand.vmem [shape: f32[2,1,32], index: 9, kind: input, shape index: {}]   ;;  %s6157_s10 = inlined_call_operand.vmem [shape: f32[2,1,32], index: 10, kind: input, shape index: {}]   ;;  %s6158_s11 = inlined_call_operand.vmem [shape: f32[2,1,32], index: 11, kind: input, shape index: {}]   ;;  %s6159_s12 = inlined_call_operand.vmem [shape: f32[2,32,32], index: 12, kind: input, shape index: {}]   ;;  %s6160_s13 = inlined_call_operand.vmem [shape: f32[2,1,32], index: 13, kind: input, shape index: {}]   ;;  %s6161_s14 = inlined_call_operand.vmem [shape: f32[1,32], index: 14, kind: input, shape index: {}]   ;;  %s6162_s15 = inlined_call_operand.vmem [shape: f32[1,32], index: 15, kind: input, shape index: {}]   ;;  %s6163_s16 = inlined_call_operand.vmem [shape: f32[32,10], index: 16, kind: input, shape index: {}]   ;;  %s6164_s17 = inlined_call_operand.vmem [shape: f32[1,10], index: 17, kind: input, shape index: {}]   ;;  %s6165_s18 = inlined_call_operand.hbm [shape: f32[2,10], index: 18, kind: output, shape index: {}]  }
   0x1   :  { %6168 = sst [smem:[#allocation6_spill]] %s6147_s0 }
   0x2   :  { %6169 = sst [smem:[#allocation7_spill]] %s6148_s1 }
   0x3   :  { %6170 = sst [smem:[#allocation8_spill]] %s6149_s2 }
   0x4   :  { %s6171_s29 = sld [smem:[#allocation7_spill]]  ;;  %vm68_vm0 = vcmask 130048  }
   0x5   :  { %s6172_s20 = sld [smem:[#allocation6_spill]] }
   0xa   :  { %v63_v0 = vld [vmem:[%s6171_s29 + $0x8] sm:$0xff]  ;;  %v62_v1 = vld [vmem:[%s6171_s29] sm:$0xff] }
   0xb   :  { %89 = vmatpush.msra.mxu0 %v63_v0  ;;  %v60_v2 = vld [vmem:[%s6172_s20] sm:$0xff] }
   0xd   :  { %90 = vmatpush.msra.mxu0 %v62_v1 }
   0xe   :  { %4142 = vmatmul.msk.f32.vlgmr.msra.gmra.mxu0 %vm68_vm0, %v60_v2 }
   0xf   :  { %23 = vsyncpa [#allocation4], 0  ;;  %v61_v3 = vld [vmem:[%s6172_s20 + $0x8] sm:$0xff]  ;;  %v98_v4 = vld [vmem:[%s6151_s4] sm:$0xff]  ;;  %vm102_vm1 = vcmask 253952   ;;  %s6173_s30 = sld [smem:[#allocation8_spill]] }
  0x10   :  { %v100_v5 = vld [vmem:[%s6150_s3] sm:$0x1]  ;;  %v99_v7 = vld [vmem:[%s6151_s4 + $0x8] sm:$0x1]  ;;  %v108_v8 = vrot.slane %v98_v4, 1  ;;  %vm107_vm2 = vcmask 1046528  }
  0x11   :  { %v101_v6 = vadd.f32 %v100_v5, %v98_v4  ;;  %v109_v9 = vrot.slane %v99_v7, 1  ;;  %vm114_vm3 = vcmask 261120   ;;  %v4669_v26 = vmov 32.0   ;;  %v235_v53 = vld [vmem:[%s6154_s7 + $0x18] sm:$0xff]  ;;  %v234_v55 = vld [vmem:[%s6154_s7 + $0x10] sm:$0xff]  ;;  %v233_v57 = vld [vmem:[%s6154_s7 + $0x8] sm:$0xff] }
  0x12   :  { %4475 = vrcp.f32 %v4669_v26  ;;  %v239_v54 = vld [vmem:[%s6154_s7 + $0x38] sm:$0xff]  ;;  %298 = vmatpush.msra.mxu1 %v235_v53  ;;  %v238_v56 = vld [vmem:[%s6154_s7 + $0x30] sm:$0xff]  ;;  %327 = vmatpush.msra.mxu2 %v235_v53  ;;  %v237_v58 = vld [vmem:[%s6154_s7 + $0x28] sm:$0xff]  ;;  %s4133_s20 = sshll.u32 %s6165_s18, 4  ;;  %s4134_s20 = int_to_ptr.hbm [resolvable:$true] %s4133_s20 }
  0x13   :  { %103 = vst.msk [vmem:[#allocation2] sm:$0x1] %vm102_vm1, %v101_v6  ;;  %v110_v12 = vsel %vm107_vm2, %v108_v8, %v109_v9  ;;  %350 = vmatpush.msrb.mxu0 %v239_v54  ;;  %4453 = vmatpush.msra.mxu3 %v239_v54  ;;  %v232_v59 = vld [vmem:[%s6154_s7] sm:$0xff]  ;;  %v4851_v61 = vld [vmem:[%s6154_s7 + $0x78] sm:$0xff]  ;;  %v4857_v0 = vld [vmem:[%s6154_s7 + $0x70] sm:$0xff]  ;;  %vm844_vm2 = vcmask 64512  }
  0x14   :  { %104 = vst.msk [vmem:[#allocation2 + $0x10] sm:$0x1] %vm102_vm1, %v101_v6  ;;  %299 = vmatpush.msra.mxu1 %v234_v55  ;;  %328 = vmatpush.msra.mxu2 %v234_v55  ;;  %v236_v60 = vld [vmem:[%s6154_s7 + $0x20] sm:$0xff]  ;;  %v243_v7 = vld [vmem:[%s6154_s7 + $0x58] sm:$0xff]  ;;  %v242_v8 = vld [vmem:[%s6154_s7 + $0x50] sm:$0xff] }
  0x15   :  { %v4459_v10 = vld [vmem:[%s6173_s30] ss:$0 sm:$0xff]  ;;  %351 = vmatpush.msrb.mxu0 %v238_v56  ;;  %4454 = vmatpush.msra.mxu3 %v238_v56  ;;  %v251_v55 = vld [vmem:[%s6154_s7 + $0x98] sm:$0xff] }
  0x16   :  { %4143 = vmatmul.msk.f32.gmra.mxu0 %vm68_vm0, %v61_v3  ;;  %300 = vmatpush.msra.mxu1 %v233_v57  ;;  %v4865_v3 = vld [vmem:[%s6154_s7 + $0x68] sm:$0xff]  ;;  %v4871_v6 = vld [vmem:[%s6154_s7 + $0x60] sm:$0xff] }
  0x17   :  { %352 = vmatpush.msrb.mxu0 %v237_v58  ;;  %4455 = vmatpush.msra.mxu3 %v237_v58 }
  0x18   :  { %v4476_v27 = vpop.eup %4475  ;;  %329 = vmatpush.msra.mxu2 %v233_v57  ;;  %301 = vmatpush.msra.mxu1 %v232_v59  ;;  %v254_v57 = vld [vmem:[%s6154_s7 + $0xb0] sm:$0xff] }
  0x19   :  { %v136_v28 = vmul.f32 32.0, %v4476_v27  ;;  %vm140_vm4 = vweird.f32 %v4476_v27  ;;  %353 = vmatpush.msrb.mxu0 %v236_v60  ;;  %4456 = vmatpush.msra.mxu3 %v236_v60 }
  0x1a   :  { %330 = vmatpush.msra.mxu2 %v232_v59  ;;  %396 = vmatpush.msrb.mxu1 %v243_v7  ;;  %v250_v59 = vld [vmem:[%s6154_s7 + $0x90] sm:$0xff] }
  0x1b   :  { %v137_v29 = vsub.f32 1.0, %v136_v28  ;;  %373 = vmatpush.msra.mxu0 %v239_v54  ;;  %442 = vmatpush.msrb.mxu3 %v4851_v61 }
  0x1c   :  { %419 = vmatpush.msrb.mxu2 %v243_v7  ;;  %397 = vmatpush.msrb.mxu1 %v242_v8  ;;  %v261_v7 = vld [vmem:[%s6154_s7 + $0xe8] sm:$0xff] }
  0x1d   :  { %v138_v30 = vmul.f32 %v4476_v27, %v137_v29  ;;  %374 = vmatpush.msra.mxu0 %v238_v56  ;;  %443 = vmatpush.msrb.mxu3 %v4857_v0 }
  0x1e   :  { %420 = vmatpush.msrb.mxu2 %v242_v8  ;;  %v260_v8 = vld [vmem:[%s6154_s7 + $0xe0] sm:$0xff] }
  0x1f   :  { %v139_v31 = vadd.f32 %v4476_v27, %v138_v30  ;;  %375 = vmatpush.msra.mxu0 %v237_v58  ;;  %444 = vmatpush.msrb.mxu3 %v4865_v3 }
  0x21   :  { %v4798_v32 = vsel %vm140_vm4, %v4476_v27, %v139_v31  ;;  %376 = vmatpush.msra.mxu0 %v236_v60  ;;  %445 = vmatpush.msrb.mxu3 %v4871_v6  ;;  %v4460_v31 = vld [vmem:[%s6152_s5] ss:$0 sm:$0xff]  ;;  %vm1325_vm4 = vcmask 1040384  }
  0x8b   :  { %v92_v11 = vpop.f32.mrf.mxu0 }
  0x8c   :  { %v93_v13 = vadd.f32 %v4459_v10, %v92_v11  ;;  %v241_v11 = vld [vmem:[%s6154_s7 + $0x48] sm:$0xff] }
  0x8d   :  { %398 = vmatpush.msrb.mxu1 %v241_v11  ;;  %421 = vmatpush.msrb.mxu2 %v241_v11  ;;  %v256_v11 = vld [vmem:[%s6154_s7 + $0xc0] sm:$0xff] }
  0x8e   :  { %v112_v14 = vadd.f32 %v110_v12, %v93_v13 }
  0x90   :  { %115 = vst.msk [vmem:[#allocation2 + $0x1] sm:$0xff] %vm114_vm3, %v112_v14  ;;  %v240_v14 = vld [vmem:[%s6154_s7 + $0x40] sm:$0xff] }
  0x91   :  { %399 = vmatpush.msrb.mxu1 %v240_v14  ;;  %422 = vmatpush.msrb.mxu2 %v240_v14  ;;  %v269_v14 = vld [vmem:[%s6154_s7 + $0x128] sm:$0xff] }
  0x93   :  { %v95_v15 = vpop.f32.mrf.mxu0 }
  0x94   :  { %v96_v16 = vadd.f32 %v4459_v10, %v95_v15 }
  0x96   :  { %v113_v17 = vadd.f32 %v110_v12, %v96_v16 }
  0x97   :  { %v118_v18 = vld [vmem:[#allocation2 + $0x8] sm:$0x1]  ;;  %v117_v19 = vld [vmem:[#allocation2] sm:$0xff] }
  0x98   :  { %116 = vst.msk [vmem:[#allocation2 + $0x11] sm:$0xff] %vm114_vm3, %v113_v17  ;;  %v126_v20 = vsel %vm102_vm1, %v118_v18, 0.0  ;;  %v123_v21 = vsel %vm114_vm3, %v117_v19, 0.0 }
  0x99   :  { %127 = vadd.xlane.f32.xlu0 %v126_v20  ;;  %124 = vadd.xlane.f32.xlu1 %v123_v21 }
  0x9f   :  { %v119_v22 = vld [vmem:[#allocation2 + $0x10] sm:$0xff]  ;;  %v120_v23 = vld [vmem:[#allocation2 + $0x18] sm:$0x1] }
  0xa0   :  { %v129_v24 = vsel %vm114_vm3, %v119_v22, 0.0  ;;  %v132_v25 = vsel %vm102_vm1, %v120_v23, 0.0 }
  0xa1   :  { %130 = vadd.xlane.f32.xlu0 %v129_v24  ;;  %133 = vadd.xlane.f32.xlu1 %v132_v25 }
 0x10c   :  { %v128_v33 = vpop.xlane.xlu0 %127  ;;  %v125_v34 = vpop.xlane.xlu1 %124 }
 0x10d   :  { %v143_v35 = vmul.f32 %v4798_v32, %v128_v33  ;;  %v142_v36 = vmul.f32 %v4798_v32, %v125_v34 }
 0x10f   :  { %v4802_v37 = vsub.f32 %v118_v18, %v143_v35  ;;  %v4804_v38 = vsub.f32 %v117_v19, %v142_v36 }
 0x111   :  { %v151_v39 = vmul.f32 %v4802_v37, %v4802_v37  ;;  %v150_v40 = vmul.f32 %v4804_v38, %v4804_v38 }
 0x113   :  { %v157_v41 = vsel %vm102_vm1, %v151_v39, 0.0  ;;  %v154_v42 = vsel %vm114_vm3, %v150_v40, 0.0  ;;  %v4461_v39 = vld [vmem:[%s6153_s6] ss:$0 sm:$0xff] }
 0x114   :  { %158 = vadd.xlane.f32.xlu2 %v157_v41  ;;  %v131_v43 = vpop.xlane.xlu0 %130  ;;  %155 = vadd.xlane.f32.xlu0 %v154_v42  ;;  %v134_v44 = vpop.xlane.xlu1 %133 }
 0x115   :  { %v144_v45 = vmul.f32 %v4798_v32, %v131_v43  ;;  %v145_v46 = vmul.f32 %v4798_v32, %v134_v44 }
 0x117   :  { %v4814_v47 = vsub.f32 %v119_v22, %v144_v45  ;;  %v4816_v48 = vsub.f32 %v120_v23, %v145_v46 }
 0x119   :  { %v152_v49 = vmul.f32 %v4814_v47, %v4814_v47  ;;  %v153_v50 = vmul.f32 %v4816_v48, %v4816_v48 }
 0x11b   :  { %v160_v51 = vsel %vm114_vm3, %v152_v49, 0.0  ;;  %v163_v52 = vsel %vm102_vm1, %v153_v50, 0.0 }
 0x11c   :  { %161 = vadd.xlane.f32.xlu2 %v160_v51  ;;  %164 = vadd.xlane.f32.xlu1 %v163_v52 }
 0x187   :  { %v159_v62 = vpop.xlane.xlu2 %158  ;;  %v156_v63 = vpop.xlane.xlu0 %155 }
 0x188   :  { %v167_v1 = vmul.f32 %v159_v62, %v4798_v32  ;;  %v166_v2 = vmul.f32 %v156_v63, %v4798_v32  ;;  %v253_v62 = vld [vmem:[%s6154_s7 + $0xa8] sm:$0xff] }
 0x18a   :  { %v171_v4 = vadd.f32 1e-05, %v167_v1  ;;  %v170_v5 = vadd.f32 1e-05, %v166_v2  ;;  %v252_v2 = vld [vmem:[%s6154_s7 + $0xa0] sm:$0xff] }
 0x18c   :  { %4477 = vrsqrt.f32 %v171_v4  ;;  %vm190_vm7 = vweird.f32 %v171_v4  ;;  %vm180_vm9 = vweird.f32 %v170_v5 }
 0x18d   :  { %4479 = vrsqrt.f32 %v170_v5 }
 0x18f   :  { %v162_v9 = vpop.xlane.xlu2 %161  ;;  %v165_v10 = vpop.xlane.xlu1 %164 }
 0x190   :  { %v168_v12 = vmul.f32 %v162_v9, %v4798_v32  ;;  %v169_v13 = vmul.f32 %v165_v10, %v4798_v32  ;;  %v258_v9 = vld [vmem:[%s6154_s7 + $0xd0] sm:$0xff]  ;;  %v257_v10 = vld [vmem:[%s6154_s7 + $0xc8] sm:$0xff] }
 0x192   :  { %v4478_v15 = vpop.eup %4477  ;;  %v172_v16 = vadd.f32 1e-05, %v168_v12  ;;  %v173_v17 = vadd.f32 1e-05, %v169_v13  ;;  %v271_v12 = vld [vmem:[%s6154_s7 + $0x138] sm:$0xff]  ;;  %v270_v13 = vld [vmem:[%s6154_s7 + $0x130] sm:$0xff] }
 0x193   :  { %v4480_v18 = vpop.eup %4479  ;;  %v185_v19 = vmul.f32 %v4478_v15, %v171_v4  ;;  %vm191_vm5 = vweird.f32 %v4478_v15  ;;  %v262_v4 = vld [vmem:[%s6154_s7 + $0xf0] sm:$0xff] }
 0x194   :  { %v175_v20 = vmul.f32 %v4480_v18, %v170_v5  ;;  %4481 = vrsqrt.f32 %v172_v16  ;;  %vm181_vm6 = vweird.f32 %v4480_v18  ;;  %vm192_vm8 = vmor %vm190_vm7, %vm191_vm5  ;;  %vm200_vm12 = vweird.f32 %v172_v16 }
 0x195   :  { %v186_v21 = vmul.f32 %v4478_v15, %v185_v19  ;;  %4483 = vrsqrt.f32 %v173_v17  ;;  %vm182_vm10 = vmor %vm180_vm9, %vm181_vm6  ;;  %vm210_vm15 = vweird.f32 %v173_v17  ;;  %v264_v19 = vld [vmem:[%s6154_s7 + $0x100] sm:$0xff]  ;;  %vm1141_vm5 = vcmask 72704  }
 0x196   :  { %v176_v22 = vmul.f32 %v4480_v18, %v175_v20  ;;  %v279_v20 = vld [vmem:[%s6154_s7 + $0x178] sm:$0xff]  ;;  %vm1145_vm6 = vcmask 65536  }
 0x197   :  { %v187_v23 = vmul.f32 0.5, %v186_v21  ;;  %v278_v21 = vld [vmem:[%s6154_s7 + $0x170] sm:$0xff] }
 0x198   :  { %v177_v24 = vmul.f32 0.5, %v176_v22  ;;  %v277_v22 = vld [vmem:[%s6154_s7 + $0x168] sm:$0xff] }
 0x199   :  { %v188_v25 = vsub.f32 1.5, %v187_v23  ;;  %v276_v23 = vld [vmem:[%s6154_s7 + $0x160] sm:$0xff] }
 0x19a   :  { %v4482_v26 = vpop.eup %4481  ;;  %v178_v27 = vsub.f32 1.5, %v177_v24  ;;  %v275_v24 = vld [vmem:[%s6154_s7 + $0x158] sm:$0xff] }
 0x19b   :  { %v4484_v28 = vpop.eup %4483  ;;  %v189_v29 = vmul.f32 %v4478_v15, %v188_v25  ;;  %v195_v30 = vmul.f32 %v4482_v26, %v172_v16  ;;  %vm201_vm11 = vweird.f32 %v4482_v26  ;;  %v267_v16 = vld [vmem:[%s6154_s7 + $0x118] sm:$0xff]  ;;  %v274_v25 = vld [vmem:[%s6154_s7 + $0x150] sm:$0xff] }
 0x19c   :  { %v179_v33 = vmul.f32 %v4480_v18, %v178_v27  ;;  %v205_v34 = vmul.f32 %v4484_v28, %v173_v17  ;;  %vm211_vm13 = vweird.f32 %v4484_v28  ;;  %vm202_vm14 = vmor %vm200_vm12, %vm201_vm11  ;;  %v266_v17 = vld [vmem:[%s6154_s7 + $0x110] sm:$0xff]  ;;  %v272_v27 = vld [vmem:[%s6154_s7 + $0x140] sm:$0xff] }
 0x19d   :  { %v193_v35 = vsel %vm192_vm8, %v4478_v15, %v189_v29  ;;  %v196_v36 = vmul.f32 %v4482_v26, %v195_v30  ;;  %vm212_vm0 = vmor %vm210_vm15, %vm211_vm13  ;;  %v268_v15 = vld [vmem:[%s6154_s7 + $0x120] sm:$0xff] }
 0x19e   :  { %v215_v40 = vmul.f32 %v193_v35, %v4802_v37  ;;  %v183_v41 = vsel %vm182_vm10, %v4480_v18, %v179_v33  ;;  %v206_v42 = vmul.f32 %v4484_v28, %v205_v34  ;;  %v255_v37 = vld [vmem:[%s6154_s7 + $0xb8] sm:$0xff]  ;;  %v265_v18 = vld [vmem:[%s6154_s7 + $0x108] sm:$0xff] }
 0x19f   :  { %v214_v43 = vmul.f32 %v183_v41, %v4804_v38  ;;  %v197_v44 = vmul.f32 0.5, %v196_v36 }
 0x1a0   :  { %v222_v45 = vmul.f32 %v4460_v31, %v215_v40  ;;  %v207_v46 = vmul.f32 0.5, %v206_v42 }
 0x1a1   :  { %v221_v49 = vmul.f32 %v4460_v31, %v214_v43  ;;  %v198_v50 = vsub.f32 1.5, %v197_v44 }
 0x1a2   :  { %v4896_v51 = vadd.f32 %v4461_v39, %v222_v45  ;;  %v208_v52 = vsub.f32 1.5, %v207_v46 }
 0x1a3   :  { %v4898_v53 = vadd.f32 %v4461_v39, %v221_v49  ;;  %v199_v54 = vmul.f32 %v4482_v26, %v198_v50 }
 0x1a4   :  { %v209_v38 = vmul.f32 %v4484_v28, %v208_v52  ;;  %4149 = vmatmul.msk.f32.vlgmr.msra.gmra.mxu3 %vm114_vm3, %v4896_v51 }
 0x1a5   :  { %v203_v56 = vsel %vm202_vm14, %v4482_v26, %v199_v54  ;;  %4144 = vmatmul.msk.f32.vlgmr.msra.gmra.mxu1 %vm114_vm3, %v4898_v53  ;;  %4148 = vmatmul.msk.f32.vlgmr.msrb.gmra.mxu0 %vm114_vm3, %v4898_v53  ;;  %v273_v26 = vld [vmem:[%s6154_s7 + $0x148] sm:$0xff] }
 0x1a6   :  { %v216_v58 = vmul.f32 %v203_v56, %v4814_v47  ;;  %465 = vmatpush.msrb.mxu0 %v4851_v61  ;;  %534 = vmatpush.msra.mxu3 %v255_v37  ;;  %v213_v60 = vsel %vm212_vm0, %v4484_v28, %v209_v38  ;;  %v249_v47 = vld [vmem:[%s6154_s7 + $0x88] sm:$0xff] }
 0x1a7   :  { %488 = vmatpush.msra.mxu1 %v251_v55  ;;  %v217_v1 = vmul.f32 %v213_v60, %v4816_v48  ;;  %v263_v48 = vld [vmem:[%s6154_s7 + $0xf8] sm:$0xff] }
 0x1a8   :  { %v223_v63 = vmul.f32 %v4460_v31, %v216_v58  ;;  %466 = vmatpush.msrb.mxu0 %v4857_v0  ;;  %535 = vmatpush.msra.mxu3 %v254_v57  ;;  %v248_v0 = vld [vmem:[%s6154_s7 + $0x80] sm:$0xff] }
 0x1a9   :  { %489 = vmatpush.msra.mxu1 %v250_v59 }
 0x1aa   :  { %v4927_v61 = vadd.f32 %v4461_v39, %v223_v63  ;;  %467 = vmatpush.msrb.mxu0 %v4865_v3  ;;  %536 = vmatpush.msra.mxu3 %v253_v62  ;;  %v224_v3 = vmul.f32 %v4460_v31, %v217_v1 }
 0x1ab   :  { %490 = vmatpush.msra.mxu1 %v249_v47 }
 0x1ac   :  { %4146 = vmatmul.msk.f32.vlgmr.msra.gmra.mxu2 %vm114_vm3, %v4927_v61  ;;  %4156 = vmatmul.msk.f32.vlgmr.msrb.gmra.mxu3 %vm114_vm3, %v4898_v53  ;;  %v4952_v5 = vadd.f32 %v4461_v39, %v224_v3 }
 0x1ad   :  { %4145 = vmatmul.msk.f32.gmra.mxu1 %vm114_vm3, %v4896_v51  ;;  %4150 = vmatmul.msk.f32.vlgmr.msra.gmra.mxu0 %vm114_vm3, %v4927_v61 }
 0x1ae   :  { %468 = vmatpush.msrb.mxu0 %v4871_v6  ;;  %537 = vmatpush.msra.mxu3 %v252_v2  ;;  %v259_v6 = vld [vmem:[%s6154_s7 + $0xd8] sm:$0xff] }
 0x1af   :  { %491 = vmatpush.msra.mxu1 %v248_v0  ;;  %511 = vmatpush.msra.mxu2 %v251_v55 }
 0x1b0   :  { %557 = vmatpush.msra.mxu0 %v255_v37  ;;  %626 = vmatpush.msrb.mxu3 %v263_v48 }
 0x1b1   :  { %512 = vmatpush.msra.mxu2 %v250_v59 }
 0x1b2   :  { %558 = vmatpush.msra.mxu0 %v254_v57  ;;  %627 = vmatpush.msrb.mxu3 %v262_v4 }
 0x1b3   :  { %513 = vmatpush.msra.mxu2 %v249_v47 }
 0x1b4   :  { %4147 = vmatmul.msk.f32.gmra.mxu2 %vm114_vm3, %v4952_v5  ;;  %4157 = vmatmul.msk.f32.gmra.mxu3 %vm114_vm3, %v4896_v51 }
 0x1b5   :  { %4151 = vmatmul.msk.f32.gmra.mxu0 %vm114_vm3, %v4952_v5  ;;  %4152 = vmatmul.msk.f32.vlgmr.msrb.gmra.mxu1 %vm114_vm3, %v4898_v53 }
 0x1b6   :  { %559 = vmatpush.msra.mxu0 %v253_v62  ;;  %628 = vmatpush.msrb.mxu3 %v261_v7 }
 0x1b7   :  { %514 = vmatpush.msra.mxu2 %v248_v0  ;;  %580 = vmatpush.msrb.mxu1 %v259_v6 }
 0x1b8   :  { %560 = vmatpush.msra.mxu0 %v252_v2  ;;  %629 = vmatpush.msrb.mxu3 %v260_v8 }
 0x1b9   :  { %581 = vmatpush.msrb.mxu1 %v258_v9 }
 0x1bb   :  { %582 = vmatpush.msrb.mxu1 %v257_v10 }
 0x1bc   :  { %4154 = vmatmul.msk.f32.vlgmr.msrb.gmra.mxu2 %vm114_vm3, %v4927_v61  ;;  %4164 = vmatmul.msk.f32.vlgmr.msra.gmra.mxu3 %vm114_vm3, %v4898_v53 }
 0x1bd   :  { %4153 = vmatmul.msk.f32.gmra.mxu1 %vm114_vm3, %v4896_v51  ;;  %4158 = vmatmul.msk.f32.vlgmr.msrb.gmra.mxu0 %vm114_vm3, %v4927_v61 }
 0x1be   :  { %583 = vmatpush.msrb.mxu1 %v256_v11  ;;  %603 = vmatpush.msrb.mxu2 %v259_v6 }
 0x1bf   :  { %649 = vmatpush.msrb.mxu0 %v263_v48  ;;  %718 = vmatpush.msra.mxu3 %v271_v12 }
 0x1c0   :  { %604 = vmatpush.msrb.mxu2 %v258_v9 }
 0x1c1   :  { %650 = vmatpush.msrb.mxu0 %v262_v4  ;;  %719 = vmatpush.msra.mxu3 %v270_v13 }
 0x1c2   :  { %605 = vmatpush.msrb.mxu2 %v257_v10 }
 0x1c3   :  { %651 = vmatpush.msrb.mxu0 %v261_v7  ;;  %720 = vmatpush.msra.mxu3 %v269_v14 }
 0x1c4   :  { %4155 = vmatmul.msk.f32.gmra.mxu2 %vm114_vm3, %v4952_v5  ;;  %4165 = vmatmul.msk.f32.gmra.mxu3 %vm114_vm3, %v4896_v51 }
 0x1c5   :  { %4159 = vmatmul.msk.f32.gmra.mxu0 %vm114_vm3, %v4952_v5  ;;  %4160 = vmatmul.msk.f32.vlgmr.msra.gmra.mxu1 %vm114_vm3, %v4898_v53 }
 0x1c6   :  { %606 = vmatpush.msrb.mxu2 %v256_v11  ;;  %652 = vmatpush.msrb.mxu0 %v260_v8 }
 0x1c7   :  { %721 = vmatpush.msra.mxu3 %v268_v15  ;;  %672 = vmatpush.msra.mxu1 %v267_v16 }
 0x1c9   :  { %673 = vmatpush.msra.mxu1 %v266_v17 }
 0x1cb   :  { %674 = vmatpush.msra.mxu1 %v265_v18 }
 0x1cc   :  { %4162 = vmatmul.msk.f32.vlgmr.msra.gmra.mxu2 %vm114_vm3, %v4927_v61  ;;  %4172 = vmatmul.msk.f32.vlgmr.msrb.gmra.mxu3 %vm114_vm3, %v4898_v53 }
 0x1cd   :  { %4161 = vmatmul.msk.f32.gmra.mxu1 %vm114_vm3, %v4896_v51  ;;  %4166 = vmatmul.msk.f32.vlgmr.msra.gmra.mxu0 %vm114_vm3, %v4927_v61 }
 0x1ce   :  { %675 = vmatpush.msra.mxu1 %v264_v19  ;;  %695 = vmatpush.msra.mxu2 %v267_v16 }
 0x1cf   :  { %741 = vmatpush.msra.mxu0 %v271_v12  ;;  %810 = vmatpush.msrb.mxu3 %v279_v20 }
 0x1d0   :  { %696 = vmatpush.msra.mxu2 %v266_v17 }
 0x1d1   :  { %742 = vmatpush.msra.mxu0 %v270_v13  ;;  %811 = vmatpush.msrb.mxu3 %v278_v21 }
 0x1d2   :  { %697 = vmatpush.msra.mxu2 %v265_v18 }
 0x1d3   :  { %743 = vmatpush.msra.mxu0 %v269_v14  ;;  %812 = vmatpush.msrb.mxu3 %v277_v22 }
 0x1d4   :  { %4163 = vmatmul.msk.f32.gmra.mxu2 %vm114_vm3, %v4952_v5  ;;  %4173 = vmatmul.msk.f32.gmra.mxu3 %vm114_vm3, %v4896_v51 }
 0x1d5   :  { %4167 = vmatmul.msk.f32.gmra.mxu0 %vm114_vm3, %v4952_v5  ;;  %4168 = vmatmul.msk.f32.vlgmr.msrb.gmra.mxu1 %vm114_vm3, %v4898_v53 }
 0x1d6   :  { %698 = vmatpush.msra.mxu2 %v264_v19  ;;  %744 = vmatpush.msra.mxu0 %v268_v15 }
 0x1d7   :  { %813 = vmatpush.msrb.mxu3 %v276_v23  ;;  %764 = vmatpush.msrb.mxu1 %v275_v24 }
 0x1d9   :  { %765 = vmatpush.msrb.mxu1 %v274_v25 }
 0x1db   :  { %766 = vmatpush.msrb.mxu1 %v273_v26 }
 0x1dc   :  { %4170 = vmatmul.msk.f32.vlgmr.msrb.gmra.mxu2 %vm114_vm3, %v4927_v61  ;;  %4180 = vmatmul.msk.f32.vlgmr.msra.gmra.mxu3 %vm114_vm3, %v4898_v53 }
 0x1dd   :  { %4169 = vmatmul.msk.f32.gmra.mxu1 %vm114_vm3, %v4896_v51  ;;  %4174 = vmatmul.msk.f32.vlgmr.msrb.gmra.mxu0 %vm114_vm3, %v4927_v61 }
 0x1de   :  { %767 = vmatpush.msrb.mxu1 %v272_v27  ;;  %787 = vmatpush.msrb.mxu2 %v275_v24 }
 0x1df   :  { %833 = vmatpush.msrb.mxu0 %v279_v20 }
 0x1e0   :  { %788 = vmatpush.msrb.mxu2 %v274_v25 }
 0x1e1   :  { %834 = vmatpush.msrb.mxu0 %v278_v21 }
 0x1e2   :  { %789 = vmatpush.msrb.mxu2 %v273_v26 }
 0x1e3   :  { %835 = vmatpush.msrb.mxu0 %v277_v22 }
 0x1e4   :  { %4171 = vmatmul.msk.f32.gmra.mxu2 %vm114_vm3, %v4952_v5  ;;  %4181 = vmatmul.msk.f32.gmra.mxu3 %vm114_vm3, %v4896_v51 }
 0x1e5   :  { %4175 = vmatmul.msk.f32.gmra.mxu0 %vm114_vm3, %v4952_v5  ;;  %4176 = vmatmul.msk.f32.vlgmr.msra.gmra.mxu1 %vm114_vm3, %v4898_v53 }
 0x1e6   :  { %790 = vmatpush.msrb.mxu2 %v272_v27  ;;  %836 = vmatpush.msrb.mxu0 %v276_v23 }
 0x1ec   :  { %4178 = vmatmul.msk.f32.vlgmr.msra.gmra.mxu2 %vm114_vm3, %v4927_v61  ;;  %4188 = vmatmul.msk.f32.vlgmr.msrb.gmra.mxu3 %vm114_vm3, %v4898_v53 }
 0x1ed   :  { %4177 = vmatmul.msk.f32.gmra.mxu1 %vm114_vm3, %v4896_v51  ;;  %4182 = vmatmul.msk.f32.vlgmr.msra.gmra.mxu0 %vm114_vm3, %v4927_v61 }
 0x1f4   :  { %4179 = vmatmul.msk.f32.gmra.mxu2 %vm114_vm3, %v4952_v5  ;;  %4189 = vmatmul.msk.f32.gmra.mxu3 %vm114_vm3, %v4896_v51 }
 0x1f5   :  { %4183 = vmatmul.msk.f32.gmra.mxu0 %vm114_vm3, %v4952_v5  ;;  %4184 = vmatmul.msk.f32.vlgmr.msrb.gmra.mxu1 %vm114_vm3, %v4898_v53 }
 0x1fc   :  { %4186 = vmatmul.msk.f32.vlgmr.msrb.gmra.mxu2 %vm114_vm3, %v4927_v61 }
 0x1fd   :  { %4185 = vmatmul.msk.f32.gmra.mxu1 %vm114_vm3, %v4896_v51  ;;  %4190 = vmatmul.msk.f32.vlgmr.msrb.gmra.mxu0 %vm114_vm3, %v4927_v61 }
 0x204   :  { %4187 = vmatmul.msk.f32.gmra.mxu2 %vm114_vm3, %v4952_v5 }
 0x205   :  { %4191 = vmatmul.msk.f32.gmra.mxu0 %vm114_vm3, %v4952_v5 }
 0x222   :  { %v303_v28 = vpop.f32.mrf.mxu1  ;;  %v355_v29 = vpop.f32.mrf.mxu0 }
 0x227   :  { %v358_v30 = vpop.f32.mrf.mxu3 }
 0x22a   :  { %v306_v31 = vpop.f32.mrf.mxu1  ;;  %v378_v33 = vpop.f32.mrf.mxu0 }
 0x22f   :  { %v332_v34 = vpop.f32.mrf.mxu2  ;;  %v447_v35 = vpop.f32.mrf.mxu3 }
 0x232   :  { %v381_v36 = vpop.f32.mrf.mxu0  ;;  %v401_v39 = vpop.f32.mrf.mxu1 }
 0x237   :  { %v335_v40 = vpop.f32.mrf.mxu2  ;;  %v450_v41 = vpop.f32.mrf.mxu3 }
 0x23a   :  { %v404_v42 = vpop.f32.mrf.mxu1  ;;  %v470_v43 = vpop.f32.mrf.mxu0 }
 0x23f   :  { %v424_v44 = vpop.f32.mrf.mxu2  ;;  %v539_v45 = vpop.f32.mrf.mxu3 }
 0x242   :  { %v473_v46 = vpop.f32.mrf.mxu0  ;;  %v493_v49 = vpop.f32.mrf.mxu1 }
 0x247   :  { %v5102_v50 = vpop.f32.mrf.mxu2  ;;  %v542_v51 = vpop.f32.mrf.mxu3 }
 0x248   :  { %4200 = vmatpush.xpose.msk.msra.mxu3 %vm844_vm2, %v542_v51 }
 0x24a   :  { %v496_v52 = vpop.f32.mrf.mxu1  ;;  %v562_v53 = vpop.f32.mrf.mxu0 }
 0x24b   :  { %4192 = vmatpush.xpose.msk.msra.mxu1 %vm844_vm2, %v496_v52 }
 0x24c   :  { %4201 = vmatpush.xpose.msk.msra.mxu3 %vm844_vm2, %v539_v45 }
 0x24f   :  { %4193 = vmatpush.xpose.msk.msra.mxu1 %vm844_vm2, %v493_v49  ;;  %v516_v54 = vpop.f32.mrf.mxu2  ;;  %v631_v37 = vpop.f32.mrf.mxu3  ;;  %4202 = vmatmul.msk.f32.vlgmr.msra.gmra.mxu3 %vm844_vm2, %v355_v29 }
 0x252   :  { %v565_v38 = vpop.f32.mrf.mxu0  ;;  %v585_v55 = vpop.f32.mrf.mxu1  ;;  %4194 = vmatmul.msk.f32.vlgmr.msra.gmra.mxu1 %vm844_vm2, %v303_v28 }
 0x253   :  { %4204 = vmatpush.xpose.msk.msra.mxu0 %vm844_vm2, %v565_v38 }
 0x257   :  { %4205 = vmatpush.xpose.msk.msra.mxu0 %vm844_vm2, %v562_v53  ;;  %v519_v56 = vpop.f32.mrf.mxu2  ;;  %v634_v57 = vpop.f32.mrf.mxu3  ;;  %4203 = vmatmul.msk.f32.gmra.mxu3 %vm844_vm2, %v358_v30 }
 0x258   :  { %4196 = vmatpush.xpose.msk.msra.mxu2 %vm844_vm2, %v519_v56  ;;  %4216 = vmatpush.xpose.msk.msrb.mxu3 %vm844_vm2, %v634_v57 }
 0x25a   :  { %v588_v58 = vpop.f32.mrf.mxu1  ;;  %v654_v59 = vpop.f32.mrf.mxu0  ;;  %4195 = vmatmul.msk.f32.gmra.mxu1 %vm844_vm2, %v306_v31  ;;  %4206 = vmatmul.msk.f32.vlgmr.msra.gmra.mxu0 %vm844_vm2, %v378_v33 }
 0x25b   :  { %4208 = vmatpush.xpose.msk.msrb.mxu1 %vm844_vm2, %v588_v58 }
 0x25c   :  { %4197 = vmatpush.xpose.msk.msra.mxu2 %vm844_vm2, %v516_v54  ;;  %4217 = vmatpush.xpose.msk.msrb.mxu3 %vm844_vm2, %v631_v37 }
 0x25f   :  { %4209 = vmatpush.xpose.msk.msrb.mxu1 %vm844_vm2, %v585_v55  ;;  %v608_v60 = vpop.f32.mrf.mxu2  ;;  %v723_v62 = vpop.f32.mrf.mxu3  ;;  %4198 = vmatmul.msk.f32.vlgmr.msra.gmra.mxu2 %vm844_vm2, %v332_v34 }
 0x260   :  { %4218 = vmatmul.msk.f32.vlgmr.msrb.gmra.mxu3 %vm844_vm2, %v447_v35 }
 0x262   :  { %v657_v63 = vpop.f32.mrf.mxu0  ;;  %v677_v47 = vpop.f32.mrf.mxu1  ;;  %4207 = vmatmul.msk.f32.gmra.mxu0 %vm844_vm2, %v381_v36  ;;  %4210 = vmatmul.msk.f32.vlgmr.msrb.gmra.mxu1 %vm844_vm2, %v401_v39 }
 0x263   :  { %4220 = vmatpush.xpose.msk.msrb.mxu0 %vm844_vm2, %v657_v63 }
 0x267   :  { %4221 = vmatpush.xpose.msk.msrb.mxu0 %vm844_vm2, %v654_v59  ;;  %v611_v61 = vpop.f32.mrf.mxu2  ;;  %v726_v1 = vpop.f32.mrf.mxu3  ;;  %4199 = vmatmul.msk.f32.gmra.mxu2 %vm844_vm2, %v335_v40 }
 0x268   :  { %4219 = vmatmul.msk.f32.gmra.mxu3 %vm844_vm2, %v450_v41  ;;  %4212 = vmatpush.xpose.msk.msrb.mxu2 %vm844_vm2, %v611_v61 }
 0x269   :  { %4230 = vmatpush.msk.msra.mxu3 %vm1325_vm4, %v726_v1 }
 0x26a   :  { %v680_v2 = vpop.f32.mrf.mxu1  ;;  %v746_v0 = vpop.f32.mrf.mxu0  ;;  %4211 = vmatmul.msk.f32.gmra.mxu1 %vm844_vm2, %v404_v42  ;;  %4222 = vmatmul.msk.f32.vlgmr.msrb.gmra.mxu0 %vm844_vm2, %v470_v43 }
 0x26b   :  { %4224 = vmatpush.msk.msra.mxu1 %vm1325_vm4, %v680_v2  ;;  %1408 = vmatpush.msra.mxu3 %v723_v62 }
 0x26c   :  { %4213 = vmatpush.xpose.msk.msrb.mxu2 %vm844_vm2, %v608_v60 }
 0x26d   :  { %1344 = vmatpush.msra.mxu1 %v677_v47 }
 0x26f   :  { %v700_v48 = vpop.f32.mrf.mxu2  ;;  %v815_v3 = vpop.f32.mrf.mxu3  ;;  %4214 = vmatmul.msk.f32.vlgmr.msrb.gmra.mxu2 %vm844_vm2, %v424_v44 }
 0x272   :  { %v749_v4 = vpop.f32.mrf.mxu0  ;;  %v769_v5 = vpop.f32.mrf.mxu1  ;;  %4223 = vmatmul.msk.f32.gmra.mxu0 %vm844_vm2, %v473_v46 }
 0x273   :  { %4233 = vmatpush.msk.msra.mxu0 %vm1325_vm4, %v749_v4 }
 0x275   :  { %1440 = vmatpush.msra.mxu0 %v746_v0 }
 0x277   :  { %v703_v7 = vpop.f32.mrf.mxu2  ;;  %v818_v6 = vpop.f32.mrf.mxu3  ;;  %4215 = vmatmul.msk.f32.gmra.mxu2 %vm844_vm2, %v5102_v50 }
 0x278   :  { %4227 = vmatpush.msk.msra.mxu2 %vm1325_vm4, %v703_v7  ;;  %4242 = vmatpush.msk.msrb.mxu3 %vm1325_vm4, %v818_v6 }
 0x27a   :  { %v772_v8 = vpop.f32.mrf.mxu1  ;;  %v838_v9 = vpop.f32.mrf.mxu0  ;;  %1376 = vmatpush.msra.mxu2 %v700_v48  ;;  %1536 = vmatpush.msrb.mxu3 %v815_v3 }
 0x27b   :  { %4236 = vmatpush.msk.msrb.mxu1 %vm1325_vm4, %v772_v8 }
 0x27d   :  { %1472 = vmatpush.msrb.mxu1 %v769_v5 }
 0x27f   :  { %v792_v10 = vpop.f32.mrf.mxu2 }
 0x282   :  { %v841_v11 = vpop.f32.mrf.mxu0 }
 0x283   :  { %4245 = vmatpush.msk.msrb.mxu0 %vm1325_vm4, %v841_v11 }
 0x285   :  { %1568 = vmatpush.msrb.mxu0 %v838_v9 }
 0x287   :  { %v795_v12 = vpop.f32.mrf.mxu2 }
 0x288   :  { %4239 = vmatpush.msk.msrb.mxu2 %vm1325_vm4, %v795_v12 }
 0x28a   :  { %1504 = vmatpush.msrb.mxu2 %v792_v10 }
 0x2cf   :  { %v874_v13 = vpop.f32.mrf.mxu1 }
 0x2d0   :  { %v5149_v17 = vmul.f32 0.35355338, %v874_v13 }
 0x2d2   :  { %v944_v14 = vpop.f32.mrf.mxu3  ;;  %v1142_v21 = vsel %vm1141_vm5, %v5149_v17, -inf }
 0x2d3   :  { %v5145_v15 = vmul.f32 0.35355338, %v944_v14 }
 0x2d5   :  { %v1155_v16 = vsel %vm1141_vm5, %v5145_v15, -inf }
 0x2d6   :  { %1156 = vmax.xlane.f32.xlu2 %v1155_v16 }
 0x2d7   :  { %v877_v20 = vpop.f32.mrf.mxu1  ;;  %v979_v24 = vpop.f32.mrf.mxu0 }
 0x2d8   :  { %v5157_v23 = vmul.f32 0.35355338, %v877_v20  ;;  %v5177_v42 = vmul.f32 0.35355338, %v979_v24 }
 0x2da   :  { %v947_v18 = vpop.f32.mrf.mxu3  ;;  %v1146_v29 = vsel %vm1145_vm6, %v5157_v23, -inf  ;;  %v1161_v46 = vsel %vm1141_vm5, %v5177_v42, -inf }
 0x2db   :  { %v5151_v19 = vmul.f32 0.35355338, %v947_v18 }
 0x2dd   :  { %v1158_v22 = vsel %vm1145_vm6, %v5151_v19, -inf }
 0x2de   :  { %1143 = vmax.xlane.f32.xlu2 %v1142_v21  ;;  %1159 = vmax.xlane.f32.xlu1 %v1158_v22 }
 0x2df   :  { %v1014_v31 = vpop.f32.mrf.mxu1  ;;  %v982_v36 = vpop.f32.mrf.mxu0 }
 0x2e0   :  { %v5169_v34 = vmul.f32 0.35355338, %v1014_v31  ;;  %v5185_v51 = vmul.f32 0.35355338, %v982_v36 }
 0x2e2   :  { %v909_v25 = vpop.f32.mrf.mxu2  ;;  %v1167_v40 = vsel %vm1141_vm5, %v5169_v34, -inf  ;;  %v1164_v38 = vsel %vm1145_vm6, %v5185_v51, -inf }
 0x2e3   :  { %v5159_v26 = vmul.f32 0.35355338, %v909_v25  ;;  %v1084_v27 = vpop.f32.mrf.mxu3 }
 0x2e4   :  { %v5161_v28 = vmul.f32 0.35355338, %v1084_v27 }
 0x2e5   :  { %v1149_v30 = vsel %vm1141_vm5, %v5159_v26, -inf }
 0x2e6   :  { %1147 = vmax.xlane.f32.xlu2 %v1146_v29  ;;  %v1179_v33 = vsel %vm1141_vm5, %v5161_v28, -inf  ;;  %1150 = vmax.xlane.f32.xlu0 %v1149_v30 }
 0x2e7   :  { %1180 = vmax.xlane.f32.xlu1 %v1179_v33  ;;  %v1119_v45 = vpop.f32.mrf.mxu0  ;;  %v1017_v56 = vpop.f32.mrf.mxu1 }
 0x2e8   :  { %v5197_v58 = vmul.f32 0.35355338, %v1017_v56  ;;  %v5199_v59 = vmul.f32 0.35355338, %v1119_v45 }
 0x2ea   :  { %v912_v35 = vpop.f32.mrf.mxu2  ;;  %v1170_v62 = vsel %vm1145_vm6, %v5197_v58, -inf  ;;  %v1185_v63 = vsel %vm1141_vm5, %v5199_v59, -inf }
 0x2eb   :  { %v5171_v39 = vmul.f32 0.35355338, %v912_v35  ;;  %v1087_v50 = vpop.f32.mrf.mxu3 }
 0x2ec   :  { %v5187_v52 = vmul.f32 0.35355338, %v1087_v50 }
 0x2ed   :  { %v1152_v41 = vsel %vm1145_vm6, %v5171_v39, -inf }
 0x2ee   :  { %1168 = vmax.xlane.f32.xlu2 %v1167_v40  ;;  %1153 = vmax.xlane.f32.xlu0 %v1152_v41  ;;  %v1182_v37 = vsel %vm1145_vm6, %v5187_v52, -inf }
 0x2ef   :  { %v1122_v57 = vpop.f32.mrf.mxu0 }
 0x2f0   :  { %v5201_v60 = vmul.f32 0.35355338, %v1122_v57 }
 0x2f2   :  { %v1049_v43 = vpop.f32.mrf.mxu2  ;;  %v1188_v47 = vsel %vm1145_vm6, %v5201_v60, -inf }
 0x2f3   :  { %v5179_v44 = vmul.f32 0.35355338, %v1049_v43 }
 0x2f5   :  { %v1173_v49 = vsel %vm1141_vm5, %v5179_v44, -inf }
 0x2f6   :  { %1162 = vmax.xlane.f32.xlu0 %v1161_v46  ;;  %1174 = vmax.xlane.f32.xlu1 %v1173_v49 }
 0x2fa   :  { %v1052_v53 = vpop.f32.mrf.mxu2 }
 0x2fb   :  { %v5189_v54 = vmul.f32 0.35355338, %v1052_v53 }
 0x2fd   :  { %v1176_v55 = vsel %vm1145_vm6, %v5189_v54, -inf }
 0x2fe   :  { %1183 = vmax.xlane.f32.xlu0 %v1182_v37  ;;  %1165 = vmax.xlane.f32.xlu1 %v1164_v38 }
 0x2ff   :  { %1177 = vmax.xlane.f32.xlu2 %v1176_v55 }
 0x306   :  { %1171 = vmax.xlane.f32.xlu0 %v1170_v62  ;;  %1186 = vmax.xlane.f32.xlu1 %v1185_v63 }
 0x307   :  { %1189 = vmax.xlane.f32.xlu2 %v1188_v47 }
 0x349   :  { %v1157_v61 = vpop.xlane.xlu2 %1156 }
 0x34a   :  { %v1195_v1 = vsub.f32 %v5145_v15, %v1157_v61 }
 0x34c   :  { %v1215_v2 = vmul.f32 1.442695, %v1195_v1 }
 0x34e   :  { %4485 = vpow2.f32 %v1215_v2 }
 0x351   :  { %v1144_v0 = vpop.xlane.xlu2 %1143  ;;  %v1160_v48 = vpop.xlane.xlu1 %1159 }
 0x352   :  { %v1191_v3 = vsub.f32 %v5149_v17, %v1144_v0  ;;  %v1196_v4 = vsub.f32 %v5151_v19, %v1160_v48 }
 0x354   :  { %v5212_v5 = vpop.eup %4485  ;;  %v1207_v7 = vmul.f32 1.442695, %v1191_v3  ;;  %v1217_v6 = vmul.f32 1.442695, %v1196_v4 }
 0x355   :  { %v1251_v8 = vsel %vm1141_vm5, %v5212_v5, 0.0 }
 0x356   :  { %4487 = vpow2.f32 %v1207_v7  ;;  %1252 = vadd.xlane.f32.xlu0 %v1251_v8 }
 0x357   :  { %4489 = vpow2.f32 %v1217_v6 }
 0x359   :  { %v1148_v9 = vpop.xlane.xlu2 %1147  ;;  %v1151_v10 = vpop.xlane.xlu0 %1150 }
 0x35a   :  { %v1192_v11 = vsub.f32 %v5157_v23, %v1148_v9  ;;  %v1193_v12 = vsub.f32 %v5159_v26, %v1151_v10  ;;  %v1181_v13 = vpop.xlane.xlu1 %1180 }
 0x35b   :  { %v1203_v14 = vsub.f32 %v5161_v28, %v1181_v13 }
 0x35c   :  { %v5219_v15 = vpop.eup %4487  ;;  %v1209_v16 = vmul.f32 1.442695, %v1192_v11  ;;  %v1211_v17 = vmul.f32 1.442695, %v1193_v12 }
 0x35d   :  { %v5221_v18 = vpop.eup %4489  ;;  %v1231_v19 = vmul.f32 1.442695, %v1203_v14  ;;  %v1239_v20 = vsel %vm1141_vm5, %v5219_v15, 0.0 }
 0x35e   :  { %4491 = vpow2.f32 %v1209_v16  ;;  %1240 = vadd.xlane.f32.xlu0 %v1239_v20  ;;  %v1254_v21 = vsel %vm1145_vm6, %v5221_v18, 0.0 }
 0x35f   :  { %4493 = vpow2.f32 %v1211_v17  ;;  %1255 = vadd.xlane.f32.xlu2 %v1254_v21 }
 0x360   :  { %4495 = vpow2.f32 %v1231_v19 }
 0x361   :  { %v1169_v22 = vpop.xlane.xlu2 %1168  ;;  %v1154_v23 = vpop.xlane.xlu0 %1153 }
 0x362   :  { %v1199_v24 = vsub.f32 %v5169_v34, %v1169_v22  ;;  %v1194_v25 = vsub.f32 %v5171_v39, %v1154_v23 }
 0x364   :  { %v5229_v26 = vpop.eup %4491  ;;  %v1223_v27 = vmul.f32 1.442695, %v1199_v24  ;;  %v1213_v28 = vmul.f32 1.442695, %v1194_v25 }
 0x365   :  { %v5231_v29 = vpop.eup %4493  ;;  %v1242_v30 = vsel %vm1145_vm6, %v5229_v26, 0.0 }
 0x366   :  { %v5235_v31 = vpop.eup %4495  ;;  %4497 = vpow2.f32 %v1223_v27  ;;  %1243 = vadd.xlane.f32.xlu0 %v1242_v30  ;;  %v1245_v33 = vsel %vm1141_vm5, %v5231_v29, 0.0 }
 0x367   :  { %4499 = vpow2.f32 %v1213_v28  ;;  %1246 = vadd.xlane.f32.xlu1 %v1245_v33  ;;  %v1275_v34 = vsel %vm1141_vm5, %v5235_v31, 0.0 }
 0x368   :  { %1276 = vadd.xlane.f32.xlu2 %v1275_v34 }
 0x369   :  { %v1163_v35 = vpop.xlane.xlu0 %1162  ;;  %v1175_v36 = vpop.xlane.xlu1 %1174 }
 0x36a   :  { %v1197_v39 = vsub.f32 %v5177_v42, %v1163_v35  ;;  %v1201_v40 = vsub.f32 %v5179_v44, %v1175_v36 }
 0x36c   :  { %v5243_v41 = vpop.eup %4497  ;;  %v1219_v43 = vmul.f32 1.442695, %v1197_v39  ;;  %v1227_v45 = vmul.f32 1.442695, %v1201_v40 }
 0x36d   :  { %v5245_v46 = vpop.eup %4499  ;;  %v1263_v49 = vsel %vm1141_vm5, %v5243_v41, 0.0 }
 0x36e   :  { %4501 = vpow2.f32 %v1219_v43  ;;  %1264 = vadd.xlane.f32.xlu0 %v1263_v49  ;;  %v1248_v50 = vsel %vm1145_vm6, %v5245_v46, 0.0 }
 0x36f   :  { %4503 = vpow2.f32 %v1227_v45  ;;  %1249 = vadd.xlane.f32.xlu1 %v1248_v50 }
 0x371   :  { %v1184_v53 = vpop.xlane.xlu0 %1183  ;;  %v1166_v42 = vpop.xlane.xlu1 %1165 }
 0x372   :  { %v1204_v44 = vsub.f32 %v5187_v52, %v1184_v53  ;;  %v1178_v37 = vpop.xlane.xlu2 %1177  ;;  %v1198_v38 = vsub.f32 %v5185_v51, %v1166_v42 }
 0x373   :  { %v1202_v55 = vsub.f32 %v5189_v54, %v1178_v37 }
 0x374   :  { %v5254_v56 = vpop.eup %4501  ;;  %v1233_v57 = vmul.f32 1.442695, %v1204_v44  ;;  %v1221_v62 = vmul.f32 1.442695, %v1198_v38 }
 0x375   :  { %v5256_v63 = vpop.eup %4503  ;;  %v1229_v47 = vmul.f32 1.442695, %v1202_v55  ;;  %v1257_v61 = vsel %vm1141_vm5, %v5254_v56, 0.0 }
 0x376   :  { %4505 = vpow2.f32 %v1233_v57  ;;  %v1269_v1 = vsel %vm1141_vm5, %v5256_v63, 0.0 }
 0x377   :  { %4507 = vpow2.f32 %v1229_v47  ;;  %1258 = vadd.xlane.f32.xlu1 %v1257_v61  ;;  %1270 = vadd.xlane.f32.xlu2 %v1269_v1 }
 0x378   :  { %4509 = vpow2.f32 %v1221_v62 }
 0x379   :  { %v1172_v51 = vpop.xlane.xlu0 %1171  ;;  %v1187_v52 = vpop.xlane.xlu1 %1186 }
 0x37a   :  { %v1200_v54 = vsub.f32 %v5197_v58, %v1172_v51  ;;  %v1190_v2 = vpop.xlane.xlu2 %1189  ;;  %v1205_v0 = vsub.f32 %v5199_v59, %v1187_v52 }
 0x37b   :  { %v1206_v48 = vsub.f32 %v5201_v60, %v1190_v2 }
 0x37c   :  { %v5265_v3 = vpop.eup %4505  ;;  %v1225_v4 = vmul.f32 1.442695, %v1200_v54  ;;  %v1235_v7 = vmul.f32 1.442695, %v1205_v0 }
 0x37d   :  { %v5267_v6 = vpop.eup %4507  ;;  %v1237_v8 = vmul.f32 1.442695, %v1206_v48  ;;  %v1278_v9 = vsel %vm1145_vm6, %v5265_v3, 0.0 }
 0x37e   :  { %v5271_v10 = vpop.eup %4509  ;;  %4511 = vpow2.f32 %v1225_v4  ;;  %v1272_v58 = vsel %vm1145_vm6, %v5267_v6, 0.0  ;;  %v1576_v4 = vld [vmem:[%s6155_s8] sm:$0xff] }
 0x37f   :  { %4513 = vpow2.f32 %v1237_v8  ;;  %1279 = vadd.xlane.f32.xlu1 %v1278_v9  ;;  %1273 = vadd.xlane.f32.xlu0 %v1272_v58  ;;  %v1260_v59 = vsel %vm1145_vm6, %v5271_v10, 0.0 }
 0x380   :  { %4515 = vpow2.f32 %v1235_v7  ;;  %1261 = vadd.xlane.f32.xlu2 %v1260_v59  ;;  %v1579_v7 = vld [vmem:[%s6155_s8 + $0x18] sm:$0xff] }
 0x384   :  { %v5277_v60 = vpop.eup %4511 }
 0x385   :  { %v5279_v11 = vpop.eup %4513  ;;  %v1266_v12 = vsel %vm1145_vm6, %v5277_v60, 0.0 }
 0x386   :  { %v5283_v13 = vpop.eup %4515  ;;  %v1284_v14 = vsel %vm1145_vm6, %v5279_v11, 0.0 }
 0x387   :  { %1267 = vadd.xlane.f32.xlu1 %v1266_v12  ;;  %1285 = vadd.xlane.f32.xlu0 %v1284_v14  ;;  %v1281_v16 = vsel %vm1141_vm5, %v5283_v13, 0.0 }
 0x388   :  { %1282 = vadd.xlane.f32.xlu2 %v1281_v16 }
 0x3c9   :  { %v1253_v17 = vpop.xlane.xlu0 %1252 }
 0x3ca   :  { %4517 = vrcp.f32 %v1253_v17 }
 0x3d0   :  { %v4518_v19 = vpop.eup %4517 }
 0x3d1   :  { %v1307_v20 = vmul.f32 %v4518_v19, %v5212_v5  ;;  %v1241_v21 = vpop.xlane.xlu0 %1240 }
 0x3d2   :  { %4519 = vrcp.f32 %v1241_v21  ;;  %v1256_v22 = vpop.xlane.xlu2 %1255 }
 0x3d3   :  { %4521 = vrcp.f32 %v1256_v22  ;;  %4231 = vmatmul.msk.f32.vlgmr.msra.gmra.mxu3 %vm1141_vm5, %v1307_v20 }
 0x3d8   :  { %v4520_v23 = vpop.eup %4519 }
 0x3d9   :  { %v4522_v24 = vpop.eup %4521  ;;  %v1303_v25 = vmul.f32 %v4520_v23, %v5219_v15  ;;  %v1244_v27 = vpop.xlane.xlu0 %1243 }
 0x3da   :  { %4523 = vrcp.f32 %v1244_v27  ;;  %v1247_v28 = vpop.xlane.xlu1 %1246  ;;  %v1308_v30 = vmul.f32 %v4522_v24, %v5221_v18 }
 0x3db   :  { %v1277_v33 = vpop.xlane.xlu2 %1276  ;;  %4525 = vrcp.f32 %v1247_v28  ;;  %4225 = vmatmul.msk.f32.vlgmr.msra.gmra.mxu1 %vm1141_vm5, %v1303_v25 }
 0x3dc   :  { %4527 = vrcp.f32 %v1277_v33  ;;  %4232 = vmatmul.msk.f32.gmra.mxu3 %vm1141_vm5, %v1308_v30  ;;  %1601 = vmatpush.msra.mxu1 %v1576_v4 }
 0x3e0   :  { %v4524_v5 = vpop.eup %4523 }
 0x3e1   :  { %v4526_v34 = vpop.eup %4525  ;;  %v1265_v35 = vpop.xlane.xlu0 %1264  ;;  %v1304_v36 = vmul.f32 %v4524_v5, %v5229_v26 }
 0x3e2   :  { %v4528_v39 = vpop.eup %4527  ;;  %v1305_v15 = vmul.f32 %v4526_v34, %v5231_v29  ;;  %4529 = vrcp.f32 %v1265_v35  ;;  %v1250_v40 = vpop.xlane.xlu1 %1249 }
 0x3e3   :  { %v1315_v43 = vmul.f32 %v4528_v39, %v5235_v31  ;;  %4531 = vrcp.f32 %v1250_v40  ;;  %4226 = vmatmul.msk.f32.gmra.mxu1 %vm1141_vm5, %v1304_v36  ;;  %v4462_v36 = vld [vmem:[%s6156_s9] ss:$0 sm:$0xff]  ;;  %v4639_v39 = vld [vmem:[#allocation2] sm:$0xff] }
 0x3e4   :  { %4228 = vmatmul.msk.f32.vlgmr.msra.gmra.mxu2 %vm1141_vm5, %v1305_v15 }
 0x3e5   :  { %4243 = vmatmul.msk.f32.vlgmr.msrb.gmra.mxu3 %vm1141_vm5, %v1315_v43  ;;  %1630 = vmatpush.msra.mxu2 %v1576_v4 }
 0x3e8   :  { %v4530_v18 = vpop.eup %4529 }
 0x3e9   :  { %v4532_v45 = vpop.eup %4531  ;;  %v1311_v49 = vmul.f32 %v4530_v18, %v5243_v41 }
 0x3ea   :  { %v1271_v50 = vpop.xlane.xlu2 %1270  ;;  %v1259_v26 = vpop.xlane.xlu1 %1258  ;;  %v1306_v53 = vmul.f32 %v4532_v45, %v5245_v46 }
 0x3eb   :  { %4533 = vrcp.f32 %v1271_v50  ;;  %4237 = vmatmul.msk.f32.vlgmr.msrb.gmra.mxu1 %vm1141_vm5, %v1311_v49 }
 0x3ec   :  { %4535 = vrcp.f32 %v1259_v26  ;;  %4229 = vmatmul.msk.f32.gmra.mxu2 %vm1141_vm5, %v1306_v53 }
 0x3f1   :  { %v4534_v29 = vpop.eup %4533 }
 0x3f2   :  { %v4536_v31 = vpop.eup %4535  ;;  %v1313_v42 = vmul.f32 %v4534_v29, %v5256_v63  ;;  %v1274_v44 = vpop.xlane.xlu0 %1273 }
 0x3f3   :  { %v1280_v37 = vpop.xlane.xlu1 %1279  ;;  %v1309_v38 = vmul.f32 %v4536_v31, %v5254_v56  ;;  %4537 = vrcp.f32 %v1274_v44  ;;  %v1262_v41 = vpop.xlane.xlu2 %1261 }
 0x3f4   :  { %4539 = vrcp.f32 %v1262_v41  ;;  %4240 = vmatmul.msk.f32.vlgmr.msrb.gmra.mxu2 %vm1141_vm5, %v1313_v42 }
 0x3f5   :  { %4541 = vrcp.f32 %v1280_v37  ;;  %4234 = vmatmul.msk.f32.vlgmr.msra.gmra.mxu0 %vm1141_vm5, %v1309_v38  ;;  %v4640_v37 = vld [vmem:[#allocation2 + $0x10] sm:$0xff] }
 0x3f9   :  { %v4538_v46 = vpop.eup %4537 }
 0x3fa   :  { %v4540_v55 = vpop.eup %4539  ;;  %v1314_v62 = vmul.f32 %v4538_v46, %v5267_v6  ;;  %v1286_v1 = vpop.xlane.xlu0 %1285  ;;  %v1578_v6 = vld [vmem:[%s6155_s8 + $0x10] sm:$0xff] }
 0x3fb   :  { %v1268_v57 = vpop.xlane.xlu1 %1267  ;;  %v4542_v47 = vpop.eup %4541  ;;  %v1310_v63 = vmul.f32 %v4540_v55, %v5271_v10  ;;  %1717 = vmatpush.msrb.mxu1 %v1578_v6  ;;  %1746 = vmatpush.msrb.mxu2 %v1578_v6 }
 0x3fc   :  { %v1283_v61 = vpop.xlane.xlu2 %1282  ;;  %4241 = vmatmul.msk.f32.gmra.mxu2 %vm1141_vm5, %v1314_v62  ;;  %v1316_v56 = vmul.f32 %v4542_v47, %v5265_v3  ;;  %v1577_v3 = vld [vmem:[%s6155_s8 + $0x8] sm:$0xff] }
 0x3fd   :  { %4543 = vrcp.f32 %v1283_v61  ;;  %4235 = vmatmul.msk.f32.gmra.mxu0 %vm1141_vm5, %v1310_v63  ;;  %1659 = vmatpush.msra.mxu3 %v1577_v3 }
 0x3fe   :  { %4545 = vrcp.f32 %v1268_v57  ;;  %4244 = vmatmul.msk.f32.gmra.mxu3 %vm1141_vm5, %v1316_v56  ;;  %1688 = vmatpush.msra.mxu0 %v1577_v3  ;;  %v4641_v56 = vld [vmem:[#allocation2 + $0x8] sm:$0x1] }
 0x3ff   :  { %4547 = vrcp.f32 %v1286_v1  ;;  %1775 = vmatpush.msrb.mxu3 %v1579_v7 }
 0x403   :  { %v4544_v51 = vpop.eup %4543 }
 0x404   :  { %v4546_v52 = vpop.eup %4545  ;;  %v1317_v54 = vmul.f32 %v4544_v51, %v5283_v13 }
 0x405   :  { %v1312_v2 = vmul.f32 %v4546_v52, %v5277_v60  ;;  %v4548_v0 = vpop.eup %4547 }
 0x406   :  { %4246 = vmatmul.msk.f32.vlgmr.msrb.gmra.mxu0 %vm1141_vm5, %v1317_v54  ;;  %v1318_v48 = vmul.f32 %v4548_v0, %v5279_v11 }
 0x407   :  { %4238 = vmatmul.msk.f32.gmra.mxu1 %vm1141_vm5, %v1312_v2  ;;  %1804 = vmatpush.msrb.mxu0 %v1579_v7  ;;  %v4642_v2 = vld [vmem:[#allocation2 + $0x18] sm:$0x1] }
 0x40e   :  { %4247 = vmatmul.msk.f32.gmra.mxu0 %vm1141_vm5, %v1318_v48 }
 0x456   :  { %v1410_v8 = vpop.f32.mrf.mxu3 }
 0x457   :  { %4252 = vmatmul.msk.f32.vlgmr.msra.gmra.mxu3 %vm844_vm2, %v1410_v8 }
 0x458   :  { %v1346_v9 = vpop.f32.mrf.mxu1 }
 0x459   :  { %4248 = vmatmul.msk.f32.vlgmr.msra.gmra.mxu1 %vm844_vm2, %v1346_v9 }
 0x45f   :  { %v1413_v10 = vpop.f32.mrf.mxu3 }
 0x460   :  { %4253 = vmatmul.msk.f32.gmra.mxu3 %vm844_vm2, %v1413_v10  ;;  %v1349_v58 = vpop.f32.mrf.mxu1 }
 0x461   :  { %4249 = vmatmul.msk.f32.gmra.mxu1 %vm844_vm2, %v1349_v58 }
 0x467   :  { %v1378_v59 = vpop.f32.mrf.mxu2 }
 0x468   :  { %v1538_v60 = vpop.f32.mrf.mxu3  ;;  %4250 = vmatmul.msk.f32.vlgmr.msra.gmra.mxu2 %vm844_vm2, %v1378_v59  ;;  %v1474_v11 = vpop.f32.mrf.mxu1 }
 0x469   :  { %4260 = vmatmul.msk.f32.vlgmr.msrb.gmra.mxu3 %vm844_vm2, %v1538_v60  ;;  %4256 = vmatmul.msk.f32.vlgmr.msrb.gmra.mxu1 %vm844_vm2, %v1474_v11 }
 0x46f   :  { %v1381_v12 = vpop.f32.mrf.mxu2 }
 0x470   :  { %4251 = vmatmul.msk.f32.gmra.mxu2 %vm844_vm2, %v1381_v12 }
 0x472   :  { %v1442_v13 = vpop.f32.mrf.mxu0 }
 0x473   :  { %4254 = vmatmul.msk.f32.vlgmr.msra.gmra.mxu0 %vm844_vm2, %v1442_v13 }
 0x477   :  { %v1506_v14 = vpop.f32.mrf.mxu2 }
 0x478   :  { %4258 = vmatmul.msk.f32.vlgmr.msrb.gmra.mxu2 %vm844_vm2, %v1506_v14 }
 0x47a   :  { %v1445_v16 = vpop.f32.mrf.mxu0 }
 0x47b   :  { %4255 = vmatmul.msk.f32.gmra.mxu0 %vm844_vm2, %v1445_v16 }
 0x47f   :  { %v1509_v17 = vpop.f32.mrf.mxu2 }
 0x480   :  { %4259 = vmatmul.msk.f32.gmra.mxu2 %vm844_vm2, %v1509_v17 }
 0x481   :  { %v1541_v19 = vpop.f32.mrf.mxu3 }
 0x482   :  { %4261 = vmatmul.msk.f32.gmra.mxu3 %vm844_vm2, %v1541_v19 }
 0x483   :  { %v1570_v20 = vpop.f32.mrf.mxu0 }
 0x484   :  { %v1477_v21 = vpop.f32.mrf.mxu1  ;;  %4262 = vmatmul.msk.f32.vlgmr.msrb.gmra.mxu0 %vm844_vm2, %v1570_v20 }
 0x485   :  { %4257 = vmatmul.msk.f32.gmra.mxu1 %vm844_vm2, %v1477_v21 }
 0x48b   :  { %v1573_v22 = vpop.f32.mrf.mxu0 }
 0x48c   :  { %4263 = vmatmul.msk.f32.gmra.mxu0 %vm844_vm2, %v1573_v22 }
 0x4d6   :  { %v1603_v23 = vpop.f32.mrf.mxu1 }
 0x4da   :  { %v1661_v24 = vpop.f32.mrf.mxu3 }
 0x4db   :  { %v1812_v30 = vadd.f32 %v1661_v24, %v1603_v23 }
 0x4de   :  { %v1606_v25 = vpop.f32.mrf.mxu1 }
 0x4e3   :  { %v1664_v27 = vpop.f32.mrf.mxu3 }
 0x4e4   :  { %v1813_v44 = vadd.f32 %v1664_v27, %v1606_v25 }
 0x4e6   :  { %v1719_v28 = vpop.f32.mrf.mxu1 }
 0x4e7   :  { %v1816_v33 = vadd.f32 %v1812_v30, %v1719_v28  ;;  %v1961_v30 = vld [vmem:[%s6159_s12 + $0x18] sm:$0xff] }
 0x4e8   :  { %2012 = vmatpush.msra.mxu1 %v1961_v30 }
 0x4eb   :  { %v1632_v5 = vpop.f32.mrf.mxu2 }
 0x4ec   :  { %v1777_v34 = vpop.f32.mrf.mxu3 }
 0x4ed   :  { %v1820_v35 = vadd.f32 %v1816_v33, %v1777_v34  ;;  %v1960_v33 = vld [vmem:[%s6159_s12 + $0x10] sm:$0xff] }
 0x4ee   :  { %2013 = vmatpush.msra.mxu1 %v1960_v33 }
 0x4ef   :  { %v1824_v15 = vadd.f32 %v4639_v39, %v1820_v35  ;;  %v1958_v35 = vld [vmem:[%s6159_s12] sm:$0xff] }
 0x4f0   :  { %v1690_v40 = vpop.f32.mrf.mxu0 }
 0x4f1   :  { %v5352_v43 = vadd.f32 %v4462_v36, %v1824_v15  ;;  %v1814_v26 = vadd.f32 %v1690_v40, %v1632_v5  ;;  %v1959_v5 = vld [vmem:[%s6159_s12 + $0x8] sm:$0xff] }
 0x4f2   :  { %2014 = vmatpush.msra.mxu1 %v1959_v5 }
 0x4f3   :  { %v1635_v18 = vpop.f32.mrf.mxu2  ;;  %v1838_v45 = vsel %vm114_vm3, %v5352_v43, 0.0 }
 0x4f4   :  { %1839 = vadd.xlane.f32.xlu1 %v1838_v45  ;;  %2015 = vmatpush.msra.mxu1 %v1958_v35 }
 0x4f8   :  { %v1693_v49 = vpop.f32.mrf.mxu0 }
 0x4f9   :  { %v1815_v55 = vadd.f32 %v1693_v49, %v1635_v18  ;;  %v5408_v49 = vld [vmem:[%s6157_s10] ss:$0 sm:$0xff] }
 0x4fb   :  { %v1748_v50 = vpop.f32.mrf.mxu2 }
 0x4fc   :  { %v1818_v53 = vadd.f32 %v1814_v26, %v1748_v50 }
 0x501   :  { %v1806_v29 = vpop.f32.mrf.mxu0 }
 0x502   :  { %v1722_v31 = vpop.f32.mrf.mxu1  ;;  %v1822_v42 = vadd.f32 %v1818_v53, %v1806_v29  ;;  %v5414_v53 = vld [vmem:[%s6158_s11] ss:$0 sm:$0xff] }
 0x503   :  { %v1817_v41 = vadd.f32 %v1813_v44, %v1722_v31  ;;  %v1751_v46 = vpop.f32.mrf.mxu2 }
 0x504   :  { %v1826_v38 = vadd.f32 %v4640_v37, %v1822_v42  ;;  %v1819_v61 = vadd.f32 %v1815_v55, %v1751_v46 }
 0x505   :  { %v1780_v57 = vpop.f32.mrf.mxu3 }
 0x506   :  { %v5356_v62 = vadd.f32 %v4462_v36, %v1826_v38  ;;  %v1821_v47 = vadd.f32 %v1817_v41, %v1780_v57 }
 0x508   :  { %v1844_v63 = vsel %vm114_vm3, %v5356_v62, 0.0  ;;  %v1825_v1 = vadd.f32 %v4641_v56, %v1821_v47 }
 0x509   :  { %1845 = vadd.xlane.f32.xlu2 %v1844_v63  ;;  %v1809_v51 = vpop.f32.mrf.mxu0 }
 0x50a   :  { %v1823_v52 = vadd.f32 %v1819_v61, %v1809_v51  ;;  %v5360_v54 = vadd.f32 %v4462_v36, %v1825_v1 }
 0x50c   :  { %v1827_v0 = vadd.f32 %v4642_v2, %v1823_v52  ;;  %v1841_v48 = vsel %vm102_vm1, %v5360_v54, 0.0 }
 0x50d   :  { %1842 = vadd.xlane.f32.xlu0 %v1841_v48 }
 0x50e   :  { %v5364_v3 = vadd.f32 %v4462_v36, %v1827_v0 }
 0x510   :  { %v1847_v4 = vsel %vm102_vm1, %v5364_v3, 0.0 }
 0x511   :  { %1848 = vadd.xlane.f32.xlu1 %v1847_v4 }
 0x567   :  { %v1840_v7 = vpop.xlane.xlu1 %1839 }
 0x568   :  { %v1850_v6 = vmul.f32 %v1840_v7, %v4798_v32 }
 0x56a   :  { %v1854_v8 = vsub.f32 %v5352_v43, %v1850_v6 }
 0x56c   :  { %v1858_v9 = vmul.f32 %v1854_v8, %v1854_v8 }
 0x56e   :  { %v1862_v10 = vsel %vm114_vm3, %v1858_v9, 0.0 }
 0x56f   :  { %1863 = vadd.xlane.f32.xlu2 %v1862_v10 }
 0x57c   :  { %v1846_v58 = vpop.xlane.xlu2 %1845 }
 0x57d   :  { %v1852_v59 = vmul.f32 %v1846_v58, %v4798_v32 }
 0x57f   :  { %v5373_v60 = vsub.f32 %v5356_v62, %v1852_v59 }
 0x580   :  { %v1843_v11 = vpop.xlane.xlu0 %1842 }
 0x581   :  { %v1860_v12 = vmul.f32 %v5373_v60, %v5373_v60  ;;  %v1851_v13 = vmul.f32 %v1843_v11, %v4798_v32 }
 0x583   :  { %v1868_v14 = vsel %vm114_vm3, %v1860_v12, 0.0  ;;  %v5380_v16 = vsub.f32 %v5360_v54, %v1851_v13 }
 0x584   :  { %v1849_v17 = vpop.xlane.xlu1 %1848  ;;  %1869 = vadd.xlane.f32.xlu0 %v1868_v14 }
 0x585   :  { %v1853_v19 = vmul.f32 %v1849_v17, %v4798_v32  ;;  %v1859_v20 = vmul.f32 %v5380_v16, %v5380_v16 }
 0x587   :  { %v5386_v21 = vsub.f32 %v5364_v3, %v1853_v19  ;;  %v1865_v22 = vsel %vm102_vm1, %v1859_v20, 0.0 }
 0x588   :  { %1866 = vadd.xlane.f32.xlu1 %v1865_v22 }
 0x589   :  { %v1861_v23 = vmul.f32 %v5386_v21, %v5386_v21 }
 0x58b   :  { %v1871_v24 = vsel %vm102_vm1, %v1861_v23, 0.0 }
 0x58c   :  { %1872 = vadd.xlane.f32.xlu2 %v1871_v24 }
 0x5e2   :  { %v1864_v25 = vpop.xlane.xlu2 %1863 }
 0x5e3   :  { %v1874_v27 = vmul.f32 %v1864_v25, %v4798_v32 }
 0x5e5   :  { %v1878_v28 = vadd.f32 1e-05, %v1874_v27 }
 0x5e7   :  { %4549 = vrsqrt.f32 %v1878_v28  ;;  %vm1888_vm8 = vweird.f32 %v1878_v28 }
 0x5ed   :  { %v4550_v34 = vpop.eup %4549 }
 0x5ee   :  { %v1883_v36 = vmul.f32 %v4550_v34, %v1878_v28  ;;  %vm1889_vm7 = vweird.f32 %v4550_v34 }
 0x5ef   :  { %vm1890_vm9 = vmor %vm1888_vm8, %vm1889_vm7 }
 0x5f0   :  { %v1884_v39 = vmul.f32 %v4550_v34, %v1883_v36 }
 0x5f2   :  { %v1885_v15 = vmul.f32 0.5, %v1884_v39 }
 0x5f4   :  { %v1886_v40 = vsub.f32 1.5, %v1885_v15 }
 0x5f6   :  { %v1887_v18 = vmul.f32 %v4550_v34, %v1886_v40 }
 0x5f7   :  { %v1870_v45 = vpop.xlane.xlu0 %1869 }
 0x5f8   :  { %v1876_v50 = vmul.f32 %v1870_v45, %v4798_v32  ;;  %v1891_v26 = vsel %vm1890_vm9, %v4550_v34, %v1887_v18 }
 0x5f9   :  { %v1922_v29 = vmul.f32 %v1891_v26, %v1854_v8 }
 0x5fa   :  { %v1880_v31 = vadd.f32 1e-05, %v1876_v50 }
 0x5fb   :  { %v1929_v42 = vmul.f32 %v5408_v49, %v1922_v29  ;;  %v1867_v44 = vpop.xlane.xlu1 %1866 }
 0x5fc   :  { %4551 = vrsqrt.f32 %v1880_v31  ;;  %v1875_v37 = vmul.f32 %v1867_v44, %v4798_v32  ;;  %vm1908_vm11 = vweird.f32 %v1880_v31 }
 0x5fd   :  { %v1936_v38 = vadd.f32 %v5414_v53, %v1929_v42 }
 0x5fe   :  { %v1879_v41 = vadd.f32 1e-05, %v1875_v37 }
 0x5ff   :  { %v1873_v46 = vpop.xlane.xlu2 %1872  ;;  %v1945_v55 = vrot.slane %v1936_v38, 2  ;;  %v1946_v57 = vrot.slane %v1936_v38, 3  ;;  %v1947_v47 = vrot.slane %v1936_v38, 4  ;;  %1966 = vst [vmem:[#allocation1] ss:$9 sm:$0xff] %v1936_v38  ;;  %v1948_v61 = vrot.slane %v1936_v38, 5 }
 0x600   :  { %4553 = vrsqrt.f32 %v1879_v41  ;;  %v1949_v56 = vrot.slane %v1936_v38, 6  ;;  %v1877_v1 = vmul.f32 %v1873_v46, %v4798_v32  ;;  %v1950_v51 = vrot.slane %v1936_v38, 7 }
 0x601   :  { %1970 = vst [vmem:[#allocation1 + $0x2] ss:$9 sm:$0xff] %v1945_v55  ;;  %v1944_v2 = vrot.slane %v1936_v38, 1  ;;  %vm1898_vm14 = vweird.f32 %v1879_v41 }
 0x602   :  { %v4552_v63 = vpop.eup %4551  ;;  %1972 = vst [vmem:[#allocation1 + $0x3] ss:$9 sm:$0xff] %v1946_v57  ;;  %v1881_v0 = vadd.f32 1e-05, %v1877_v1 }
 0x603   :  { %v1903_v52 = vmul.f32 %v4552_v63, %v1880_v31  ;;  %1974 = vst [vmem:[#allocation1 + $0x4] ss:$9 sm:$0xff] %v1947_v47  ;;  %vm1909_vm10 = vweird.f32 %v4552_v63  ;;  %v4465_v31 = vld [vmem:[%s6160_s13] ss:$0 sm:$0xff] }
 0x604   :  { %1976 = vst [vmem:[#allocation1 + $0x5] ss:$9 sm:$0xff] %v1948_v61  ;;  %4555 = vrsqrt.f32 %v1881_v0  ;;  %vm1910_vm12 = vmor %vm1908_vm11, %vm1909_vm10  ;;  %vm1918_vm7 = vweird.f32 %v1881_v0 }
 0x605   :  { %v1904_v48 = vmul.f32 %v4552_v63, %v1903_v52  ;;  %1978 = vst [vmem:[#allocation1 + $0x6] ss:$9 sm:$0xff] %v1949_v56 }
 0x606   :  { %v4554_v4 = vpop.eup %4553  ;;  %1980 = vst [vmem:[#allocation1 + $0x7] ss:$9 sm:$0xff] %v1950_v51 }
 0x607   :  { %v1905_v7 = vmul.f32 0.5, %v1904_v48  ;;  %1968 = vst [vmem:[#allocation1 + $0x1] ss:$9 sm:$0xff] %v1944_v2  ;;  %v1893_v6 = vmul.f32 %v4554_v4, %v1879_v41  ;;  %vm1899_vm13 = vweird.f32 %v4554_v4 }
 0x608   :  { %vm1900_vm15 = vmor %vm1898_vm14, %vm1899_vm13 }
 0x609   :  { %v1906_v8 = vsub.f32 1.5, %v1905_v7  ;;  %v1894_v9 = vmul.f32 %v4554_v4, %v1893_v6 }
 0x60a   :  { %v4556_v58 = vpop.eup %4555 }
 0x60b   :  { %v1907_v10 = vmul.f32 %v4552_v63, %v1906_v8  ;;  %v1895_v59 = vmul.f32 0.5, %v1894_v9  ;;  %v1913_v12 = vmul.f32 %v4556_v58, %v1881_v0  ;;  %vm1919_vm0 = vweird.f32 %v4556_v58 }
 0x60c   :  { %vm1920_vm8 = vmor %vm1918_vm7, %vm1919_vm0 }
 0x60d   :  { %v1911_v11 = vsel %vm1910_vm12, %v4552_v63, %v1907_v10  ;;  %v1896_v14 = vsub.f32 1.5, %v1895_v59  ;;  %v1914_v19 = vmul.f32 %v4556_v58, %v1913_v12 }
 0x60e   :  { %v1924_v13 = vmul.f32 %v1911_v11, %v5373_v60  ;;  %v1981_v17 = vld [vmem:[#allocation1] sm:$0xff] }
 0x60f   :  { %v1897_v22 = vmul.f32 %v4554_v4, %v1896_v14  ;;  %4264 = vmatmul.msk.f32.vlgmr.msra.gmra.mxu1 %vm114_vm3, %v1981_v17  ;;  %v1915_v23 = vmul.f32 0.5, %v1914_v19 }
 0x610   :  { %v1931_v20 = vmul.f32 %v5408_v49, %v1924_v13 }
 0x611   :  { %v1901_v25 = vsel %vm1900_vm15, %v4554_v4, %v1897_v22  ;;  %v1916_v28 = vsub.f32 1.5, %v1915_v23 }
 0x612   :  { %v1938_v24 = vadd.f32 %v5414_v53, %v1931_v20  ;;  %v1923_v27 = vmul.f32 %v1901_v25, %v5380_v16 }
 0x613   :  { %v1917_v36 = vmul.f32 %v4556_v58, %v1916_v28 }
 0x614   :  { %v1951_v30 = vrot.slane %v1938_v24, 1  ;;  %v1952_v60 = vrot.slane %v1938_v24, 2  ;;  %v1953_v33 = vrot.slane %v1938_v24, 3  ;;  %1983 = vst [vmem:[#allocation1 + $0x1] ss:$9 sm:$0xff] %v1938_v24  ;;  %v1954_v5 = vrot.slane %v1938_v24, 4 }
 0x615   :  { %v1930_v34 = vmul.f32 %v5408_v49, %v1923_v27  ;;  %v1955_v35 = vrot.slane %v1938_v24, 5  ;;  %v1956_v39 = vrot.slane %v1938_v24, 6  ;;  %v1921_v16 = vsel %vm1920_vm8, %v4556_v58, %v1917_v36 }
 0x616   :  { %1984 = vst [vmem:[#allocation1 + $0x2] ss:$9 sm:$0xff] %v1951_v30  ;;  %v1925_v40 = vmul.f32 %v1921_v16, %v5386_v21  ;;  %v1957_v45 = vrot.slane %v1938_v24, 7  ;;  %v4271_v16 = vld [vmem:[%s6154_s7 + $0x190] sm:$0xff] }
 0x617   :  { %1985 = vst [vmem:[#allocation1 + $0x3] ss:$9 sm:$0xff] %v1952_v60  ;;  %v1937_v15 = vadd.f32 %v5414_v53, %v1930_v34 }
 0x618   :  { %1986 = vst [vmem:[#allocation1 + $0x4] ss:$9 sm:$0xff] %v1953_v33  ;;  %v1932_v18 = vmul.f32 %v5408_v49, %v1925_v40  ;;  %v4275_v40 = vld [vmem:[%s6154_s7 + $0x1b0] sm:$0xff] }
 0x619   :  { %1987 = vst [vmem:[#allocation1 + $0x5] ss:$9 sm:$0xff] %v1954_v5 }
 0x61a   :  { %1988 = vst [vmem:[#allocation1 + $0x6] ss:$9 sm:$0xff] %v1955_v35  ;;  %v1939_v26 = vadd.f32 %v5414_v53, %v1932_v18  ;;  %v4270_v18 = vld [vmem:[%s6154_s7 + $0x188] sm:$0xff] }
 0x61b   :  { %1989 = vst [vmem:[#allocation1 + $0x7] ss:$9 sm:$0xff] %v1956_v39  ;;  %v4272_v39 = vld [vmem:[%s6154_s7 + $0x198] sm:$0xff] }
 0x61c   :  { %1982 = vst [vmem:[#allocation1] ss:$9 sm:$0xff] %v1937_v15  ;;  %v4276_v15 = vld [vmem:[%s6154_s7 + $0x1b8] sm:$0xff]  ;;  %2254 = vmatpush.msra.mxu2 %v4272_v39  ;;  %2283 = vmatpush.msra.mxu3 %v4272_v39 }
 0x61d   :  { %2306 = vmatpush.msra.mxu0 %v4276_v15 }
 0x61e   :  { %2255 = vmatpush.msra.mxu2 %v4271_v16  ;;  %2284 = vmatpush.msra.mxu3 %v4271_v16 }
 0x61f   :  { %2307 = vmatpush.msra.mxu0 %v4275_v40 }
 0x620   :  { %2256 = vmatpush.msra.mxu2 %v4270_v18  ;;  %2285 = vmatpush.msra.mxu3 %v4270_v18 }
 0x623   :  { %v1990_v50 = vld [vmem:[#allocation1] sm:$0xff] }
 0x624   :  { %1991 = vst [vmem:[#allocation1] ss:$9 sm:$0xff] %v1957_v45  ;;  %4265 = vmatmul.msk.f32.gmra.mxu1 %vm114_vm3, %v1990_v50  ;;  %v4274_v45 = vld [vmem:[%s6154_s7 + $0x1a8] sm:$0xff]  ;;  %v4269_v50 = vld [vmem:[%s6154_s7 + $0x180] sm:$0xff] }
 0x625   :  { %1992 = vst [vmem:[#allocation1 + $0x1] ss:$9 sm:$0xff] %v1939_v26  ;;  %2308 = vmatpush.msra.mxu0 %v4274_v45  ;;  %v4273_v26 = vld [vmem:[%s6154_s7 + $0x1a0] sm:$0xff]  ;;  %2257 = vmatpush.msra.mxu2 %v4269_v50 }
 0x626   :  { %2286 = vmatpush.msra.mxu3 %v4269_v50 }
 0x627   :  { %2309 = vmatpush.msra.mxu0 %v4273_v26  ;;  %2329 = vmatpush.msrb.mxu2 %v4276_v15 }
 0x629   :  { %2330 = vmatpush.msrb.mxu2 %v4275_v40 }
 0x62b   :  { %2331 = vmatpush.msrb.mxu2 %v4274_v45 }
 0x62c   :  { %v1993_v29 = vld [vmem:[#allocation1] sm:$0xff] }
 0x62d   :  { %4266 = vmatmul.msk.f32.gmra.mxu1 %vm114_vm3, %v1993_v29  ;;  %2332 = vmatpush.msrb.mxu2 %v4273_v26 }
 0x68c   :  { %v2017_v42 = vpop.f32.mrf.mxu1 }
 0x68d   :  { %v2018_v21 = vadd.f32 %v4465_v31, %v2017_v42 }
 0x68f   :  { %v2029_v44 = vrot.slane %v2018_v21, 1  ;;  %v2030_v37 = vrot.slane %v2018_v21, 2  ;;  %v2031_v49 = vrot.slane %v2018_v21, 3  ;;  %2044 = vst [vmem:[#allocation1] ss:$9 sm:$0xff] %v2018_v21  ;;  %v2032_v38 = vrot.slane %v2018_v21, 4 }
 0x690   :  { %v2033_v41 = vrot.slane %v2018_v21, 5  ;;  %v2034_v53 = vrot.slane %v2018_v21, 6  ;;  %v2035_v46 = vrot.slane %v2018_v21, 7 }
 0x691   :  { %2046 = vst [vmem:[#allocation1 + $0x1] ss:$9 sm:$0xff] %v2029_v44 }
 0x692   :  { %2048 = vst [vmem:[#allocation1 + $0x2] ss:$9 sm:$0xff] %v2030_v37 }
 0x693   :  { %2050 = vst [vmem:[#allocation1 + $0x3] ss:$9 sm:$0xff] %v2031_v49 }
 0x694   :  { %2052 = vst [vmem:[#allocation1 + $0x4] ss:$9 sm:$0xff] %v2032_v38 }
 0x695   :  { %2054 = vst [vmem:[#allocation1 + $0x5] ss:$9 sm:$0xff] %v2033_v41 }
 0x696   :  { %2056 = vst [vmem:[#allocation1 + $0x6] ss:$9 sm:$0xff] %v2034_v53 }
 0x697   :  { %2058 = vst [vmem:[#allocation1 + $0x7] ss:$9 sm:$0xff] %v2035_v46  ;;  %v4280_v46 = vld [vmem:[%s6154_s7 + $0x1d8] sm:$0xff] }
 0x698   :  { %2375 = vmatpush.msrb.mxu1 %v4280_v46  ;;  %2352 = vmatpush.msrb.mxu3 %v4280_v46 }
 0x69e   :  { %v2059_v55 = vld [vmem:[#allocation1] sm:$0xff] }
 0x69f   :  { %v5436_v57 = vadd.f32 %v2059_v55, %v5352_v43  ;;  %v4284_v55 = vld [vmem:[%s6154_s7 + $0x1f8] sm:$0xff] }
 0x6a0   :  { %2398 = vmatpush.msrb.mxu0 %v4284_v55 }
 0x6a1   :  { %v2020_v47 = vpop.f32.mrf.mxu1  ;;  %v2085_v61 = vsel %vm114_vm3, %v5436_v57, 0.0 }
 0x6a2   :  { %v2021_v63 = vadd.f32 %v4465_v31, %v2020_v47  ;;  %2086 = vadd.xlane.f32.xlu0 %v2085_v61  ;;  %v4279_v61 = vld [vmem:[%s6154_s7 + $0x1d0] sm:$0xff] }
 0x6a3   :  { %2376 = vmatpush.msrb.mxu1 %v4279_v61  ;;  %2353 = vmatpush.msrb.mxu3 %v4279_v61 }
 0x6a4   :  { %2060 = vst [vmem:[#allocation1] ss:$9 sm:$0xff] %v2021_v63  ;;  %v2036_v56 = vrot.slane %v2021_v63, 1  ;;  %v2037_v1 = vrot.slane %v2021_v63, 2  ;;  %v2038_v52 = vrot.slane %v2021_v63, 3  ;;  %v2039_v48 = vrot.slane %v2021_v63, 4 }
 0x6a5   :  { %v2040_v43 = vrot.slane %v2021_v63, 5  ;;  %v2041_v7 = vrot.slane %v2021_v63, 6  ;;  %v2042_v8 = vrot.slane %v2021_v63, 7  ;;  %v4283_v63 = vld [vmem:[%s6154_s7 + $0x1f0] sm:$0xff] }
 0x6a6   :  { %2399 = vmatpush.msrb.mxu0 %v4283_v63 }
 0x6aa   :  { %v2023_v2 = vpop.f32.mrf.mxu1 }
 0x6ab   :  { %v2061_v51 = vld [vmem:[#allocation1] sm:$0xff]  ;;  %v2024_v6 = vadd.f32 %v4465_v31, %v2023_v2 }
 0x6ac   :  { %2062 = vst [vmem:[#allocation1] ss:$9 sm:$0xff] %v2036_v56  ;;  %v5441_v0 = vadd.f32 %v2061_v51, %v5360_v54  ;;  %v5524_v56 = vld [vmem:[%s6152_s5 + $0x1] ss:$0 sm:$0xff]  ;;  %v4278_v51 = vld [vmem:[%s6154_s7 + $0x1c8] sm:$0xff] }
 0x6ad   :  { %2063 = vst [vmem:[#allocation1 + $0x1] ss:$9 sm:$0xff] %v2037_v1  ;;  %v2043_v9 = vrot.slane %v2024_v6, 1  ;;  %2377 = vmatpush.msrb.mxu1 %v4278_v51  ;;  %2354 = vmatpush.msrb.mxu3 %v4278_v51 }
 0x6ae   :  { %2064 = vst [vmem:[#allocation1 + $0x2] ss:$9 sm:$0xff] %v2038_v52  ;;  %v2088_v4 = vsel %vm102_vm1, %v5441_v0, 0.0  ;;  %v4282_v52 = vld [vmem:[%s6154_s7 + $0x1e8] sm:$0xff] }
 0x6af   :  { %2065 = vst [vmem:[#allocation1 + $0x3] ss:$9 sm:$0xff] %v2039_v48  ;;  %2089 = vadd.xlane.f32.xlu2 %v2088_v4  ;;  %2400 = vmatpush.msrb.mxu0 %v4282_v52 }
 0x6b0   :  { %2066 = vst [vmem:[#allocation1 + $0x4] ss:$9 sm:$0xff] %v2040_v43  ;;  %v5535_v43 = vld [vmem:[%s6153_s6 + $0x1] ss:$0 sm:$0xff] }
 0x6b1   :  { %2067 = vst [vmem:[#allocation1 + $0x5] ss:$9 sm:$0xff] %v2041_v7  ;;  %v4277_v7 = vld [vmem:[%s6154_s7 + $0x1c0] sm:$0xff] }
 0x6b2   :  { %2068 = vst [vmem:[#allocation1 + $0x6] ss:$9 sm:$0xff] %v2042_v8  ;;  %2378 = vmatpush.msrb.mxu1 %v4277_v7  ;;  %2355 = vmatpush.msrb.mxu3 %v4277_v7  ;;  %v4305_v7 = vld [vmem:[%s6154_s7 + $0x2a0] sm:$0xff] }
 0x6b3   :  { %2069 = vst [vmem:[#allocation1 + $0x7] ss:$9 sm:$0xff] %v2024_v6  ;;  %v4281_v6 = vld [vmem:[%s6154_s7 + $0x1e0] sm:$0xff] }
 0x6b4   :  { %2401 = vmatpush.msrb.mxu0 %v4281_v6 }
 0x6ba   :  { %v2070_v10 = vld [vmem:[#allocation1] sm:$0xff] }
 0x6bb   :  { %2071 = vst [vmem:[#allocation1] ss:$9 sm:$0xff] %v2043_v9  ;;  %v5446_v54 = vadd.f32 %v2070_v10, %v5356_v62 }
 0x6bd   :  { %v2091_v58 = vsel %vm114_vm3, %v5446_v54, 0.0 }
 0x6be   :  { %2092 = vadd.xlane.f32.xlu1 %v2091_v58 }
 0x6c2   :  { %v2072_v59 = vld [vmem:[#allocation1] sm:$0xff] }
 0x6c3   :  { %v5451_v11 = vadd.f32 %v2072_v59, %v5364_v3 }
 0x6c5   :  { %v2094_v12 = vsel %vm102_vm1, %v5451_v11, 0.0 }
 0x6c6   :  { %2095 = vadd.xlane.f32.xlu0 %v2094_v12 }
 0x715   :  { %v2087_v13 = vpop.xlane.xlu0 %2086 }
 0x716   :  { %v2097_v14 = vmul.f32 %v2087_v13, %v4798_v32 }
 0x718   :  { %v5457_v17 = vsub.f32 %v5436_v57, %v2097_v14 }
 0x71a   :  { %v2105_v62 = vmul.f32 %v5457_v17, %v5457_v17 }
 0x71c   :  { %v2109_v19 = vsel %vm114_vm3, %v2105_v62, 0.0 }
 0x71d   :  { %2110 = vadd.xlane.f32.xlu1 %v2109_v19  ;;  %v5556_v19 = vld [vmem:[%s6154_s7 + $0x218] sm:$0xff] }
 0x71e   :  { %2467 = vmatpush.msra.mxu1 %v5556_v19 }
 0x722   :  { %v2090_v20 = vpop.xlane.xlu2 %2089 }
 0x723   :  { %v2098_v3 = vmul.f32 %v2090_v20, %v4798_v32  ;;  %v5561_v20 = vld [vmem:[%s6154_s7 + $0x238] sm:$0xff] }
 0x725   :  { %v5464_v22 = vsub.f32 %v5441_v0, %v2098_v3  ;;  %v5566_v3 = vld [vmem:[%s6154_s7 + $0x210] sm:$0xff] }
 0x726   :  { %2468 = vmatpush.msra.mxu1 %v5566_v3 }
 0x727   :  { %v2106_v23 = vmul.f32 %v5464_v22, %v5464_v22 }
 0x729   :  { %v2112_v24 = vsel %vm102_vm1, %v2106_v23, 0.0 }
 0x72a   :  { %2113 = vadd.xlane.f32.xlu0 %v2112_v24  ;;  %v5573_v24 = vld [vmem:[%s6154_s7 + $0x230] sm:$0xff] }
 0x731   :  { %v2093_v25 = vpop.xlane.xlu1 %2092 }
 0x732   :  { %v2099_v27 = vmul.f32 %v2093_v25, %v4798_v32 }
 0x734   :  { %v5471_v28 = vsub.f32 %v5446_v54, %v2099_v27 }
 0x736   :  { %v2107_v30 = vmul.f32 %v5471_v28, %v5471_v28 }
 0x738   :  { %v2115_v60 = vsel %vm114_vm3, %v2107_v30, 0.0  ;;  %v5579_v30 = vld [vmem:[%s6154_s7 + $0x208] sm:$0xff] }
 0x739   :  { %2116 = vadd.xlane.f32.xlu2 %v2115_v60  ;;  %v2096_v33 = vpop.xlane.xlu0 %2095  ;;  %v5584_v60 = vld [vmem:[%s6154_s7 + $0x228] sm:$0xff]  ;;  %2469 = vmatpush.msra.mxu1 %v5579_v30 }
 0x73a   :  { %v2100_v5 = vmul.f32 %v2096_v33, %v4798_v32 }
 0x73c   :  { %v5478_v34 = vsub.f32 %v5451_v11, %v2100_v5  ;;  %v5593_v5 = vld [vmem:[%s6154_s7 + $0x200] sm:$0xff] }
 0x73d   :  { %2470 = vmatpush.msra.mxu1 %v5593_v5 }
 0x73e   :  { %v2108_v35 = vmul.f32 %v5478_v34, %v5478_v34 }
 0x740   :  { %v2118_v36 = vsel %vm102_vm1, %v2108_v35, 0.0  ;;  %v5598_v35 = vld [vmem:[%s6154_s7 + $0x220] sm:$0xff] }
 0x741   :  { %2119 = vadd.xlane.f32.xlu1 %v2118_v36 }
 0x790   :  { %v2111_v29 = vpop.xlane.xlu1 %2110 }
 0x791   :  { %v2121_v31 = vmul.f32 %v2111_v29, %v4798_v32 }
 0x793   :  { %v2125_v42 = vadd.f32 1e-05, %v2121_v31 }
 0x795   :  { %4557 = vrsqrt.f32 %v2125_v42  ;;  %vm2135_vm10 = vweird.f32 %v2125_v42 }
 0x79b   :  { %v4558_v21 = vpop.eup %4557 }
 0x79c   :  { %v2130_v44 = vmul.f32 %v4558_v21, %v2125_v42  ;;  %vm2136_vm9 = vweird.f32 %v4558_v21 }
 0x79d   :  { %v2114_v37 = vpop.xlane.xlu0 %2113  ;;  %vm2137_vm11 = vmor %vm2135_vm10, %vm2136_vm9 }
 0x79e   :  { %v2122_v49 = vmul.f32 %v2114_v37, %v4798_v32  ;;  %v2131_v38 = vmul.f32 %v4558_v21, %v2130_v44  ;;  %v4299_v37 = vld [vmem:[%s6154_s7 + $0x270] sm:$0xff] }
 0x7a0   :  { %v2126_v41 = vadd.f32 1e-05, %v2122_v49  ;;  %v2132_v53 = vmul.f32 0.5, %v2131_v38  ;;  %v4298_v38 = vld [vmem:[%s6154_s7 + $0x268] sm:$0xff] }
 0x7a2   :  { %4559 = vrsqrt.f32 %v2126_v41  ;;  %v2133_v47 = vsub.f32 1.5, %v2132_v53  ;;  %vm2145_vm13 = vweird.f32 %v2126_v41 }
 0x7a4   :  { %v2134_v1 = vmul.f32 %v4558_v21, %v2133_v47  ;;  %v4297_v47 = vld [vmem:[%s6154_s7 + $0x260] sm:$0xff] }
 0x7a6   :  { %v2138_v2 = vsel %vm2137_vm11, %v4558_v21, %v2134_v1  ;;  %v4300_v21 = vld [vmem:[%s6154_s7 + $0x278] sm:$0xff]  ;;  %v4295_v1 = vld [vmem:[%s6154_s7 + $0x250] sm:$0xff] }
 0x7a7   :  { %v2169_v4 = vmul.f32 %v2138_v2, %v5457_v17  ;;  %v4308_v2 = vld [vmem:[%s6154_s7 + $0x2b8] sm:$0xff] }
 0x7a8   :  { %v4560_v48 = vpop.eup %4559 }
 0x7a9   :  { %v2140_v8 = vmul.f32 %v4560_v48, %v2126_v41  ;;  %v2176_v9 = vmul.f32 %v5524_v56, %v2169_v4  ;;  %vm2146_vm12 = vweird.f32 %v4560_v48  ;;  %v4304_v4 = vld [vmem:[%s6154_s7 + $0x298] sm:$0xff] }
 0x7aa   :  { %vm2147_vm14 = vmor %vm2145_vm13, %vm2146_vm12 }
 0x7ab   :  { %v2141_v10 = vmul.f32 %v4560_v48, %v2140_v8  ;;  %v5546_v58 = vadd.f32 %v5535_v43, %v2176_v9  ;;  %v4302_v8 = vld [vmem:[%s6154_s7 + $0x288] sm:$0xff]  ;;  %v4301_v9 = vld [vmem:[%s6154_s7 + $0x280] sm:$0xff] }
 0x7ac   :  { %v2117_v59 = vpop.xlane.xlu2 %2116 }
 0x7ad   :  { %v2142_v12 = vmul.f32 0.5, %v2141_v10  ;;  %v2123_v13 = vmul.f32 %v2117_v59, %v4798_v32  ;;  %4317 = vmatmul.msk.f32.vlgmr.msra.gmra.mxu2 %vm114_vm3, %v5546_v58  ;;  %4321 = vmatmul.msk.f32.vlgmr.msra.gmra.mxu0 %vm114_vm3, %v5546_v58  ;;  %v4316_v10 = vld [vmem:[%s6154_s7 + $0x2f8] sm:$0xff]  ;;  %v4315_v59 = vld [vmem:[%s6154_s7 + $0x2f0] sm:$0xff] }
 0x7ae   :  { %2421 = vmatpush.msra.mxu2 %v4284_v55  ;;  %2490 = vmatpush.msra.mxu0 %v5561_v20  ;;  %v4296_v55 = vld [vmem:[%s6154_s7 + $0x258] sm:$0xff] }
 0x7af   :  { %v2143_v14 = vsub.f32 1.5, %v2142_v12  ;;  %v2127_v17 = vadd.f32 1e-05, %v2123_v13  ;;  %v4314_v12 = vld [vmem:[%s6154_s7 + $0x2e8] sm:$0xff]  ;;  %v4312_v13 = vld [vmem:[%s6154_s7 + $0x2d8] sm:$0xff] }
 0x7b0   :  { %2422 = vmatpush.msra.mxu2 %v4283_v63  ;;  %2491 = vmatpush.msra.mxu0 %v5573_v24 }
 0x7b1   :  { %v2144_v62 = vmul.f32 %v4560_v48, %v2143_v14  ;;  %4561 = vrsqrt.f32 %v2127_v17  ;;  %vm2155_vm0 = vweird.f32 %v2127_v17  ;;  %v4313_v14 = vld [vmem:[%s6154_s7 + $0x2e0] sm:$0xff] }
 0x7b2   :  { %2423 = vmatpush.msra.mxu2 %v4282_v52  ;;  %2492 = vmatpush.msra.mxu0 %v5584_v60 }
 0x7b3   :  { %v2148_v23 = vsel %vm2147_vm14, %v4560_v48, %v2144_v62  ;;  %v4307_v48 = vld [vmem:[%s6154_s7 + $0x2b0] sm:$0xff]  ;;  %v4310_v62 = vld [vmem:[%s6154_s7 + $0x2c8] sm:$0xff] }
 0x7b4   :  { %v2170_v25 = vmul.f32 %v2148_v23, %v5464_v22  ;;  %v2120_v27 = vpop.xlane.xlu1 %2119  ;;  %2424 = vmatpush.msra.mxu2 %v4281_v6  ;;  %2493 = vmatpush.msra.mxu0 %v5598_v35  ;;  %v4303_v6 = vld [vmem:[%s6154_s7 + $0x290] sm:$0xff] }
 0x7b5   :  { %v2124_v33 = vmul.f32 %v2120_v27, %v4798_v32 }
 0x7b6   :  { %v2177_v22 = vmul.f32 %v5524_v56, %v2170_v25 }
 0x7b7   :  { %v4562_v36 = vpop.eup %4561  ;;  %v2128_v39 = vadd.f32 1e-05, %v2124_v33 }
 0x7b8   :  { %v5603_v15 = vadd.f32 %v5535_v43, %v2177_v22  ;;  %v2150_v16 = vmul.f32 %v4562_v36, %v2127_v17  ;;  %vm2156_vm15 = vweird.f32 %v4562_v36  ;;  %v4311_v17 = vld [vmem:[%s6154_s7 + $0x2d0] sm:$0xff] }
 0x7b9   :  { %4563 = vrsqrt.f32 %v2128_v39  ;;  %vm2157_vm7 = vmor %vm2155_vm0, %vm2156_vm15  ;;  %vm2165_vm9 = vweird.f32 %v2128_v39 }
 0x7ba   :  { %v2151_v40 = vmul.f32 %v4562_v36, %v2150_v16  ;;  %4318 = vmatmul.msk.f32.gmra.mxu2 %vm114_vm3, %v5603_v15  ;;  %4322 = vmatmul.msk.f32.gmra.mxu0 %vm114_vm3, %v5603_v15 }
 0x7bc   :  { %v2152_v18 = vmul.f32 0.5, %v2151_v40 }
 0x7be   :  { %v2153_v45 = vsub.f32 1.5, %v2152_v18 }
 0x7bf   :  { %v4564_v50 = vpop.eup %4563 }
 0x7c0   :  { %v2154_v26 = vmul.f32 %v4562_v36, %v2153_v45  ;;  %v2160_v29 = vmul.f32 %v4564_v50, %v2128_v39  ;;  %vm2166_vm8 = vweird.f32 %v4564_v50 }
 0x7c1   :  { %vm2167_vm10 = vmor %vm2165_vm9, %vm2166_vm8  ;;  %vm4038_vm8 = vcmask 1041409   ;;  %vm4041_vm9 = vcmask 254976  }
 0x7c2   :  { %v2158_v31 = vsel %vm2157_vm7, %v4562_v36, %v2154_v26  ;;  %v2161_v42 = vmul.f32 %v4564_v50, %v2160_v29  ;;  %4329 = vmatmul.msk.f32.vlgmr.msrb.gmra.mxu0 %vm114_vm3, %v5546_v58 }
 0x7c3   :  { %v2171_v44 = vmul.f32 %v2158_v31, %v5471_v28  ;;  %2582 = vmatpush.msrb.mxu0 %v4300_v21 }
 0x7c4   :  { %v2162_v49 = vmul.f32 0.5, %v2161_v42 }
 0x7c5   :  { %v2178_v41 = vmul.f32 %v5524_v56, %v2171_v44  ;;  %2583 = vmatpush.msrb.mxu0 %v4299_v37 }
 0x7c6   :  { %v2163_v53 = vsub.f32 1.5, %v2162_v49 }
 0x7c7   :  { %v5625_v46 = vadd.f32 %v5535_v43, %v2178_v41  ;;  %2584 = vmatpush.msrb.mxu0 %v4298_v38 }
 0x7c8   :  { %v2164_v28 = vmul.f32 %v4564_v50, %v2163_v53 }
 0x7c9   :  { %4319 = vmatmul.msk.f32.vlgmr.msra.gmra.mxu3 %vm114_vm3, %v5625_v46  ;;  %4323 = vmatmul.msk.f32.vlgmr.msrb.gmra.mxu2 %vm114_vm3, %v5625_v46 }
 0x7ca   :  { %v2168_v61 = vsel %vm2167_vm10, %v4564_v50, %v2164_v28  ;;  %4327 = vmatmul.msk.f32.vlgmr.msrb.gmra.mxu1 %vm114_vm3, %v5625_v46  ;;  %4330 = vmatmul.msk.f32.gmra.mxu0 %vm114_vm3, %v5603_v15 }
 0x7cb   :  { %v2172_v63 = vmul.f32 %v2168_v61, %v5478_v34  ;;  %2444 = vmatpush.msra.mxu3 %v5556_v19  ;;  %2513 = vmatpush.msrb.mxu2 %v5561_v20  ;;  %v4294_v34 = vld [vmem:[%s6154_s7 + $0x248] sm:$0xff]  ;;  %v4309_v19 = vld [vmem:[%s6154_s7 + $0x2c0] sm:$0xff] }
 0x7cc   :  { %2559 = vmatpush.msrb.mxu1 %v4296_v55  ;;  %2585 = vmatpush.msrb.mxu0 %v4297_v47 }
 0x7cd   :  { %v2179_v51 = vmul.f32 %v5524_v56, %v2172_v63  ;;  %2445 = vmatpush.msra.mxu3 %v5566_v3  ;;  %2514 = vmatpush.msrb.mxu2 %v5573_v24  ;;  %v4293_v56 = vld [vmem:[%s6154_s7 + $0x240] sm:$0xff] }
 0x7ce   :  { %2560 = vmatpush.msrb.mxu1 %v4295_v1 }
 0x7cf   :  { %v5654_v52 = vadd.f32 %v5535_v43, %v2179_v51  ;;  %2446 = vmatpush.msra.mxu3 %v5579_v30  ;;  %2515 = vmatpush.msrb.mxu2 %v5584_v60  ;;  %v4306_v43 = vld [vmem:[%s6154_s7 + $0x2a8] sm:$0xff] }
 0x7d0   :  { %2561 = vmatpush.msrb.mxu1 %v4294_v34 }
 0x7d1   :  { %4320 = vmatmul.msk.f32.gmra.mxu3 %vm114_vm3, %v5654_v52  ;;  %4324 = vmatmul.msk.f32.gmra.mxu2 %vm114_vm3, %v5654_v52 }
 0x7d2   :  { %4328 = vmatmul.msk.f32.gmra.mxu1 %vm114_vm3, %v5654_v52  ;;  %4337 = vmatmul.msk.f32.vlgmr.msra.gmra.mxu0 %vm114_vm3, %v5546_v58 }
 0x7d3   :  { %2447 = vmatpush.msra.mxu3 %v5593_v5  ;;  %2516 = vmatpush.msrb.mxu2 %v5598_v35 }
 0x7d4   :  { %2562 = vmatpush.msrb.mxu1 %v4293_v56  ;;  %2674 = vmatpush.msra.mxu0 %v4308_v2 }
 0x7d6   :  { %2675 = vmatpush.msra.mxu0 %v4307_v48 }
 0x7d8   :  { %2676 = vmatpush.msra.mxu0 %v4306_v43 }
 0x7d9   :  { %4325 = vmatmul.msk.f32.vlgmr.msrb.gmra.mxu3 %vm114_vm3, %v5546_v58  ;;  %4331 = vmatmul.msk.f32.vlgmr.msra.gmra.mxu2 %vm114_vm3, %v5625_v46 }
 0x7da   :  { %4335 = vmatmul.msk.f32.vlgmr.msra.gmra.mxu1 %vm114_vm3, %v5625_v46  ;;  %4338 = vmatmul.msk.f32.gmra.mxu0 %vm114_vm3, %v5603_v15 }
 0x7db   :  { %2536 = vmatpush.msrb.mxu3 %v4296_v55  ;;  %2605 = vmatpush.msra.mxu2 %v4300_v21 }
 0x7dc   :  { %2651 = vmatpush.msra.mxu1 %v4304_v4  ;;  %2677 = vmatpush.msra.mxu0 %v4305_v7 }
 0x7dd   :  { %2537 = vmatpush.msrb.mxu3 %v4295_v1  ;;  %2606 = vmatpush.msra.mxu2 %v4299_v37 }
 0x7de   :  { %2652 = vmatpush.msra.mxu1 %v4303_v6 }
 0x7df   :  { %2538 = vmatpush.msrb.mxu3 %v4294_v34  ;;  %2607 = vmatpush.msra.mxu2 %v4298_v38 }
 0x7e0   :  { %2653 = vmatpush.msra.mxu1 %v4302_v8 }
 0x7e1   :  { %4326 = vmatmul.msk.f32.gmra.mxu3 %vm114_vm3, %v5603_v15  ;;  %4332 = vmatmul.msk.f32.gmra.mxu2 %vm114_vm3, %v5654_v52 }
 0x7e2   :  { %4336 = vmatmul.msk.f32.gmra.mxu1 %vm114_vm3, %v5654_v52  ;;  %4345 = vmatmul.msk.f32.vlgmr.msrb.gmra.mxu0 %vm114_vm3, %v5546_v58 }
 0x7e3   :  { %2539 = vmatpush.msrb.mxu3 %v4293_v56  ;;  %2608 = vmatpush.msra.mxu2 %v4297_v47 }
 0x7e4   :  { %2654 = vmatpush.msra.mxu1 %v4301_v9  ;;  %2766 = vmatpush.msrb.mxu0 %v4316_v10 }
 0x7e6   :  { %2767 = vmatpush.msrb.mxu0 %v4315_v59 }
 0x7e8   :  { %2768 = vmatpush.msrb.mxu0 %v4314_v12 }
 0x7e9   :  { %4333 = vmatmul.msk.f32.vlgmr.msra.gmra.mxu3 %vm114_vm3, %v5546_v58  ;;  %4339 = vmatmul.msk.f32.vlgmr.msrb.gmra.mxu2 %vm114_vm3, %v5625_v46 }
 0x7ea   :  { %4343 = vmatmul.msk.f32.vlgmr.msrb.gmra.mxu1 %vm114_vm3, %v5625_v46  ;;  %4346 = vmatmul.msk.f32.gmra.mxu0 %vm114_vm3, %v5603_v15 }
 0x7eb   :  { %2628 = vmatpush.msra.mxu3 %v4304_v4  ;;  %2697 = vmatpush.msrb.mxu2 %v4308_v2 }
 0x7ec   :  { %2743 = vmatpush.msrb.mxu1 %v4312_v13  ;;  %2769 = vmatpush.msrb.mxu0 %v4313_v14 }
 0x7ed   :  { %2629 = vmatpush.msra.mxu3 %v4303_v6  ;;  %2698 = vmatpush.msrb.mxu2 %v4307_v48 }
 0x7ee   :  { %2744 = vmatpush.msrb.mxu1 %v4311_v17 }
 0x7ef   :  { %2630 = vmatpush.msra.mxu3 %v4302_v8  ;;  %2699 = vmatpush.msrb.mxu2 %v4306_v43 }
 0x7f0   :  { %2745 = vmatpush.msrb.mxu1 %v4310_v62 }
 0x7f1   :  { %4334 = vmatmul.msk.f32.gmra.mxu3 %vm114_vm3, %v5603_v15  ;;  %4340 = vmatmul.msk.f32.gmra.mxu2 %vm114_vm3, %v5654_v52 }
 0x7f2   :  { %4344 = vmatmul.msk.f32.gmra.mxu1 %vm114_vm3, %v5654_v52  ;;  %4353 = vmatmul.msk.f32.vlgmr.msra.gmra.mxu0 %vm114_vm3, %v5546_v58 }
 0x7f3   :  { %2631 = vmatpush.msra.mxu3 %v4301_v9  ;;  %2700 = vmatpush.msrb.mxu2 %v4305_v7 }
 0x7f4   :  { %2746 = vmatpush.msrb.mxu1 %v4309_v19 }
 0x7f9   :  { %4341 = vmatmul.msk.f32.vlgmr.msrb.gmra.mxu3 %vm114_vm3, %v5546_v58  ;;  %4347 = vmatmul.msk.f32.vlgmr.msra.gmra.mxu2 %vm114_vm3, %v5625_v46 }
 0x7fa   :  { %4351 = vmatmul.msk.f32.vlgmr.msra.gmra.mxu1 %vm114_vm3, %v5625_v46  ;;  %4354 = vmatmul.msk.f32.gmra.mxu0 %vm114_vm3, %v5603_v15 }
 0x7fb   :  { %2720 = vmatpush.msrb.mxu3 %v4312_v13  ;;  %2789 = vmatpush.msra.mxu2 %v4316_v10 }
 0x7fd   :  { %2721 = vmatpush.msrb.mxu3 %v4311_v17  ;;  %2790 = vmatpush.msra.mxu2 %v4315_v59 }
 0x7ff   :  { %2722 = vmatpush.msrb.mxu3 %v4310_v62  ;;  %2791 = vmatpush.msra.mxu2 %v4314_v12 }
 0x801   :  { %4342 = vmatmul.msk.f32.gmra.mxu3 %vm114_vm3, %v5603_v15  ;;  %4348 = vmatmul.msk.f32.gmra.mxu2 %vm114_vm3, %v5654_v52 }
 0x802   :  { %4352 = vmatmul.msk.f32.gmra.mxu1 %vm114_vm3, %v5654_v52  ;;  %4361 = vmatmul.msk.f32.vlgmr.msrb.gmra.mxu0 %vm114_vm3, %v5546_v58 }
 0x803   :  { %2723 = vmatpush.msrb.mxu3 %v4309_v19  ;;  %2792 = vmatpush.msra.mxu2 %v4313_v14 }
 0x809   :  { %4349 = vmatmul.msk.f32.vlgmr.msra.gmra.mxu3 %vm114_vm3, %v5546_v58  ;;  %4355 = vmatmul.msk.f32.vlgmr.msrb.gmra.mxu2 %vm114_vm3, %v5625_v46 }
 0x80a   :  { %4359 = vmatmul.msk.f32.vlgmr.msrb.gmra.mxu1 %vm114_vm3, %v5625_v46  ;;  %4362 = vmatmul.msk.f32.gmra.mxu0 %vm114_vm3, %v5603_v15 }
 0x811   :  { %4350 = vmatmul.msk.f32.gmra.mxu3 %vm114_vm3, %v5603_v15  ;;  %4356 = vmatmul.msk.f32.gmra.mxu2 %vm114_vm3, %v5654_v52 }
 0x812   :  { %4360 = vmatmul.msk.f32.gmra.mxu1 %vm114_vm3, %v5654_v52 }
 0x819   :  { %4357 = vmatmul.msk.f32.vlgmr.msrb.gmra.mxu3 %vm114_vm3, %v5546_v58  ;;  %4363 = vmatmul.msk.f32.vlgmr.msra.gmra.mxu2 %vm114_vm3, %v5625_v46 }
 0x821   :  { %4358 = vmatmul.msk.f32.gmra.mxu3 %vm114_vm3, %v5603_v15  ;;  %4364 = vmatmul.msk.f32.gmra.mxu2 %vm114_vm3, %v5654_v52 }
 0x82a   :  { %v2311_v20 = vpop.f32.mrf.mxu0 }
 0x830   :  { %v2259_v23 = vpop.f32.mrf.mxu2 }
 0x837   :  { %v2314_v3 = vpop.f32.mrf.mxu0 }
 0x83d   :  { %v2262_v25 = vpop.f32.mrf.mxu2 }
 0x83f   :  { %v2403_v24 = vpop.f32.mrf.mxu0 }
 0x847   :  { %v2380_v27 = vpop.f32.mrf.mxu1  ;;  %v2406_v30 = vpop.f32.mrf.mxu0 }
 0x84c   :  { %v2288_v60 = vpop.f32.mrf.mxu3  ;;  %v2334_v33 = vpop.f32.mrf.mxu2 }
 0x84f   :  { %v2383_v22 = vpop.f32.mrf.mxu1  ;;  %v2495_v58 = vpop.f32.mrf.mxu0 }
 0x854   :  { %v2291_v5 = vpop.f32.mrf.mxu3  ;;  %v2337_v35 = vpop.f32.mrf.mxu2 }
 0x857   :  { %v2472_v36 = vpop.f32.mrf.mxu1  ;;  %v2498_v39 = vpop.f32.mrf.mxu0 }
 0x858   :  { %4373 = vmatpush.xpose.msk.msra.mxu0 %vm844_vm2, %v2498_v39 }
 0x85c   :  { %v2357_v15 = vpop.f32.mrf.mxu3  ;;  %v2426_v16 = vpop.f32.mrf.mxu2  ;;  %4374 = vmatpush.xpose.msk.msra.mxu0 %vm844_vm2, %v2495_v58 }
 0x85f   :  { %v2475_v40 = vpop.f32.mrf.mxu1  ;;  %v2587_v18 = vpop.f32.mrf.mxu0  ;;  %4375 = vmatmul.msk.f32.vlgmr.msra.gmra.mxu0 %vm844_vm2, %v2311_v20 }
 0x860   :  { %4369 = vmatpush.xpose.msk.msra.mxu1 %vm844_vm2, %v2475_v40 }
 0x864   :  { %4370 = vmatpush.xpose.msk.msra.mxu1 %vm844_vm2, %v2472_v36  ;;  %v2360_v45 = vpop.f32.mrf.mxu3  ;;  %v2429_v50 = vpop.f32.mrf.mxu2 }
 0x867   :  { %v2564_v26 = vpop.f32.mrf.mxu1  ;;  %4371 = vmatmul.msk.f32.vlgmr.msra.gmra.mxu1 %vm844_vm2, %v2288_v60  ;;  %v2590_v29 = vpop.f32.mrf.mxu0  ;;  %4376 = vmatmul.msk.f32.gmra.mxu0 %vm844_vm2, %v2314_v3 }
 0x868   :  { %4389 = vmatpush.xpose.msk.msrb.mxu0 %vm844_vm2, %v2590_v29 }
 0x86c   :  { %v2449_v31 = vpop.f32.mrf.mxu3  ;;  %v2518_v42 = vpop.f32.mrf.mxu2  ;;  %4390 = vmatpush.xpose.msk.msrb.mxu0 %vm844_vm2, %v2587_v18 }
 0x86f   :  { %v2567_v21 = vpop.f32.mrf.mxu1  ;;  %4372 = vmatmul.msk.f32.gmra.mxu1 %vm844_vm2, %v2291_v5  ;;  %v2679_v44 = vpop.f32.mrf.mxu0  ;;  %4391 = vmatmul.msk.f32.vlgmr.msrb.gmra.mxu0 %vm844_vm2, %v2403_v24 }
 0x870   :  { %4385 = vmatpush.xpose.msk.msrb.mxu1 %vm844_vm2, %v2567_v21 }
 0x874   :  { %4386 = vmatpush.xpose.msk.msrb.mxu1 %vm844_vm2, %v2564_v26  ;;  %v2452_v37 = vpop.f32.mrf.mxu3  ;;  %v2521_v49 = vpop.f32.mrf.mxu2 }
 0x875   :  { %4365 = vmatpush.xpose.msk.msra.mxu3 %vm844_vm2, %v2452_v37  ;;  %4377 = vmatpush.xpose.msk.msrb.mxu2 %vm844_vm2, %v2521_v49 }
 0x877   :  { %v2656_v38 = vpop.f32.mrf.mxu1  ;;  %4387 = vmatmul.msk.f32.vlgmr.msrb.gmra.mxu1 %vm844_vm2, %v2380_v27  ;;  %v2682_v41 = vpop.f32.mrf.mxu0  ;;  %4392 = vmatmul.msk.f32.gmra.mxu0 %vm844_vm2, %v2406_v30 }
 0x878   :  { %4403 = vmatpush.msk.msra.mxu0 %vm1325_vm4, %v2682_v41 }
 0x879   :  { %4366 = vmatpush.xpose.msk.msra.mxu3 %vm844_vm2, %v2449_v31  ;;  %4378 = vmatpush.xpose.msk.msrb.mxu2 %vm844_vm2, %v2518_v42 }
 0x87a   :  { %3360 = vmatpush.msra.mxu0 %v2679_v44 }
 0x87c   :  { %v2541_v53 = vpop.f32.mrf.mxu3  ;;  %v2610_v46 = vpop.f32.mrf.mxu2  ;;  %4367 = vmatmul.msk.f32.vlgmr.msra.gmra.mxu3 %vm844_vm2, %v2259_v23  ;;  %4379 = vmatmul.msk.f32.vlgmr.msrb.gmra.mxu2 %vm844_vm2, %v2334_v33 }
 0x87f   :  { %v2659_v28 = vpop.f32.mrf.mxu1  ;;  %4388 = vmatmul.msk.f32.gmra.mxu1 %vm844_vm2, %v2383_v22  ;;  %v2771_v55 = vpop.f32.mrf.mxu0 }
 0x880   :  { %4400 = vmatpush.msk.msra.mxu1 %vm1325_vm4, %v2659_v28 }
 0x882   :  { %3328 = vmatpush.msra.mxu1 %v2656_v38 }
 0x884   :  { %v2544_v47 = vpop.f32.mrf.mxu3  ;;  %v2613_v61 = vpop.f32.mrf.mxu2  ;;  %4368 = vmatmul.msk.f32.gmra.mxu3 %vm844_vm2, %v2262_v25  ;;  %4380 = vmatmul.msk.f32.gmra.mxu2 %vm844_vm2, %v2337_v35 }
 0x885   :  { %4381 = vmatpush.xpose.msk.msrb.mxu3 %vm844_vm2, %v2544_v47  ;;  %4393 = vmatpush.xpose.msk.msra.mxu2 %vm844_vm2, %v2613_v61 }
 0x887   :  { %v2748_v63 = vpop.f32.mrf.mxu1  ;;  %v2774_v1 = vpop.f32.mrf.mxu0 }
 0x888   :  { %4415 = vmatpush.msk.msrb.mxu0 %vm1325_vm4, %v2774_v1 }
 0x889   :  { %4382 = vmatpush.xpose.msk.msrb.mxu3 %vm844_vm2, %v2541_v53  ;;  %4394 = vmatpush.xpose.msk.msra.mxu2 %vm844_vm2, %v2610_v46 }
 0x88a   :  { %3488 = vmatpush.msrb.mxu0 %v2771_v55 }
 0x88c   :  { %v2633_v51 = vpop.f32.mrf.mxu3  ;;  %v2702_v34 = vpop.f32.mrf.mxu2  ;;  %4383 = vmatmul.msk.f32.vlgmr.msrb.gmra.mxu3 %vm844_vm2, %v2357_v15  ;;  %4395 = vmatmul.msk.f32.vlgmr.msra.gmra.mxu2 %vm844_vm2, %v2426_v16 }
 0x88f   :  { %v2751_v52 = vpop.f32.mrf.mxu1 }
 0x890   :  { %4412 = vmatpush.msk.msrb.mxu1 %vm1325_vm4, %v2751_v52 }
 0x892   :  { %3456 = vmatpush.msrb.mxu1 %v2748_v63 }
 0x894   :  { %v2636_v56 = vpop.f32.mrf.mxu3  ;;  %v2705_v2 = vpop.f32.mrf.mxu2  ;;  %4384 = vmatmul.msk.f32.gmra.mxu3 %vm844_vm2, %v2360_v45  ;;  %4396 = vmatmul.msk.f32.gmra.mxu2 %vm844_vm2, %v2429_v50 }
 0x895   :  { %4397 = vmatpush.msk.msra.mxu3 %vm1325_vm4, %v2636_v56  ;;  %4406 = vmatpush.msk.msrb.mxu2 %vm1325_vm4, %v2705_v2 }
 0x897   :  { %3296 = vmatpush.msra.mxu3 %v2633_v51  ;;  %3392 = vmatpush.msrb.mxu2 %v2702_v34 }
 0x89c   :  { %v2725_v48 = vpop.f32.mrf.mxu3  ;;  %v2794_v43 = vpop.f32.mrf.mxu2 }
 0x8a4   :  { %v2728_v4 = vpop.f32.mrf.mxu3  ;;  %v2797_v7 = vpop.f32.mrf.mxu2 }
 0x8a5   :  { %4409 = vmatpush.msk.msrb.mxu3 %vm1325_vm4, %v2728_v4  ;;  %4418 = vmatpush.msk.msra.mxu2 %vm1325_vm4, %v2797_v7 }
 0x8a7   :  { %3424 = vmatpush.msrb.mxu3 %v2725_v48  ;;  %3520 = vmatpush.msra.mxu2 %v2794_v43 }
 0x8dc   :  { %v2899_v13 = vpop.f32.mrf.mxu0 }
 0x8dd   :  { %v5837_v17 = vmul.f32 0.35355338, %v2899_v13 }
 0x8df   :  { %v3108_v23 = vsel %vm1141_vm5, %v5837_v17, -inf }
 0x8e4   :  { %v2864_v14 = vpop.f32.mrf.mxu1  ;;  %v2902_v30 = vpop.f32.mrf.mxu0 }
 0x8e5   :  { %v5849_v27 = vmul.f32 0.35355338, %v2864_v14  ;;  %v5857_v36 = vmul.f32 0.35355338, %v2902_v30 }
 0x8e7   :  { %v3102_v58 = vsel %vm1141_vm5, %v5849_v27, -inf  ;;  %v3111_v45 = vsel %vm1145_vm6, %v5857_v36, -inf }
 0x8ec   :  { %v2867_v33 = vpop.f32.mrf.mxu1  ;;  %v3039_v40 = vpop.f32.mrf.mxu0 }
 0x8ed   :  { %v5869_v29 = vmul.f32 0.35355338, %v2867_v33  ;;  %v5871_v31 = vmul.f32 0.35355338, %v3039_v40 }
 0x8ef   :  { %v3105_v21 = vsel %vm1145_vm6, %v5869_v29, -inf  ;;  %v3132_v44 = vsel %vm1141_vm5, %v5871_v31, -inf }
 0x8f4   :  { %v3004_v18 = vpop.f32.mrf.mxu1  ;;  %v3042_v37 = vpop.f32.mrf.mxu0 }
 0x8f5   :  { %v5873_v42 = vmul.f32 0.35355338, %v3004_v18  ;;  %v5881_v53 = vmul.f32 0.35355338, %v3042_v37 }
 0x8f7   :  { %v3126_v38 = vsel %vm1141_vm5, %v5873_v42, -inf  ;;  %v3135_v55 = vsel %vm1145_vm6, %v5881_v53, -inf }
 0x8fc   :  { %v3007_v41 = vpop.f32.mrf.mxu1 }
 0x8fd   :  { %v5885_v28 = vmul.f32 0.35355338, %v3007_v41 }
 0x8ff   :  { %v2829_v6 = vpop.f32.mrf.mxu3  ;;  %v2934_v8 = vpop.f32.mrf.mxu2  ;;  %v3129_v61 = vsel %vm1145_vm6, %v5885_v28, -inf }
 0x900   :  { %v5829_v9 = vmul.f32 0.35355338, %v2829_v6  ;;  %v5831_v10 = vmul.f32 0.35355338, %v2934_v8 }
 0x902   :  { %v3096_v59 = vsel %vm1141_vm5, %v5829_v9, -inf  ;;  %v3114_v12 = vsel %vm1141_vm5, %v5831_v10, -inf }
 0x903   :  { %3097 = vmax.xlane.f32.xlu2 %v3096_v59  ;;  %3115 = vmax.xlane.f32.xlu1 %v3114_v12 }
 0x907   :  { %v2832_v62 = vpop.f32.mrf.mxu3  ;;  %v2937_v19 = vpop.f32.mrf.mxu2 }
 0x908   :  { %v5839_v20 = vmul.f32 0.35355338, %v2832_v62  ;;  %v5841_v3 = vmul.f32 0.35355338, %v2937_v19 }
 0x90a   :  { %v3099_v24 = vsel %vm1145_vm6, %v5839_v20, -inf  ;;  %v3117_v25 = vsel %vm1145_vm6, %v5841_v3, -inf }
 0x90b   :  { %3109 = vmax.xlane.f32.xlu2 %v3108_v23  ;;  %3100 = vmax.xlane.f32.xlu0 %v3099_v24 }
 0x90c   :  { %3118 = vmax.xlane.f32.xlu1 %v3117_v25 }
 0x90f   :  { %v2969_v60 = vpop.f32.mrf.mxu3  ;;  %v3074_v35 = vpop.f32.mrf.mxu2 }
 0x910   :  { %v5851_v22 = vmul.f32 0.35355338, %v2969_v60  ;;  %v5859_v39 = vmul.f32 0.35355338, %v3074_v35 }
 0x912   :  { %v3120_v5 = vsel %vm1141_vm5, %v5851_v22, -inf  ;;  %v3138_v26 = vsel %vm1141_vm5, %v5859_v39, -inf }
 0x913   :  { %3103 = vmax.xlane.f32.xlu2 %v3102_v58  ;;  %3121 = vmax.xlane.f32.xlu0 %v3120_v5 }
 0x917   :  { %v2972_v15 = vpop.f32.mrf.mxu3  ;;  %v3077_v49 = vpop.f32.mrf.mxu2 }
 0x918   :  { %v5861_v16 = vmul.f32 0.35355338, %v2972_v15  ;;  %v5883_v46 = vmul.f32 0.35355338, %v3077_v49 }
 0x91a   :  { %v3123_v50 = vsel %vm1145_vm6, %v5861_v16, -inf  ;;  %v3141_v47 = vsel %vm1145_vm6, %v5883_v46, -inf }
 0x91b   :  { %3112 = vmax.xlane.f32.xlu0 %v3111_v45  ;;  %3124 = vmax.xlane.f32.xlu1 %v3123_v50 }
 0x91c   :  { %3139 = vmax.xlane.f32.xlu2 %v3138_v26 }
 0x923   :  { %3106 = vmax.xlane.f32.xlu0 %v3105_v21  ;;  %3133 = vmax.xlane.f32.xlu1 %v3132_v44 }
 0x924   :  { %3127 = vmax.xlane.f32.xlu2 %v3126_v38 }
 0x92b   :  { %3136 = vmax.xlane.f32.xlu1 %v3135_v55  ;;  %3142 = vmax.xlane.f32.xlu0 %v3141_v47 }
 0x92c   :  { %3130 = vmax.xlane.f32.xlu2 %v3129_v61 }
 0x976   :  { %v3098_v63 = vpop.xlane.xlu2 %3097  ;;  %v3116_v1 = vpop.xlane.xlu1 %3115 }
 0x977   :  { %v3144_v51 = vsub.f32 %v5829_v9, %v3098_v63  ;;  %v3150_v34 = vsub.f32 %v5831_v10, %v3116_v1 }
 0x979   :  { %v3160_v52 = vmul.f32 1.442695, %v3144_v51  ;;  %v3172_v56 = vmul.f32 1.442695, %v3150_v34 }
 0x97b   :  { %4565 = vpow2.f32 %v3160_v52 }
 0x97c   :  { %4567 = vpow2.f32 %v3172_v56 }
 0x97e   :  { %v3110_v2 = vpop.xlane.xlu2 %3109  ;;  %v3101_v48 = vpop.xlane.xlu0 %3100 }
 0x97f   :  { %v3148_v43 = vsub.f32 %v5837_v17, %v3110_v2  ;;  %v3145_v4 = vsub.f32 %v5839_v20, %v3101_v48  ;;  %v3119_v7 = vpop.xlane.xlu1 %3118 }
 0x980   :  { %v3151_v6 = vsub.f32 %v5841_v3, %v3119_v7 }
 0x981   :  { %v5898_v8 = vpop.eup %4565  ;;  %v3168_v59 = vmul.f32 1.442695, %v3148_v43  ;;  %v3162_v12 = vmul.f32 1.442695, %v3145_v4 }
 0x982   :  { %v5900_v9 = vpop.eup %4567  ;;  %v3174_v10 = vmul.f32 1.442695, %v3151_v6  ;;  %v3192_v13 = vsel %vm1141_vm5, %v5898_v8, 0.0 }
 0x983   :  { %4569 = vpow2.f32 %v3168_v59  ;;  %v3210_v14 = vsel %vm1141_vm5, %v5900_v9, 0.0  ;;  %3193 = vadd.xlane.f32.xlu0 %v3192_v13 }
 0x984   :  { %4571 = vpow2.f32 %v3162_v12  ;;  %3211 = vadd.xlane.f32.xlu2 %v3210_v14 }
 0x985   :  { %4573 = vpow2.f32 %v3174_v10 }
 0x986   :  { %v3104_v17 = vpop.xlane.xlu2 %3103  ;;  %v3122_v62 = vpop.xlane.xlu0 %3121 }
 0x987   :  { %v3146_v19 = vsub.f32 %v5849_v27, %v3104_v17  ;;  %v3152_v20 = vsub.f32 %v5851_v22, %v3122_v62 }
 0x989   :  { %v5908_v3 = vpop.eup %4569  ;;  %v3164_v23 = vmul.f32 1.442695, %v3146_v19  ;;  %v3176_v24 = vmul.f32 1.442695, %v3152_v20 }
 0x98a   :  { %v5910_v25 = vpop.eup %4571  ;;  %v3204_v30 = vsel %vm1141_vm5, %v5908_v3, 0.0 }
 0x98b   :  { %v5914_v60 = vpop.eup %4573  ;;  %4575 = vpow2.f32 %v3164_v23  ;;  %v3195_v33 = vsel %vm1145_vm6, %v5910_v25, 0.0  ;;  %3205 = vadd.xlane.f32.xlu0 %v3204_v30 }
 0x98c   :  { %4577 = vpow2.f32 %v3176_v24  ;;  %3196 = vadd.xlane.f32.xlu1 %v3195_v33  ;;  %v3213_v27 = vsel %vm1145_vm6, %v5914_v60, 0.0 }
 0x98d   :  { %3214 = vadd.xlane.f32.xlu2 %v3213_v27 }
 0x98e   :  { %v3113_v22 = vpop.xlane.xlu0 %3112  ;;  %v3125_v58 = vpop.xlane.xlu1 %3124 }
 0x98f   :  { %v3149_v5 = vsub.f32 %v5857_v36, %v3113_v22  ;;  %v3153_v35 = vsub.f32 %v5861_v16, %v3125_v58  ;;  %v3140_v15 = vpop.xlane.xlu2 %3139 }
 0x990   :  { %v3158_v40 = vsub.f32 %v5859_v39, %v3140_v15 }
 0x991   :  { %v5923_v18 = vpop.eup %4575  ;;  %v3170_v45 = vmul.f32 1.442695, %v3149_v5  ;;  %v3178_v50 = vmul.f32 1.442695, %v3153_v35 }
 0x992   :  { %v5925_v26 = vpop.eup %4577  ;;  %v3188_v21 = vmul.f32 1.442695, %v3158_v40  ;;  %v3198_v44 = vsel %vm1141_vm5, %v5923_v18, 0.0 }
 0x993   :  { %4579 = vpow2.f32 %v3170_v45  ;;  %v3216_v37 = vsel %vm1141_vm5, %v5925_v26, 0.0  ;;  %3199 = vadd.xlane.f32.xlu0 %v3198_v44 }
 0x994   :  { %4581 = vpow2.f32 %v3178_v50  ;;  %3217 = vadd.xlane.f32.xlu1 %v3216_v37 }
 0x995   :  { %4583 = vpow2.f32 %v3188_v21 }
 0x996   :  { %v3107_v36 = vpop.xlane.xlu0 %3106  ;;  %v3134_v39 = vpop.xlane.xlu1 %3133 }
 0x997   :  { %v3147_v16 = vsub.f32 %v5869_v29, %v3107_v36  ;;  %v3156_v49 = vsub.f32 %v5871_v31, %v3134_v39  ;;  %v3128_v38 = vpop.xlane.xlu2 %3127 }
 0x998   :  { %v3154_v41 = vsub.f32 %v5873_v42, %v3128_v38 }
 0x999   :  { %v5934_v55 = vpop.eup %4579  ;;  %v3166_v47 = vmul.f32 1.442695, %v3147_v16  ;;  %v3184_v61 = vmul.f32 1.442695, %v3156_v49 }
 0x99a   :  { %v5936_v63 = vpop.eup %4581  ;;  %v3180_v1 = vmul.f32 1.442695, %v3154_v41  ;;  %v3207_v51 = vsel %vm1145_vm6, %v5934_v55, 0.0 }
 0x99b   :  { %v5940_v34 = vpop.eup %4583  ;;  %4585 = vpow2.f32 %v3166_v47  ;;  %v3219_v29 = vsel %vm1145_vm6, %v5936_v63, 0.0 }
 0x99c   :  { %4587 = vpow2.f32 %v3184_v61  ;;  %3208 = vadd.xlane.f32.xlu1 %v3207_v51  ;;  %3220 = vadd.xlane.f32.xlu2 %v3219_v29  ;;  %v3234_v31 = vsel %vm1141_vm5, %v5940_v34, 0.0 }
 0x99d   :  { %4589 = vpow2.f32 %v3180_v1  ;;  %3235 = vadd.xlane.f32.xlu0 %v3234_v31 }
 0x99e   :  { %v3137_v42 = vpop.xlane.xlu1 %3136  ;;  %v3143_v52 = vpop.xlane.xlu0 %3142 }
 0x99f   :  { %v3157_v56 = vsub.f32 %v5881_v53, %v3137_v42  ;;  %v3131_v2 = vpop.xlane.xlu2 %3130  ;;  %v3159_v48 = vsub.f32 %v5883_v46, %v3143_v52 }
 0x9a0   :  { %v3155_v43 = vsub.f32 %v5885_v28, %v3131_v2 }
 0x9a1   :  { %v5949_v4 = vpop.eup %4585  ;;  %v3186_v7 = vmul.f32 1.442695, %v3157_v56  ;;  %v3190_v6 = vmul.f32 1.442695, %v3159_v48 }
 0x9a2   :  { %v5951_v59 = vpop.eup %4587  ;;  %v3182_v12 = vmul.f32 1.442695, %v3155_v43  ;;  %v3201_v10 = vsel %vm1145_vm6, %v5949_v4, 0.0 }
 0x9a3   :  { %v5955_v13 = vpop.eup %4589  ;;  %4591 = vpow2.f32 %v3186_v7  ;;  %v3228_v53 = vsel %vm1141_vm5, %v5951_v59, 0.0 }
 0x9a4   :  { %4593 = vpow2.f32 %v3182_v12  ;;  %3202 = vadd.xlane.f32.xlu1 %v3201_v10  ;;  %3229 = vadd.xlane.f32.xlu2 %v3228_v53  ;;  %v3222_v46 = vsel %vm1141_vm5, %v5955_v13, 0.0  ;;  %v4422_v10 = vld [vmem:[%s6155_s8 + $0x28] sm:$0xff]  ;;  %v4424_v53 = vld [vmem:[%s6155_s8 + $0x38] sm:$0xff] }
 0x9a5   :  { %4595 = vpow2.f32 %v3190_v6  ;;  %3223 = vadd.xlane.f32.xlu0 %v3222_v46 }
 0x9a9   :  { %v5961_v28 = vpop.eup %4591 }
 0x9aa   :  { %v5963_v14 = vpop.eup %4593  ;;  %v3231_v17 = vsel %vm1145_vm6, %v5961_v28, 0.0 }
 0x9ab   :  { %v5967_v62 = vpop.eup %4595  ;;  %v3225_v19 = vsel %vm1145_vm6, %v5963_v14, 0.0 }
 0x9ac   :  { %3232 = vadd.xlane.f32.xlu2 %v3231_v17  ;;  %v3237_v20 = vsel %vm1145_vm6, %v5967_v62, 0.0 }
 0x9ad   :  { %3226 = vadd.xlane.f32.xlu0 %v3225_v19  ;;  %3238 = vadd.xlane.f32.xlu1 %v3237_v20 }
 0x9f6   :  { %v3194_v23 = vpop.xlane.xlu0 %3193 }
 0x9f7   :  { %v3212_v24 = vpop.xlane.xlu2 %3211  ;;  %4597 = vrcp.f32 %v3194_v23 }
 0x9f8   :  { %4599 = vrcp.f32 %v3212_v24 }
 0x9fd   :  { %v4598_v30 = vpop.eup %4597 }
 0x9fe   :  { %v4600_v33 = vpop.eup %4599  ;;  %v3256_v27 = vmul.f32 %v4598_v30, %v5898_v8  ;;  %v3206_v22 = vpop.xlane.xlu0 %3205 }
 0x9ff   :  { %v3262_v58 = vmul.f32 %v4600_v33, %v5900_v9  ;;  %v3197_v5 = vpop.xlane.xlu1 %3196  ;;  %4601 = vrcp.f32 %v3206_v22 }
 0xa00   :  { %4603 = vrcp.f32 %v3197_v5  ;;  %v3215_v35 = vpop.xlane.xlu2 %3214  ;;  %4398 = vmatmul.msk.f32.vlgmr.msra.gmra.mxu3 %vm1141_vm5, %v3256_v27 }
 0xa01   :  { %4605 = vrcp.f32 %v3215_v35  ;;  %4407 = vmatmul.msk.f32.vlgmr.msrb.gmra.mxu2 %vm1141_vm5, %v3262_v58 }
 0xa02   :  { %3641 = vmatpush.msrb.mxu2 %v4422_v10 }
 0xa05   :  { %v4602_v15 = vpop.eup %4601 }
 0xa06   :  { %v4604_v40 = vpop.eup %4603  ;;  %v3260_v45 = vmul.f32 %v4602_v15, %v5908_v3  ;;  %v3200_v50 = vpop.xlane.xlu0 %3199 }
 0xa07   :  { %v4606_v21 = vpop.eup %4605  ;;  %v3218_v44 = vpop.xlane.xlu1 %3217  ;;  %4607 = vrcp.f32 %v3200_v50  ;;  %v3257_v8 = vmul.f32 %v4604_v40, %v5910_v25  ;;  %v4421_v25 = vld [vmem:[%s6155_s8 + $0x20] sm:$0xff] }
 0xa08   :  { %4609 = vrcp.f32 %v3218_v44  ;;  %4404 = vmatmul.msk.f32.vlgmr.msra.gmra.mxu0 %vm1141_vm5, %v3260_v45  ;;  %v3263_v9 = vmul.f32 %v4606_v21, %v5914_v60  ;;  %3554 = vmatpush.msra.mxu3 %v4421_v25 }
 0xa09   :  { %4399 = vmatmul.msk.f32.gmra.mxu3 %vm1141_vm5, %v3257_v8  ;;  %3612 = vmatpush.msra.mxu0 %v4422_v10 }
 0xa0a   :  { %4408 = vmatmul.msk.f32.gmra.mxu2 %vm1141_vm5, %v3263_v9 }
 0xa0d   :  { %v4608_v37 = vpop.eup %4607 }
 0xa0e   :  { %v4610_v36 = vpop.eup %4609  ;;  %v3258_v39 = vmul.f32 %v4608_v37, %v5923_v18 }
 0xa0f   :  { %v3264_v3 = vmul.f32 %v4610_v36, %v5925_v26  ;;  %v3209_v16 = vpop.xlane.xlu1 %3208  ;;  %v3221_v49 = vpop.xlane.xlu2 %3220 }
 0xa10   :  { %4611 = vrcp.f32 %v3209_v16  ;;  %v3236_v38 = vpop.xlane.xlu0 %3235  ;;  %4401 = vmatmul.msk.f32.vlgmr.msra.gmra.mxu1 %vm1141_vm5, %v3258_v39 }
 0xa11   :  { %4613 = vrcp.f32 %v3221_v49  ;;  %4410 = vmatmul.msk.f32.vlgmr.msrb.gmra.mxu3 %vm1141_vm5, %v3264_v3  ;;  %3583 = vmatpush.msra.mxu1 %v4421_v25  ;;  %v4468_v49 = vld [vmem:[%s6156_s9 + $0x1] ss:$0 sm:$0xff] }
 0xa12   :  { %4615 = vrcp.f32 %v3236_v38 }
 0xa16   :  { %v4612_v60 = vpop.eup %4611 }
 0xa17   :  { %v4614_v18 = vpop.eup %4613  ;;  %v3203_v41 = vpop.xlane.xlu1 %3202  ;;  %v3261_v47 = vmul.f32 %v4612_v60, %v5934_v55 }
 0xa18   :  { %v3230_v26 = vpop.xlane.xlu2 %3229  ;;  %v4616_v61 = vpop.eup %4615  ;;  %4617 = vrcp.f32 %v3203_v41  ;;  %v3265_v1 = vmul.f32 %v4614_v18, %v5936_v63 }
 0xa19   :  { %v3270_v51 = vmul.f32 %v4616_v61, %v5940_v34  ;;  %4619 = vrcp.f32 %v3230_v26  ;;  %v3224_v29 = vpop.xlane.xlu0 %3223  ;;  %4405 = vmatmul.msk.f32.gmra.mxu0 %vm1141_vm5, %v3261_v47 }
 0xa1a   :  { %4411 = vmatmul.msk.f32.gmra.mxu3 %vm1141_vm5, %v3265_v1  ;;  %4621 = vrcp.f32 %v3224_v29 }
 0xa1b   :  { %4419 = vmatmul.msk.f32.vlgmr.msra.gmra.mxu2 %vm1141_vm5, %v3270_v51 }
 0xa1c   :  { %3757 = vmatpush.msra.mxu2 %v4424_v53 }
 0xa1e   :  { %v4618_v31 = vpop.eup %4617 }
 0xa1f   :  { %v4620_v42 = vpop.eup %4619  ;;  %v3259_v55 = vmul.f32 %v4618_v31, %v5949_v4 }
 0xa20   :  { %v3233_v52 = vpop.xlane.xlu2 %3232  ;;  %v3268_v56 = vmul.f32 %v4620_v42, %v5951_v59  ;;  %v3239_v63 = vpop.xlane.xlu1 %3238 }
 0xa21   :  { %4623 = vrcp.f32 %v3233_v52  ;;  %4402 = vmatmul.msk.f32.gmra.mxu1 %vm1141_vm5, %v3259_v55  ;;  %v3227_v34 = vpop.xlane.xlu0 %3226  ;;  %v4622_v2 = vpop.eup %4621 }
 0xa22   :  { %4625 = vrcp.f32 %v3239_v63  ;;  %4416 = vmatmul.msk.f32.vlgmr.msrb.gmra.mxu0 %vm1141_vm5, %v3268_v56  ;;  %v3266_v7 = vmul.f32 %v4622_v2, %v5955_v13  ;;  %v4423_v13 = vld [vmem:[%s6155_s8 + $0x30] sm:$0xff] }
 0xa23   :  { %4627 = vrcp.f32 %v3227_v34  ;;  %3670 = vmatpush.msrb.mxu3 %v4423_v13  ;;  %3728 = vmatpush.msrb.mxu0 %v4424_v53 }
 0xa27   :  { %v4624_v48 = vpop.eup %4623 }
 0xa28   :  { %v4626_v43 = vpop.eup %4625  ;;  %v3269_v6 = vmul.f32 %v4624_v48, %v5961_v28 }
 0xa29   :  { %v3271_v4 = vmul.f32 %v4626_v43, %v5967_v62  ;;  %4413 = vmatmul.msk.f32.vlgmr.msrb.gmra.mxu1 %vm1141_vm5, %v3266_v7  ;;  %v4628_v59 = vpop.eup %4627 }
 0xa2a   :  { %4417 = vmatmul.msk.f32.gmra.mxu0 %vm1141_vm5, %v3269_v6  ;;  %v3267_v12 = vmul.f32 %v4628_v59, %v5963_v14  ;;  %3699 = vmatpush.msrb.mxu1 %v4423_v13 }
 0xa2b   :  { %4420 = vmatmul.msk.f32.gmra.mxu2 %vm1141_vm5, %v3271_v4 }
 0xa31   :  { %4414 = vmatmul.msk.f32.gmra.mxu1 %vm1141_vm5, %v3267_v12 }
 0xa83   :  { %v3298_v46 = vpop.f32.mrf.mxu3 }
 0xa84   :  { %v3394_v28 = vpop.f32.mrf.mxu2  ;;  %4425 = vmatmul.msk.f32.vlgmr.msra.gmra.mxu3 %vm844_vm2, %v3298_v46 }
 0xa85   :  { %4431 = vmatmul.msk.f32.vlgmr.msrb.gmra.mxu2 %vm844_vm2, %v3394_v28  ;;  %v3362_v14 = vpop.f32.mrf.mxu0 }
 0xa86   :  { %4429 = vmatmul.msk.f32.vlgmr.msra.gmra.mxu0 %vm844_vm2, %v3362_v14 }
 0xa8c   :  { %v3301_v17 = vpop.f32.mrf.mxu3 }
 0xa8d   :  { %v3397_v62 = vpop.f32.mrf.mxu2  ;;  %4426 = vmatmul.msk.f32.gmra.mxu3 %vm844_vm2, %v3301_v17  ;;  %v3330_v19 = vpop.f32.mrf.mxu1 }
 0xa8e   :  { %4432 = vmatmul.msk.f32.gmra.mxu2 %vm844_vm2, %v3397_v62  ;;  %4427 = vmatmul.msk.f32.vlgmr.msra.gmra.mxu1 %vm844_vm2, %v3330_v19 }
 0xa94   :  { %v3426_v20 = vpop.f32.mrf.mxu3 }
 0xa95   :  { %4433 = vmatmul.msk.f32.vlgmr.msrb.gmra.mxu3 %vm844_vm2, %v3426_v20 }
 0xa96   :  { %v3365_v23 = vpop.f32.mrf.mxu0 }
 0xa97   :  { %4430 = vmatmul.msk.f32.gmra.mxu0 %vm844_vm2, %v3365_v23 }
 0xa9d   :  { %v3429_v24 = vpop.f32.mrf.mxu3 }
 0xa9e   :  { %v3522_v30 = vpop.f32.mrf.mxu2  ;;  %4434 = vmatmul.msk.f32.gmra.mxu3 %vm844_vm2, %v3429_v24  ;;  %v3333_v33 = vpop.f32.mrf.mxu1 }
 0xa9f   :  { %4439 = vmatmul.msk.f32.vlgmr.msra.gmra.mxu2 %vm844_vm2, %v3522_v30  ;;  %v3490_v27 = vpop.f32.mrf.mxu0  ;;  %4428 = vmatmul.msk.f32.gmra.mxu1 %vm844_vm2, %v3333_v33 }
 0xaa0   :  { %4437 = vmatmul.msk.f32.vlgmr.msrb.gmra.mxu0 %vm844_vm2, %v3490_v27 }
 0xaa6   :  { %v3458_v22 = vpop.f32.mrf.mxu1 }
 0xaa7   :  { %v3493_v58 = vpop.f32.mrf.mxu0  ;;  %4435 = vmatmul.msk.f32.vlgmr.msrb.gmra.mxu1 %vm844_vm2, %v3458_v22 }
 0xaa8   :  { %4438 = vmatmul.msk.f32.gmra.mxu0 %vm844_vm2, %v3493_v58 }
 0xaae   :  { %v3525_v5 = vpop.f32.mrf.mxu2  ;;  %v3461_v35 = vpop.f32.mrf.mxu1 }
 0xaaf   :  { %4440 = vmatmul.msk.f32.gmra.mxu2 %vm844_vm2, %v3525_v5  ;;  %4436 = vmatmul.msk.f32.gmra.mxu1 %vm844_vm2, %v3461_v35 }
 0xb03   :  { %v3614_v40 = vpop.f32.mrf.mxu0 }
 0xb07   :  { %v3556_v15 = vpop.f32.mrf.mxu3 }
 0xb08   :  { %v3643_v50 = vpop.f32.mrf.mxu2  ;;  %v3765_v9 = vadd.f32 %v3614_v40, %v3556_v15 }
 0xb0b   :  { %v3585_v21 = vpop.f32.mrf.mxu1 }
 0xb0c   :  { %v3767_v41 = vadd.f32 %v3643_v50, %v3585_v21 }
 0xb10   :  { %v3559_v45 = vpop.f32.mrf.mxu3 }
 0xb11   :  { %v3646_v3 = vpop.f32.mrf.mxu2 }
 0xb14   :  { %v3617_v44 = vpop.f32.mrf.mxu0 }
 0xb15   :  { %v3766_v60 = vadd.f32 %v3617_v44, %v3559_v45 }
 0xb18   :  { %v3672_v8 = vpop.f32.mrf.mxu3 }
 0xb19   :  { %v3769_v37 = vadd.f32 %v3765_v9, %v3672_v8  ;;  %v4447_v9 = vld [vmem:[%s6159_s12 + $0x38] sm:$0xff] }
 0xb1a   :  { %3970 = vmatpush.msra.mxu3 %v4447_v9 }
 0xb1c   :  { %v3588_v36 = vpop.f32.mrf.mxu1 }
 0xb1d   :  { %v3730_v39 = vpop.f32.mrf.mxu0  ;;  %v3768_v48 = vadd.f32 %v3646_v3, %v3588_v36 }
 0xb1e   :  { %v3773_v16 = vadd.f32 %v3769_v37, %v3730_v39  ;;  %v4446_v39 = vld [vmem:[%s6159_s12 + $0x30] sm:$0xff] }
 0xb1f   :  { %3971 = vmatpush.msra.mxu3 %v4446_v39 }
 0xb20   :  { %v3777_v38 = vadd.f32 %v3773_v16, %v5436_v57  ;;  %v4445_v16 = vld [vmem:[%s6159_s12 + $0x28] sm:$0xff] }
 0xb21   :  { %v3675_v25 = vpop.f32.mrf.mxu3  ;;  %3972 = vmatpush.msra.mxu3 %v4445_v16 }
 0xb22   :  { %v6037_v18 = vadd.f32 %v4468_v49, %v3777_v38  ;;  %v3770_v26 = vadd.f32 %v3766_v60, %v3675_v25  ;;  %v3759_v29 = vpop.f32.mrf.mxu2  ;;  %v4444_v38 = vld [vmem:[%s6159_s12 + $0x20] sm:$0xff] }
 0xb23   :  { %3973 = vmatpush.msra.mxu3 %v4444_v38 }
 0xb24   :  { %v3794_v47 = vsel %vm114_vm3, %v6037_v18, 0.0  ;;  %v3701_v61 = vpop.f32.mrf.mxu1 }
 0xb25   :  { %3795 = vadd.xlane.f32.xlu1 %v3794_v47  ;;  %v3771_v1 = vadd.f32 %v3767_v41, %v3701_v61  ;;  %v3733_v51 = vpop.f32.mrf.mxu0 }
 0xb26   :  { %v3774_v31 = vadd.f32 %v3770_v26, %v3733_v51 }
 0xb27   :  { %v3775_v42 = vadd.f32 %v3771_v1, %v3759_v29  ;;  %v6090_v1 = vld [vmem:[%s6157_s10 + $0x1] ss:$0 sm:$0xff] }
 0xb28   :  { %v3778_v52 = vadd.f32 %v3774_v31, %v5441_v0 }
 0xb29   :  { %v3779_v57 = vadd.f32 %v3775_v42, %v5446_v54 }
 0xb2a   :  { %v3787_v55 = vadd.f32 %v4468_v49, %v3778_v52  ;;  %v6096_v52 = vld [vmem:[%s6158_s11 + $0x1] ss:$0 sm:$0xff] }
 0xb2b   :  { %v6043_v56 = vadd.f32 %v4468_v49, %v3779_v57 }
 0xb2c   :  { %v3797_v63 = vsel %vm102_vm1, %v3787_v55, 0.0  ;;  %v3704_v34 = vpop.f32.mrf.mxu1 }
 0xb2d   :  { %3798 = vadd.xlane.f32.xlu0 %v3797_v63  ;;  %v3800_v2 = vsel %vm114_vm3, %v6043_v56, 0.0  ;;  %v3772_v43 = vadd.f32 %v3768_v48, %v3704_v34 }
 0xb2e   :  { %3801 = vadd.xlane.f32.xlu2 %v3800_v2 }
 0xb32   :  { %v3762_v7 = vpop.f32.mrf.mxu2 }
 0xb33   :  { %v3776_v6 = vadd.f32 %v3772_v43, %v3762_v7 }
 0xb35   :  { %v3780_v4 = vadd.f32 %v3776_v6, %v5451_v11 }
 0xb37   :  { %v3789_v0 = vadd.f32 %v4468_v49, %v3780_v4 }
 0xb39   :  { %v3803_v54 = vsel %vm102_vm1, %v3789_v0, 0.0 }
 0xb3a   :  { %3804 = vadd.xlane.f32.xlu1 %v3803_v54 }
 0xb98   :  { %v3796_v59 = vpop.xlane.xlu1 %3795 }
 0xb99   :  { %v3806_v12 = vmul.f32 %v3796_v59, %v4798_v32 }
 0xb9b   :  { %v3810_v10 = vsub.f32 %v6037_v18, %v3806_v12 }
 0xb9d   :  { %v3814_v13 = vmul.f32 %v3810_v10, %v3810_v10 }
 0xb9f   :  { %v3818_v53 = vsel %vm114_vm3, %v3814_v13, 0.0 }
 0xba0   :  { %3819 = vadd.xlane.f32.xlu2 %v3818_v53  ;;  %v3799_v46 = vpop.xlane.xlu0 %3798 }
 0xba1   :  { %v3807_v28 = vmul.f32 %v3799_v46, %v4798_v32  ;;  %v3802_v14 = vpop.xlane.xlu2 %3801 }
 0xba2   :  { %v3808_v17 = vmul.f32 %v3802_v14, %v4798_v32 }
 0xba3   :  { %v6055_v11 = vsub.f32 %v3787_v55, %v3807_v28 }
 0xba4   :  { %v6058_v62 = vsub.f32 %v6043_v56, %v3808_v17 }
 0xba5   :  { %v3815_v19 = vmul.f32 %v6055_v11, %v6055_v11 }
 0xba6   :  { %v3816_v20 = vmul.f32 %v6058_v62, %v6058_v62 }
 0xba7   :  { %v3821_v23 = vsel %vm102_vm1, %v3815_v19, 0.0 }
 0xba8   :  { %3822 = vadd.xlane.f32.xlu1 %v3821_v23  ;;  %v3824_v24 = vsel %vm114_vm3, %v3816_v20, 0.0 }
 0xba9   :  { %3825 = vadd.xlane.f32.xlu0 %v3824_v24 }
 0xbad   :  { %v3805_v30 = vpop.xlane.xlu1 %3804 }
 0xbae   :  { %v3809_v33 = vmul.f32 %v3805_v30, %v4798_v32 }
 0xbb0   :  { %v6067_v27 = vsub.f32 %v3789_v0, %v3809_v33 }
 0xbb2   :  { %v3817_v22 = vmul.f32 %v6067_v27, %v6067_v27 }
 0xbb4   :  { %v3827_v58 = vsel %vm102_vm1, %v3817_v22, 0.0 }
 0xbb5   :  { %3828 = vadd.xlane.f32.xlu2 %v3827_v58 }
 0xc13   :  { %v3820_v5 = vpop.xlane.xlu2 %3819 }
 0xc14   :  { %v3830_v35 = vmul.f32 %v3820_v5, %v4798_v32 }
 0xc16   :  { %v3834_v15 = vadd.f32 1e-05, %v3830_v35 }
 0xc18   :  { %4629 = vrsqrt.f32 %v3834_v15  ;;  %vm3844_vm2 = vweird.f32 %v3834_v15 }
 0xc1b   :  { %v3823_v40 = vpop.xlane.xlu1 %3822 }
 0xc1c   :  { %v3831_v45 = vmul.f32 %v3823_v40, %v4798_v32  ;;  %v3826_v50 = vpop.xlane.xlu0 %3825 }
 0xc1d   :  { %v3832_v21 = vmul.f32 %v3826_v50, %v4798_v32 }
 0xc1e   :  { %v4630_v44 = vpop.eup %4629  ;;  %v3835_v8 = vadd.f32 1e-05, %v3831_v45 }
 0xc1f   :  { %v3839_v37 = vmul.f32 %v4630_v44, %v3834_v15  ;;  %v3836_v36 = vadd.f32 1e-05, %v3832_v21  ;;  %vm3845_vm1 = vweird.f32 %v4630_v44 }
 0xc20   :  { %4631 = vrsqrt.f32 %v3835_v8  ;;  %vm3846_vm4 = vmor %vm3844_vm2, %vm3845_vm1  ;;  %vm3854_vm11 = vweird.f32 %v3835_v8 }
 0xc21   :  { %v3840_v3 = vmul.f32 %v4630_v44, %v3839_v37  ;;  %4633 = vrsqrt.f32 %v3836_v36  ;;  %vm3864_vm13 = vweird.f32 %v3836_v36 }
 0xc23   :  { %v3841_v49 = vmul.f32 0.5, %v3840_v3 }
 0xc25   :  { %v3842_v25 = vsub.f32 1.5, %v3841_v49 }
 0xc26   :  { %v4632_v60 = vpop.eup %4631 }
 0xc27   :  { %v4634_v41 = vpop.eup %4633  ;;  %v3843_v26 = vmul.f32 %v4630_v44, %v3842_v25  ;;  %v3849_v47 = vmul.f32 %v4632_v60, %v3835_v8  ;;  %vm3855_vm5 = vweird.f32 %v4632_v60 }
 0xc28   :  { %v3829_v61 = vpop.xlane.xlu2 %3828  ;;  %v3859_v51 = vmul.f32 %v4634_v41, %v3836_v36  ;;  %vm3865_vm6 = vweird.f32 %v4634_v41  ;;  %vm3856_vm12 = vmor %vm3854_vm11, %vm3855_vm5 }
 0xc29   :  { %v3833_v29 = vmul.f32 %v3829_v61, %v4798_v32  ;;  %v3847_v31 = vsel %vm3846_vm4, %v4630_v44, %v3843_v26  ;;  %v3850_v42 = vmul.f32 %v4632_v60, %v3849_v47  ;;  %vm3866_vm14 = vmor %vm3864_vm13, %vm3865_vm6  ;;  %vm4124_vm4 = vcmask 74752  }
 0xc2a   :  { %v3878_v57 = vmul.f32 %v3847_v31, %v3810_v10  ;;  %v3860_v55 = vmul.f32 %v4634_v41, %v3859_v51 }
 0xc2b   :  { %v3837_v63 = vadd.f32 1e-05, %v3833_v29  ;;  %v3851_v34 = vmul.f32 0.5, %v3850_v42 }
 0xc2c   :  { %v3885_v2 = vmul.f32 %v6090_v1, %v3878_v57  ;;  %v3861_v48 = vmul.f32 0.5, %v3860_v55 }
 0xc2d   :  { %4635 = vrsqrt.f32 %v3837_v63  ;;  %v3852_v43 = vsub.f32 1.5, %v3851_v34  ;;  %vm3874_vm0 = vweird.f32 %v3837_v63 }
 0xc2e   :  { %v3892_v7 = vadd.f32 %v6096_v52, %v3885_v2  ;;  %v3862_v6 = vsub.f32 1.5, %v3861_v48 }
 0xc2f   :  { %v3853_v4 = vmul.f32 %v4632_v60, %v3852_v43 }
 0xc30   :  { %v3900_v0 = vrot.slane %v3892_v7, 1  ;;  %v3901_v54 = vrot.slane %v3892_v7, 2  ;;  %v3902_v59 = vrot.slane %v3892_v7, 3  ;;  %3924 = vst [vmem:[#allocation1] ss:$9 sm:$0xff] %v3892_v7  ;;  %v3903_v12 = vrot.slane %v3892_v7, 4 }
 0xc31   :  { %v3904_v13 = vrot.slane %v3892_v7, 5  ;;  %v3863_v53 = vmul.f32 %v4634_v41, %v3862_v6  ;;  %v3905_v46 = vrot.slane %v3892_v7, 6  ;;  %v3857_v28 = vsel %vm3856_vm12, %v4632_v60, %v3853_v4 }
 0xc32   :  { %3926 = vst [vmem:[#allocation1 + $0x1] ss:$9 sm:$0xff] %v3900_v0  ;;  %v3906_v17 = vrot.slane %v3892_v7, 7  ;;  %v3879_v24 = vmul.f32 %v3857_v28, %v6055_v11 }
 0xc33   :  { %v4636_v10 = vpop.eup %4635  ;;  %3928 = vst [vmem:[#allocation1 + $0x2] ss:$9 sm:$0xff] %v3901_v54  ;;  %v3867_v19 = vsel %vm3866_vm14, %v4634_v41, %v3863_v53 }
 0xc34   :  { %v3869_v14 = vmul.f32 %v4636_v10, %v3837_v63  ;;  %3930 = vst [vmem:[#allocation1 + $0x3] ss:$9 sm:$0xff] %v3902_v59  ;;  %v3880_v20 = vmul.f32 %v3867_v19, %v6058_v62  ;;  %v3886_v58 = vmul.f32 %v6090_v1, %v3879_v24  ;;  %vm3875_vm15 = vweird.f32 %v4636_v10  ;;  %v4091_v24 = vld [vmem:[%s6163_s16 + $0x8] sm:$0xff] }
 0xc35   :  { %3932 = vst [vmem:[#allocation1 + $0x4] ss:$9 sm:$0xff] %v3903_v12  ;;  %vm3876_vm7 = vmor %vm3874_vm0, %vm3875_vm15 }
 0xc36   :  { %v3870_v23 = vmul.f32 %v4636_v10, %v3869_v14  ;;  %3934 = vst [vmem:[#allocation1 + $0x5] ss:$9 sm:$0xff] %v3904_v13  ;;  %v3887_v30 = vmul.f32 %v6090_v1, %v3880_v20  ;;  %v3893_v15 = vadd.f32 %v6096_v52, %v3886_v58 }
 0xc37   :  { %3936 = vst [vmem:[#allocation1 + $0x6] ss:$9 sm:$0xff] %v3905_v46 }
 0xc38   :  { %v3871_v33 = vmul.f32 0.5, %v3870_v23  ;;  %3938 = vst [vmem:[#allocation1 + $0x7] ss:$9 sm:$0xff] %v3906_v17  ;;  %v3894_v5 = vadd.f32 %v6096_v52, %v3887_v30  ;;  %v4092_v23 = vld [vmem:[%s6163_s16 + $0x10] sm:$0xff]  ;;  %v4090_v30 = vld [vmem:[%s6163_s16] sm:$0xff] }
 0xc3a   :  { %v3872_v22 = vsub.f32 1.5, %v3871_v33  ;;  %v3907_v40 = vrot.slane %v3894_v5, 1  ;;  %v3908_v45 = vrot.slane %v3894_v5, 2  ;;  %v3909_v11 = vrot.slane %v3894_v5, 3 }
 0xc3b   :  { %v3910_v50 = vrot.slane %v3894_v5, 4  ;;  %v3911_v44 = vrot.slane %v3894_v5, 5  ;;  %v3912_v8 = vrot.slane %v3894_v5, 6  ;;  %v3913_v39 = vrot.slane %v3894_v5, 7 }
 0xc3c   :  { %v3873_v35 = vmul.f32 %v4636_v10, %v3872_v22 }
 0xc3e   :  { %v3877_v21 = vsel %vm3876_vm7, %v4636_v10, %v3873_v35 }
 0xc3f   :  { %v3939_v62 = vld [vmem:[#allocation1] sm:$0xff]  ;;  %v3881_v9 = vmul.f32 %v3877_v21, %v6067_v27 }
 0xc40   :  { %3940 = vst [vmem:[#allocation1] ss:$9 sm:$0xff] %v3893_v15  ;;  %4449 = vmatmul.msk.f32.vlgmr.msra.gmra.mxu3 %vm114_vm3, %v3939_v62  ;;  %v4471_v27 = vld [vmem:[%s6160_s13 + $0x1] ss:$0 sm:$0xff] }
 0xc41   :  { %3941 = vst [vmem:[#allocation1 + $0x1] ss:$9 sm:$0xff] %v3894_v5  ;;  %v3888_v37 = vmul.f32 %v6090_v1, %v3881_v9 }
 0xc42   :  { %3942 = vst [vmem:[#allocation1 + $0x2] ss:$9 sm:$0xff] %v3907_v40 }
 0xc43   :  { %3943 = vst [vmem:[#allocation1 + $0x3] ss:$9 sm:$0xff] %v3908_v45  ;;  %v3895_v36 = vadd.f32 %v6096_v52, %v3888_v37  ;;  %v4473_v37 = vld [vmem:[%s6162_s15] ss:$0 sm:$0xff] }
 0xc44   :  { %3944 = vst [vmem:[#allocation1 + $0x4] ss:$9 sm:$0xff] %v3909_v11 }
 0xc45   :  { %3945 = vst [vmem:[#allocation1 + $0x5] ss:$9 sm:$0xff] %v3910_v50  ;;  %v4472_v50 = vld [vmem:[%s6161_s14] ss:$0 sm:$0xff]  ;;  %s4670_s14 = smov [#allocation3]  }
 0xc46   :  { %3946 = vst [vmem:[#allocation1 + $0x6] ss:$9 sm:$0xff] %v3911_v44  ;;  %s4131_s0 = sshll.u32 %s4670_s14, 4  ;;  %s4132_s0 = int_to_ptr.vmem [resolvable:$true] %s4131_s0 }
 0xc47   :  { %3947 = vst [vmem:[#allocation1 + $0x7] ss:$9 sm:$0xff] %v3912_v8 }
 0xc4e   :  { %v3948_v3 = vld [vmem:[#allocation1] sm:$0xff] }
 0xc4f   :  { %3949 = vst [vmem:[#allocation1] ss:$9 sm:$0xff] %v3913_v39  ;;  %4450 = vmatmul.msk.f32.gmra.mxu3 %vm114_vm3, %v3948_v3 }
 0xc50   :  { %3950 = vst [vmem:[#allocation1 + $0x1] ss:$9 sm:$0xff] %v3895_v36 }
 0xc57   :  { %v3951_v16 = vld [vmem:[#allocation1] sm:$0xff] }
 0xc58   :  { %4451 = vmatmul.msk.f32.gmra.mxu3 %vm114_vm3, %v3951_v16 }
 0xcc3   :  { %v3975_v49 = vpop.f32.mrf.mxu3 }
 0xcc4   :  { %v3976_v38 = vadd.f32 %v4471_v27, %v3975_v49 }
 0xcc6   :  { %v3987_v25 = vrot.slane %v3976_v38, 1  ;;  %v3988_v60 = vrot.slane %v3976_v38, 2  ;;  %v3989_v41 = vrot.slane %v3976_v38, 3  ;;  %4002 = vst [vmem:[#allocation1] ss:$9 sm:$0xff] %v3976_v38  ;;  %v3990_v26 = vrot.slane %v3976_v38, 4 }
 0xcc7   :  { %v3991_v47 = vrot.slane %v3976_v38, 5  ;;  %v3992_v61 = vrot.slane %v3976_v38, 6  ;;  %v3993_v1 = vrot.slane %v3976_v38, 7 }
 0xcc8   :  { %4004 = vst [vmem:[#allocation1 + $0x1] ss:$9 sm:$0xff] %v3987_v25 }
 0xcc9   :  { %4006 = vst [vmem:[#allocation1 + $0x2] ss:$9 sm:$0xff] %v3988_v60 }
 0xcca   :  { %4008 = vst [vmem:[#allocation1 + $0x3] ss:$9 sm:$0xff] %v3989_v41 }
 0xccb   :  { %4010 = vst [vmem:[#allocation1 + $0x4] ss:$9 sm:$0xff] %v3990_v26 }
 0xccc   :  { %4012 = vst [vmem:[#allocation1 + $0x5] ss:$9 sm:$0xff] %v3991_v47 }
 0xccd   :  { %4014 = vst [vmem:[#allocation1 + $0x6] ss:$9 sm:$0xff] %v3992_v61 }
 0xcce   :  { %4016 = vst [vmem:[#allocation1 + $0x7] ss:$9 sm:$0xff] %v3993_v1 }
 0xcd2   :  { %v3978_v51 = vpop.f32.mrf.mxu3 }
 0xcd3   :  { %v3979_v29 = vadd.f32 %v4471_v27, %v3978_v51 }
 0xcd5   :  { %v3994_v31 = vrot.slane %v3979_v29, 1  ;;  %v3995_v42 = vrot.slane %v3979_v29, 2  ;;  %v3996_v52 = vrot.slane %v3979_v29, 3  ;;  %v4017_v57 = vld [vmem:[#allocation1] sm:$0xff]  ;;  %v3997_v55 = vrot.slane %v3979_v29, 4 }
 0xcd6   :  { %4018 = vst [vmem:[#allocation1] ss:$9 sm:$0xff] %v3979_v29  ;;  %v3998_v63 = vrot.slane %v3979_v29, 5  ;;  %v3999_v34 = vrot.slane %v3979_v29, 6  ;;  %v4000_v2 = vrot.slane %v3979_v29, 7  ;;  %v4031_v0 = vadd.f32 %v4017_v57, %v6037_v18  ;;  %v4093_v18 = vld [vmem:[%s6163_s16 + $0x18] sm:$0xff] }
 0xcd7   :  { %4019 = vst [vmem:[#allocation1] ss:$9 sm:$0xff] %v3994_v31  ;;  %4116 = vmatpush.msra.mxu1 %v4093_v18 }
 0xcd8   :  { %4020 = vst [vmem:[#allocation1 + $0x1] ss:$9 sm:$0xff] %v3995_v42 }
 0xcd9   :  { %4021 = vst [vmem:[#allocation1 + $0x2] ss:$9 sm:$0xff] %v3996_v52  ;;  %4117 = vmatpush.msra.mxu1 %v4092_v23 }
 0xcda   :  { %4022 = vst [vmem:[#allocation1 + $0x3] ss:$9 sm:$0xff] %v3997_v55 }
 0xcdb   :  { %v3981_v48 = vpop.f32.mrf.mxu3  ;;  %4023 = vst [vmem:[#allocation1 + $0x4] ss:$9 sm:$0xff] %v3998_v63  ;;  %4118 = vmatpush.msra.mxu1 %v4091_v24 }
 0xcdc   :  { %v3982_v43 = vadd.f32 %v4471_v27, %v3981_v48  ;;  %4024 = vst [vmem:[#allocation1 + $0x5] ss:$9 sm:$0xff] %v3999_v34  ;;  %v4474_v27 = vld [vmem:[%s6164_s17] ss:$0 sm:$0xff] }
 0xcdd   :  { %4025 = vst [vmem:[#allocation1 + $0x6] ss:$9 sm:$0xff] %v4000_v2  ;;  %4119 = vmatpush.msra.mxu1 %v4090_v30 }
 0xcde   :  { %4026 = vst [vmem:[#allocation1 + $0x7] ss:$9 sm:$0xff] %v3982_v43  ;;  %v4001_v7 = vrot.slane %v3982_v43, 1 }
 0xce5   :  { %v4027_v6 = vld [vmem:[#allocation1] sm:$0xff] }
 0xce6   :  { %v4032_v4 = vadd.f32 %v4027_v6, %v6043_v56  ;;  %4028 = vst [vmem:[#allocation1] ss:$9 sm:$0xff] %v4001_v7 }
 0xce8   :  { %v4037_v54 = vrot.slane %v4032_v4, 7 }
 0xcea   :  { %v4039_v59 = vsel %vm4038_vm8, %v4037_v54, %v4031_v0 }
 0xceb   :  { %v4042_v12 = vsel %vm4041_vm9, %v4039_v59, 0.0 }
 0xcec   :  { %4043 = vadd.xlane.f32.xlu0 %v4042_v12 }
 0xd5f   :  { %v4044_v10 = vpop.xlane.xlu0 %4043 }
 0xd60   :  { %v4045_v13 = vmul.f32 %v4044_v10, %v4798_v32 }
 0xd62   :  { %v4047_v53 = vrot.slane %v4045_v13, 1  ;;  %v4050_v46 = vsub.f32 %v4031_v0, %v4045_v13 }
 0xd64   :  { %v4051_v28 = vsub.f32 %v4032_v4, %v4047_v53  ;;  %v4052_v17 = vmul.f32 %v4050_v46, %v4050_v46 }
 0xd66   :  { %v4053_v14 = vmul.f32 %v4051_v28, %v4051_v28 }
 0xd68   :  { %v4056_v19 = vrot.slane %v4053_v14, 7 }
 0xd6a   :  { %v4057_v56 = vsel %vm4038_vm8, %v4056_v19, %v4052_v17 }
 0xd6b   :  { %v4059_v20 = vsel %vm4041_vm9, %v4057_v56, 0.0 }
 0xd6c   :  { %4060 = vadd.xlane.f32.xlu1 %v4059_v20 }
 0xddf   :  { %v4061_v33 = vpop.xlane.xlu1 %4060 }
 0xde0   :  { %v4062_v22 = vmul.f32 %v4061_v33, %v4798_v32 }
 0xde2   :  { %v4063_v58 = vadd.f32 1e-05, %v4062_v22 }
 0xde4   :  { %4637 = vrsqrt.f32 %v4063_v58  ;;  %vm4070_vm1 = vweird.f32 %v4063_v58 }
 0xdea   :  { %v4638_v5 = vpop.eup %4637 }
 0xdeb   :  { %v4065_v35 = vmul.f32 %v4638_v5, %v4063_v58  ;;  %vm4071_vm10 = vweird.f32 %v4638_v5 }
 0xdec   :  { %vm4072_vm2 = vmor %vm4070_vm1, %vm4071_vm10 }
 0xded   :  { %v4066_v15 = vmul.f32 %v4638_v5, %v4065_v35 }
 0xdef   :  { %v4067_v40 = vmul.f32 0.5, %v4066_v15 }
 0xdf1   :  { %v4068_v62 = vsub.f32 1.5, %v4067_v40 }
 0xdf3   :  { %v4069_v45 = vmul.f32 %v4638_v5, %v4068_v62 }
 0xdf5   :  { %v4073_v11 = vsel %vm4072_vm2, %v4638_v5, %v4069_v45 }
 0xdf6   :  { %v4075_v21 = vrot.slane %v4073_v11, 1  ;;  %v4078_v44 = vmul.f32 %v4073_v11, %v4050_v46 }
 0xdf8   :  { %v4079_v32 = vmul.f32 %v4075_v21, %v4051_v28  ;;  %v4083_v8 = vmul.f32 %v4472_v50, %v4078_v44 }
 0xdfa   :  { %v4084_v9 = vmul.f32 %v4472_v50, %v4079_v32  ;;  %v4088_v39 = vadd.f32 %v4473_v37, %v4083_v8 }
 0xdfc   :  { %v4089_v36 = vadd.f32 %v4473_v37, %v4084_v9 }
 0xdfe   :  { %v4100_v3 = vrot.slane %v4089_v36, 7 }
 0xe00   :  { %v4101_v16 = vsel %vm4038_vm8, %v4100_v3, %v4088_v39 }
 0xe01   :  { %4452 = vmatmul.msk.f32.vlgmr.msra.gmra.mxu1 %vm114_vm3, %v4101_v16 }
 0xe7e   :  { %v4121_v49 = vpop.f32.mrf.mxu1 }
 0xe7f   :  { %v4122_v38 = vadd.f32 %v4474_v27, %v4121_v49 }
 0xe81   :  { %4125 = vst.msk [vmem:[#allocation3] sm:$0x3] %vm4124_vm4, %v4122_v38 }
 0xe82   :  { %4136 = dma.vmem_to_hbm [thread:$0]  %s4132_s0, 32, %s4134_s20, [#allocation4]  }
 0xe83   :  { %4667 = dma.done.wait [#allocation4], 32  }
 0xe84   :  { %4668 = vsyncadd [#allocation4], 4294967264 }
 0xe85   :  { %4141 = vsyncpa [#allocation4], 1 }

</bundles_post_ra>
